<compile_context>
chip_gen: v6e
topology: v6e:2x2x1
jax: 0.10.0
libtpu: 0.0.40
codegen_flags: <defaults>
</compile_context>

<pallas_src>
import jax
import jax.numpy as jnp
from jax.experimental import pallas as pl
from jax.experimental.pallas import tpu as pltpu


def stn3d_kernel(x_ref, w1_ref, b1_ref, w2_ref, b2_ref, w3_ref, b3_ref,
                 fw1_ref, fb1_ref, fw2_ref, fb2_ref, fw3_ref, fb3_ref,
                 o_ref, pool_ref):
    n = pl.program_id(1)

    # ---- per-point MLP on this (TN, 3) tile (bf16 inputs, f32 accumulate) ----
    x = x_ref[0]                                                        # (TN, 3) bf16
    h = jnp.dot(x, w1_ref[...], preferred_element_type=jnp.float32) + b1_ref[...]
    h = jnp.maximum(h, 0.0)                                             # (TN, 64)
    h = jnp.dot(h.astype(jnp.bfloat16), w2_ref[...],
                preferred_element_type=jnp.float32) + b2_ref[...]
    h = jnp.maximum(h, 0.0)                                             # (TN, 128)
    h = jnp.dot(h.astype(jnp.bfloat16), w3_ref[...],
                preferred_element_type=jnp.float32) + b3_ref[...]
    h = jnp.maximum(h, 0.0)                                             # (TN, 1024)

    # ---- max-pool over points, accumulated across point tiles ----
    tile_max = jnp.max(h, axis=0, keepdims=True)                        # (1, 1024)

    @pl.when(n == 0)
    def _():
        pool_ref[...] = jnp.full_like(pool_ref, -jnp.inf)

    pool_ref[...] = jnp.maximum(pool_ref[...], tile_max)

    # ---- FC head, once per batch after the last point tile ----
    @pl.when(n == pl.num_programs(1) - 1)
    def _():
        f = pool_ref[...]                                               # (1, 1024) f32
        f = jnp.maximum(jnp.dot(f, fw1_ref[...],
                                preferred_element_type=jnp.float32) + fb1_ref[...], 0.0)
        f = jnp.maximum(jnp.dot(f, fw2_ref[...],
                                preferred_element_type=jnp.float32) + fb2_ref[...], 0.0)
        f = jnp.dot(f, fw3_ref[...],
                    preferred_element_type=jnp.float32) + fb3_ref[...]  # (1, 9); +I3 folded in
        o_ref[0] = f


def make_params(key):
    """Deterministic synthetic parameters matching STN3d shapes.

    Conv/FC weights stored as (Cin, Cout) (PyTorch Conv1d weight (Cout, Cin, 1)
    with the kernel dim squeezed and transposed for the matmul).
    """
    dims_conv = [(3, 64), (64, 128), (128, 1024)]
    dims_fc = [(1024, 512), (512, 256), (256, 9)]
    params = {}
    for i, (cin, cout) in enumerate(dims_conv, start=1):
        key, kw, kb = jax.random.split(key, 3)
        params[f"w{i}"] = jax.random.normal(kw, (cin, cout), jnp.float32) * 0.05
        params[f"b{i}"] = jax.random.normal(kb, (cout,), jnp.float32) * 0.05
    for i, (cin, cout) in enumerate(dims_fc, start=1):
        key, kw, kb = jax.random.split(key, 3)
        params[f"fw{i}"] = jax.random.normal(kw, (cin, cout), jnp.float32) * 0.05
        params[f"fb{i}"] = jax.random.normal(kb, (cout,), jnp.float32) * 0.05
    return params


def stn3d_forward(x_ncl, params, tn=128):
    """x_ncl: (B, 3, N) float32, PyTorch NCL layout.  Returns (B, 3, 3)."""
    B, c_in, N = x_ncl.shape
    assert c_in == 3
    if N % tn != 0:
        # TODO(synk): pad ragged N (repeat an existing point so the max is
        # unchanged) instead of falling back to a single full-N tile.
        tn = N
    n_tiles = N // tn

    # Channels-last + bf16 for the conv stage (f32 accumulation in-kernel).
    x = jnp.transpose(x_ncl, (0, 2, 1)).astype(jnp.bfloat16)            # (B, N, 3)
    w1 = params["w1"].astype(jnp.bfloat16); b1 = params["b1"][None, :]
    w2 = params["w2"].astype(jnp.bfloat16); b2 = params["b2"][None, :]
    w3 = params["w3"].astype(jnp.bfloat16); b3 = params["b3"][None, :]
    # FC head stays f32 (tiny); fold the 3x3 identity into the fc3 bias.
    fw1 = params["fw1"]; fb1 = params["fb1"][None, :]
    fw2 = params["fw2"]; fb2 = params["fb2"][None, :]
    fw3 = params["fw3"]
    fb3 = (params["fb3"] + jnp.eye(3, dtype=jnp.float32).reshape(9))[None, :]

    full = lambda b, n: (0, 0)  # weights/biases: single block, resident across grid

    flops = (2 * B * N * (3 * 64 + 64 * 128 + 128 * 1024)
             + 2 * B * (1024 * 512 + 512 * 256 + 256 * 9))
    bytes_accessed = int(sum(a.size * a.dtype.itemsize for a in
                             (x, w1, b1, w2, b2, w3, b3,
                              fw1, fb1, fw2, fb2, fw3, fb3)) + B * 9 * 4)

    out = pl.pallas_call(
        stn3d_kernel,
        out_shape=jax.ShapeDtypeStruct((B, 1, 9), jnp.float32),
        grid_spec=pltpu.PrefetchScalarGridSpec(
            num_scalar_prefetch=0,
            grid=(B, n_tiles),
            in_specs=[
                pl.BlockSpec((1, tn, 3), lambda b, n: (b, n, 0)),        # x tile
                pl.BlockSpec((3, 64), full),     pl.BlockSpec((1, 64), full),
                pl.BlockSpec((64, 128), full),   pl.BlockSpec((1, 128), full),
                pl.BlockSpec((128, 1024), full), pl.BlockSpec((1, 1024), full),
                pl.BlockSpec((1024, 512), full), pl.BlockSpec((1, 512), full),
                pl.BlockSpec((512, 256), full),  pl.BlockSpec((1, 256), full),
                pl.BlockSpec((256, 9), full),    pl.BlockSpec((1, 9), full),
            ],
            out_specs=pl.BlockSpec((1, 1, 9), lambda b, n: (b, 0, 0)),
            scratch_shapes=[pltpu.VMEM((1, 1024), jnp.float32)],         # max-pool acc
        ),
        compiler_params=pltpu.CompilerParams(
            dimension_semantics=("parallel", "arbitrary")),
        cost_estimate=pl.CostEstimate(flops=flops, transcendentals=0,
                                      bytes_accessed=bytes_accessed),
    )(x, w1, b1, w2, b2, w3, b3, fw1, fb1, fw2, fb2, fw3, fb3)

    return out.reshape(B, 3, 3)


def stn3d_reference(x_ncl, params):
    """Plain-JAX reference using the same bf16 conv-stage casting as the kernel."""
    B = x_ncl.shape[0]
    x = jnp.transpose(x_ncl, (0, 2, 1)).astype(jnp.bfloat16)            # (B, N, 3)
    w1 = params["w1"].astype(jnp.bfloat16)
    w2 = params["w2"].astype(jnp.bfloat16)
    w3 = params["w3"].astype(jnp.bfloat16)
    h = jnp.maximum(jnp.dot(x, w1, preferred_element_type=jnp.float32)
                    + params["b1"], 0.0)
    h = jnp.maximum(jnp.dot(h.astype(jnp.bfloat16), w2,
                            preferred_element_type=jnp.float32) + params["b2"], 0.0)
    h = jnp.maximum(jnp.dot(h.astype(jnp.bfloat16), w3,
                            preferred_element_type=jnp.float32) + params["b3"], 0.0)
    f = jnp.max(h, axis=1)                                               # (B, 1024)
    f = jnp.maximum(f @ params["fw1"] + params["fb1"], 0.0)
    f = jnp.maximum(f @ params["fw2"] + params["fb2"], 0.0)
    f = f @ params["fw3"] + params["fb3"]
    f = f + jnp.eye(3, dtype=jnp.float32).reshape(1, 9)
    return f.reshape(B, 3, 3)


if __name__ == "__main__":
    B, N = 2, 256            # small stand-in for the default num_points=2500

    key = jax.random.PRNGKey(0)
    key, kx = jax.random.split(key)
    x = jax.random.normal(kx, (B, 3, N), jnp.float32)                    # PyTorch NCL
    params = make_params(key)

    y = stn3d_forward(x, params)
    y = jax.block_until_ready(y)

    y_ref = stn3d_reference(x, params)
    assert y.shape == (B, 3, 3)
    assert jnp.allclose(y, y_ref, atol=1e-3, rtol=1e-3), \
        float(jnp.max(jnp.abs(y - y_ref)))

    print("KERNEL_OK")
</pallas_src>

<mosaic_0001>
module attributes {stable_mosaic.version = 11 : i64} {
  func.func @stn3d_kernel(%arg0: i32, %arg1: i32, %arg2: memref<1x128x3xbf16, #tpu.memory_space<vmem>>, %arg3: memref<3x64xbf16, #tpu.memory_space<vmem>>, %arg4: memref<1x64xf32, #tpu.memory_space<vmem>>, %arg5: memref<64x128xbf16, #tpu.memory_space<vmem>>, %arg6: memref<1x128xf32, #tpu.memory_space<vmem>>, %arg7: memref<128x1024xbf16, #tpu.memory_space<vmem>>, %arg8: memref<1x1024xf32, #tpu.memory_space<vmem>>, %arg9: memref<1024x512xf32, #tpu.memory_space<vmem>>, %arg10: memref<1x512xf32, #tpu.memory_space<vmem>>, %arg11: memref<512x256xf32, #tpu.memory_space<vmem>>, %arg12: memref<1x256xf32, #tpu.memory_space<vmem>>, %arg13: memref<256x9xf32, #tpu.memory_space<vmem>>, %arg14: memref<1x9xf32, #tpu.memory_space<vmem>>, %arg15: memref<1x1x9xf32, #tpu.memory_space<vmem>>, %arg16: memref<1x1024xf32, #tpu.memory_space<vmem>>) attributes {dimension_semantics = [#tpu.dimension_semantics<parallel>, #tpu.dimension_semantics<arbitrary>], iteration_bounds = array<i64: 2, 2>, scalar_prefetch = 0 : i64, scratch_operands = 1 : i64, tpu.core_type = #tpu.core_type<tc>, window_params = [{transform_indices = @transform_0, window_bounds = array<i64: 1, 128, 3>}, {pipeline_mode = #tpu.pipeline_mode<synchronous>, transform_indices = @transform_1, window_bounds = array<i64: 3, 64>}, {pipeline_mode = #tpu.pipeline_mode<synchronous>, transform_indices = @transform_2, window_bounds = array<i64: 1, 64>}, {pipeline_mode = #tpu.pipeline_mode<synchronous>, transform_indices = @transform_3, window_bounds = array<i64: 64, 128>}, {pipeline_mode = #tpu.pipeline_mode<synchronous>, transform_indices = @transform_4, window_bounds = array<i64: 1, 128>}, {pipeline_mode = #tpu.pipeline_mode<synchronous>, transform_indices = @transform_5, window_bounds = array<i64: 128, 1024>}, {pipeline_mode = #tpu.pipeline_mode<synchronous>, transform_indices = @transform_6, window_bounds = array<i64: 1, 1024>}, {pipeline_mode = #tpu.pipeline_mode<synchronous>, transform_indices = @transform_7, window_bounds = array<i64: 1024, 512>}, {pipeline_mode = #tpu.pipeline_mode<synchronous>, transform_indices = @transform_8, window_bounds = array<i64: 1, 512>}, {pipeline_mode = #tpu.pipeline_mode<synchronous>, transform_indices = @transform_9, window_bounds = array<i64: 512, 256>}, {pipeline_mode = #tpu.pipeline_mode<synchronous>, transform_indices = @transform_10, window_bounds = array<i64: 1, 256>}, {pipeline_mode = #tpu.pipeline_mode<synchronous>, transform_indices = @transform_11, window_bounds = array<i64: 256, 9>}, {pipeline_mode = #tpu.pipeline_mode<synchronous>, transform_indices = @transform_12, window_bounds = array<i64: 1, 9>}, {transform_indices = @transform_13, window_bounds = array<i64: 1, 1, 9>}]} {
    %c0 = arith.constant 0 : index
    %c0_0 = arith.constant 0 : index
    %c0_1 = arith.constant 0 : index
    %0 = vector.load %arg2[%c0, %c0_0, %c0_1] : memref<1x128x3xbf16, #tpu.memory_space<vmem>>, vector<1x128x3xbf16>
    %1 = vector.shape_cast %0 : vector<1x128x3xbf16> to vector<128x3xbf16>
    %c0_2 = arith.constant 0 : index
    %c0_3 = arith.constant 0 : index
    %2 = vector.load %arg3[%c0_2, %c0_3] : memref<3x64xbf16, #tpu.memory_space<vmem>>, vector<3x64xbf16>
    %cst = arith.constant dense<0.000000e+00> : vector<128x64xf32>
    %3 = tpu.matmul %1, %2, %cst {dimension_numbers = #tpu.dot_dimension_numbers<[1], [0], [0], [1], [0, 0, 1, 1], [], []>} : vector<128x3xbf16>, vector<3x64xbf16>, vector<128x64xf32> -> vector<128x64xf32>
    %c0_4 = arith.constant 0 : index
    %c0_5 = arith.constant 0 : index
    %4 = vector.load %arg4[%c0_4, %c0_5] : memref<1x64xf32, #tpu.memory_space<vmem>>, vector<1x64xf32>
    %5 = vector.broadcast %4 : vector<1x64xf32> to vector<128x64xf32>
    %6 = arith.addf %3, %5 : vector<128x64xf32>
    %cst_6 = arith.constant 0.000000e+00 : f32
    %7 = vector.broadcast %cst_6 : f32 to vector<128x64xf32>
    %8 = arith.maximumf %6, %7 : vector<128x64xf32>
    %9 = arith.truncf %8 : vector<128x64xf32> to vector<128x64xbf16>
    %c0_7 = arith.constant 0 : index
    %c0_8 = arith.constant 0 : index
    %10 = vector.load %arg5[%c0_7, %c0_8] : memref<64x128xbf16, #tpu.memory_space<vmem>>, vector<64x128xbf16>
    %cst_9 = arith.constant dense<0.000000e+00> : vector<128x128xf32>
    %11 = tpu.matmul %9, %10, %cst_9 {dimension_numbers = #tpu.dot_dimension_numbers<[1], [0], [0], [1], [0, 0, 1, 1], [], []>} : vector<128x64xbf16>, vector<64x128xbf16>, vector<128x128xf32> -> vector<128x128xf32>
    %c0_10 = arith.constant 0 : index
    %c0_11 = arith.constant 0 : index
    %12 = vector.load %arg6[%c0_10, %c0_11] : memref<1x128xf32, #tpu.memory_space<vmem>>, vector<1x128xf32>
    %13 = vector.broadcast %12 : vector<1x128xf32> to vector<128x128xf32>
    %14 = arith.addf %11, %13 : vector<128x128xf32>
    %cst_12 = arith.constant 0.000000e+00 : f32
    %15 = vector.broadcast %cst_12 : f32 to vector<128x128xf32>
    %16 = arith.maximumf %14, %15 : vector<128x128xf32>
    %17 = arith.truncf %16 : vector<128x128xf32> to vector<128x128xbf16>
    %c0_13 = arith.constant 0 : index
    %c0_14 = arith.constant 0 : index
    %18 = vector.load %arg7[%c0_13, %c0_14] : memref<128x1024xbf16, #tpu.memory_space<vmem>>, vector<128x1024xbf16>
    %cst_15 = arith.constant dense<0.000000e+00> : vector<128x1024xf32>
    %19 = tpu.matmul %17, %18, %cst_15 {dimension_numbers = #tpu.dot_dimension_numbers<[1], [0], [0], [1], [0, 0, 1, 1], [], []>} : vector<128x128xbf16>, vector<128x1024xbf16>, vector<128x1024xf32> -> vector<128x1024xf32>
    %c0_16 = arith.constant 0 : index
    %c0_17 = arith.constant 0 : index
    %20 = vector.load %arg8[%c0_16, %c0_17] : memref<1x1024xf32, #tpu.memory_space<vmem>>, vector<1x1024xf32>
    %21 = vector.broadcast %20 : vector<1x1024xf32> to vector<128x1024xf32>
    %22 = arith.addf %19, %21 : vector<128x1024xf32>
    %cst_18 = arith.constant 0.000000e+00 : f32
    %23 = vector.broadcast %cst_18 : f32 to vector<128x1024xf32>
    %24 = arith.maximumf %22, %23 : vector<128x1024xf32>
    %cst_19 = arith.constant dense<0xFF800000> : vector<1024xf32>
    %25 = vector.multi_reduction <maximumf>, %24, %cst_19 [0] : vector<128x1024xf32> to vector<1024xf32>
    %26 = vector.shape_cast %25 : vector<1024xf32> to vector<1x1024xf32>
    %c0_i32 = arith.constant 0 : i32
    %27 = arith.cmpi eq, %arg1, %c0_i32 : i32
    %28 = arith.extui %27 : i1 to i32
    %c0_i32_20 = arith.constant 0 : i32
    %29 = arith.cmpi ne, %28, %c0_i32_20 : i32
    scf.if %29 {
      %cst_26 = arith.constant 0xFF800000 : f32
      %36 = vector.broadcast %cst_26 : f32 to vector<1x1024xf32>
      %c0_27 = arith.constant 0 : index
      %c0_28 = arith.constant 0 : index
      %37 = vector.load %arg16[%c0_27, %c0_28] : memref<1x1024xf32, #tpu.memory_space<vmem>>, vector<1x1024xf32>
      tpu.vector_store %arg16[%c0_27, %c0_28], %36 {strides = array<i32>} : memref<1x1024xf32, #tpu.memory_space<vmem>>, vector<1x1024xf32>,
    } else {
    }
    %c0_21 = arith.constant 0 : index
    %c0_22 = arith.constant 0 : index
    %30 = vector.load %arg16[%c0_21, %c0_22] : memref<1x1024xf32, #tpu.memory_space<vmem>>, vector<1x1024xf32>
    %31 = arith.maximumf %30, %26 : vector<1x1024xf32>
    %c0_23 = arith.constant 0 : index
    %c0_24 = arith.constant 0 : index
    %32 = vector.load %arg16[%c0_23, %c0_24] : memref<1x1024xf32, #tpu.memory_space<vmem>>, vector<1x1024xf32>
    tpu.vector_store %arg16[%c0_23, %c0_24], %31 {strides = array<i32>} : memref<1x1024xf32, #tpu.memory_space<vmem>>, vector<1x1024xf32>,
    %c1_i32 = arith.constant 1 : i32
    %33 = arith.cmpi eq, %arg1, %c1_i32 : i32
    %34 = arith.extui %33 : i1 to i32
    %c0_i32_25 = arith.constant 0 : i32
    %35 = arith.cmpi ne, %34, %c0_i32_25 : i32
    scf.if %35 {
      %c0_26 = arith.constant 0 : index
      %c0_27 = arith.constant 0 : index
      %36 = vector.load %arg16[%c0_26, %c0_27] : memref<1x1024xf32, #tpu.memory_space<vmem>>, vector<1x1024xf32>
      %c0_28 = arith.constant 0 : index
      %c0_29 = arith.constant 0 : index
      %37 = vector.load %arg9[%c0_28, %c0_29] : memref<1024x512xf32, #tpu.memory_space<vmem>>, vector<1024x512xf32>
      %cst_30 = arith.constant dense<0.000000e+00> : vector<1x512xf32>
      %38 = tpu.matmul %36, %37, %cst_30 {dimension_numbers = #tpu.dot_dimension_numbers<[1], [0], [0], [1], [0, 0, 1, 1], [], []>} : vector<1x1024xf32>, vector<1024x512xf32>, vector<1x512xf32> -> vector<1x512xf32>
      %c0_31 = arith.constant 0 : index
      %c0_32 = arith.constant 0 : index
      %39 = vector.load %arg10[%c0_31, %c0_32] : memref<1x512xf32, #tpu.memory_space<vmem>>, vector<1x512xf32>
      %40 = arith.addf %38, %39 : vector<1x512xf32>
      %cst_33 = arith.constant 0.000000e+00 : f32
      %41 = vector.broadcast %cst_33 : f32 to vector<1x512xf32>
      %42 = arith.maximumf %40, %41 : vector<1x512xf32>
      %c0_34 = arith.constant 0 : index
      %c0_35 = arith.constant 0 : index
      %43 = vector.load %arg11[%c0_34, %c0_35] : memref<512x256xf32, #tpu.memory_space<vmem>>, vector<512x256xf32>
      %cst_36 = arith.constant dense<0.000000e+00> : vector<1x256xf32>
      %44 = tpu.matmul %42, %43, %cst_36 {dimension_numbers = #tpu.dot_dimension_numbers<[1], [0], [0], [1], [0, 0, 1, 1], [], []>} : vector<1x512xf32>, vector<512x256xf32>, vector<1x256xf32> -> vector<1x256xf32>
      %c0_37 = arith.constant 0 : index
      %c0_38 = arith.constant 0 : index
      %45 = vector.load %arg12[%c0_37, %c0_38] : memref<1x256xf32, #tpu.memory_space<vmem>>, vector<1x256xf32>
      %46 = arith.addf %44, %45 : vector<1x256xf32>
      %cst_39 = arith.constant 0.000000e+00 : f32
      %47 = vector.broadcast %cst_39 : f32 to vector<1x256xf32>
      %48 = arith.maximumf %46, %47 : vector<1x256xf32>
      %c0_40 = arith.constant 0 : index
      %c0_41 = arith.constant 0 : index
      %49 = vector.load %arg13[%c0_40, %c0_41] : memref<256x9xf32, #tpu.memory_space<vmem>>, vector<256x9xf32>
      %cst_42 = arith.constant dense<0.000000e+00> : vector<1x9xf32>
      %50 = tpu.matmul %48, %49, %cst_42 {dimension_numbers = #tpu.dot_dimension_numbers<[1], [0], [0], [1], [0, 0, 1, 1], [], []>} : vector<1x256xf32>, vector<256x9xf32>, vector<1x9xf32> -> vector<1x9xf32>
      %c0_43 = arith.constant 0 : index
      %c0_44 = arith.constant 0 : index
      %51 = vector.load %arg14[%c0_43, %c0_44] : memref<1x9xf32, #tpu.memory_space<vmem>>, vector<1x9xf32>
      %52 = arith.addf %50, %51 : vector<1x9xf32>
      %c0_45 = arith.constant 0 : index
      %c0_46 = arith.constant 0 : index
      %c0_47 = arith.constant 0 : index
      %53 = vector.load %arg15[%c0_45, %c0_46, %c0_47] : memref<1x1x9xf32, #tpu.memory_space<vmem>>, vector<1x1x9xf32>
      %54 = vector.shape_cast %53 : vector<1x1x9xf32> to vector<1x9xf32>
      %55 = vector.shape_cast %52 : vector<1x9xf32> to vector<1x1x9xf32>
      tpu.vector_store %arg15[%c0_45, %c0_46, %c0_47], %55 {strides = array<i32>} : memref<1x1x9xf32, #tpu.memory_space<vmem>>, vector<1x1x9xf32>,
    } else {
    }
    return
  }
  func.func @transform_0(%arg0: i32, %arg1: i32) -> (i32, i32, i32) {
    %c0_i32 = arith.constant 0 : i32
    %c0_i32_0 = arith.constant 0 : i32
    return %arg0, %arg1, %c0_i32 : i32, i32, i32
  }
  func.func @transform_1(%arg0: i32, %arg1: i32) -> (i32, i32) {
    %c0_i32 = arith.constant 0 : i32
    %c0_i32_0 = arith.constant 0 : i32
    %c0_i32_1 = arith.constant 0 : i32
    return %c0_i32, %c0_i32_0 : i32, i32
  }
  func.func @transform_2(%arg0: i32, %arg1: i32) -> (i32, i32) {
    %c0_i32 = arith.constant 0 : i32
    %c0_i32_0 = arith.constant 0 : i32
    %c0_i32_1 = arith.constant 0 : i32
    return %c0_i32, %c0_i32_0 : i32, i32
  }
  func.func @transform_3(%arg0: i32, %arg1: i32) -> (i32, i32) {
    %c0_i32 = arith.constant 0 : i32
    %c0_i32_0 = arith.constant 0 : i32
    %c0_i32_1 = arith.constant 0 : i32
    return %c0_i32, %c0_i32_0 : i32, i32
  }
  func.func @transform_4(%arg0: i32, %arg1: i32) -> (i32, i32) {
    %c0_i32 = arith.constant 0 : i32
    %c0_i32_0 = arith.constant 0 : i32
    %c0_i32_1 = arith.constant 0 : i32
    return %c0_i32, %c0_i32_0 : i32, i32
  }
  func.func @transform_5(%arg0: i32, %arg1: i32) -> (i32, i32) {
    %c0_i32 = arith.constant 0 : i32
    %c0_i32_0 = arith.constant 0 : i32
    %c0_i32_1 = arith.constant 0 : i32
    return %c0_i32, %c0_i32_0 : i32, i32
  }
  func.func @transform_6(%arg0: i32, %arg1: i32) -> (i32, i32) {
    %c0_i32 = arith.constant 0 : i32
    %c0_i32_0 = arith.constant 0 : i32
    %c0_i32_1 = arith.constant 0 : i32
    return %c0_i32, %c0_i32_0 : i32, i32
  }
  func.func @transform_7(%arg0: i32, %arg1: i32) -> (i32, i32) {
    %c0_i32 = arith.constant 0 : i32
    %c0_i32_0 = arith.constant 0 : i32
    %c0_i32_1 = arith.constant 0 : i32
    return %c0_i32, %c0_i32_0 : i32, i32
  }
  func.func @transform_8(%arg0: i32, %arg1: i32) -> (i32, i32) {
    %c0_i32 = arith.constant 0 : i32
    %c0_i32_0 = arith.constant 0 : i32
    %c0_i32_1 = arith.constant 0 : i32
    return %c0_i32, %c0_i32_0 : i32, i32
  }
  func.func @transform_9(%arg0: i32, %arg1: i32) -> (i32, i32) {
    %c0_i32 = arith.constant 0 : i32
    %c0_i32_0 = arith.constant 0 : i32
    %c0_i32_1 = arith.constant 0 : i32
    return %c0_i32, %c0_i32_0 : i32, i32
  }
  func.func @transform_10(%arg0: i32, %arg1: i32) -> (i32, i32) {
    %c0_i32 = arith.constant 0 : i32
    %c0_i32_0 = arith.constant 0 : i32
    %c0_i32_1 = arith.constant 0 : i32
    return %c0_i32, %c0_i32_0 : i32, i32
  }
  func.func @transform_11(%arg0: i32, %arg1: i32) -> (i32, i32) {
    %c0_i32 = arith.constant 0 : i32
    %c0_i32_0 = arith.constant 0 : i32
    %c0_i32_1 = arith.constant 0 : i32
    return %c0_i32, %c0_i32_0 : i32, i32
  }
  func.func @transform_12(%arg0: i32, %arg1: i32) -> (i32, i32) {
    %c0_i32 = arith.constant 0 : i32
    %c0_i32_0 = arith.constant 0 : i32
    %c0_i32_1 = arith.constant 0 : i32
    return %c0_i32, %c0_i32_0 : i32, i32
  }
  func.func @transform_13(%arg0: i32, %arg1: i32) -> (i32, i32, i32) {
    %c0_i32 = arith.constant 0 : i32
    %c0_i32_0 = arith.constant 0 : i32
    %c0_i32_1 = arith.constant 0 : i32
    return %arg0, %c0_i32, %c0_i32_0 : i32, i32, i32
  }
}

</mosaic_0001>

<bundles_post_ra>
// kernel: tpu_custom_call.1
= control target key start
LH: loop header
LB: loop body
LE: loop exit
PB: predicated region body
PF: predicated region fallthrough
CT: control target
= control target key end

     0   :  { %s5651_s0 = inlined_call_operand.vmem [shape: bf16[2,256,3], index: 0, kind: input, shape index: {}]   ;;  %s5652_s1 = inlined_call_operand.hbm [shape: bf16[3,64], index: 1, kind: input, shape index: {}]   ;;  %s5653_s2 = inlined_call_operand.hbm [shape: f32[1,64], index: 2, kind: input, shape index: {}]   ;;  %s5654_s3 = inlined_call_operand.hbm [shape: bf16[64,128], index: 3, kind: input, shape index: {}]   ;;  %s5655_s4 = inlined_call_operand.hbm [shape: f32[1,128], index: 4, kind: input, shape index: {}]   ;;  %s5656_s5 = inlined_call_operand.hbm [shape: bf16[128,1024], index: 5, kind: input, shape index: {}]   ;;  %s5657_s6 = inlined_call_operand.hbm [shape: f32[1,1024], index: 6, kind: input, shape index: {}]   ;;  %s5658_s7 = inlined_call_operand.hbm [shape: f32[1024,512], index: 7, kind: input, shape index: {}]   ;;  %s5659_s8 = inlined_call_operand.hbm [shape: f32[1,512], index: 8, kind: input, shape index: {}]   ;;  %s5660_s9 = inlined_call_operand.hbm [shape: f32[512,256], index: 9, kind: input, shape index: {}]   ;;  %s5661_s10 = inlined_call_operand.hbm [shape: f32[1,256], index: 10, kind: input, shape index: {}]   ;;  %s5662_s11 = inlined_call_operand.vmem [shape: f32[256,9], index: 11, kind: input, shape index: {}]   ;;  %s5663_s12 = inlined_call_operand.hbm [shape: f32[1,9], index: 12, kind: input, shape index: {}]   ;;  %s5664_s13 = inlined_call_operand.hbm [shape: f32[2,1,9], index: 13, kind: output, shape index: {}]  }
   0x1   :  { %5677 = sst [smem:[#allocation38_spill]] %s5652_s1 }
   0x2   :  { %5678 = sst [smem:[#allocation39_spill]] %s5653_s2 }
   0x3   :  { %18 = vsyncpa [#allocation4], 0 }
   0x4   :  { %19 = vsyncpa [#allocation7], 0 }
   0x5   :  { %20 = vsyncpa [#allocation10], 0 }
   0x6   :  { %21 = vsyncpa [#allocation13], 0 }
   0x7   :  { %22 = vsyncpa [#allocation16], 0 }
   0x8   :  { %23 = vsyncpa [#allocation19], 0 }
   0x9   :  { %24 = vsyncpa [#allocation5], 0 }
   0xa   :  { %26 = vsyncpa [#allocation5 + $0x1], 0  ;;  %s4915_s25 = smov 0   ;;  %s4917_s26 = smov 0  }
   0xb   :  { %s4919_s27 = smov 0   ;;  %s4921_s28 = smov 0  }
   0xc   :  { %s4923_s29 = smov 0   ;;  %s4925_s30 = smov 0  }
   0xd   :  { %s4927_s14 = smov 0   ;;  %s4929_s15 = smov 0  }
   0xe LB: > { %5679 = sst [smem:[#allocation29_spill]] %s4793_s25  ;;  %s3988_s16 = sadd.s32 4294967295, %s4821_s15   ;;  %s4821_s15 = sphi %s4929_s15, %s32_s15   ;;  %s4817_s14 = sphi %s4927_s14, %s5708_s14   ;;  %s4813_s30 = sphi %s4925_s30, %s5707_s30   ;;  %s4809_s29 = sphi %s4923_s29, %s5706_s29   ;;  %s4805_s28 = sphi %s4921_s28, %s5705_s28   ;;  %s4801_s27 = sphi %s4919_s27, %s5704_s27   ;;  %s4797_s26 = sphi %s4917_s26, %s5710_s26   ;;  %s4793_s25 = sphi %s4915_s25, %s5709_s25  }
   0xf   : > { %5680 = sst [smem:[#allocation30_spill]] %s4801_s27  ;;  %s3989_s17 = sadd.s32 4294967294, %s4821_s15  }
  0x10   : > { %5681 = sst [smem:[#allocation31_spill]] %s4813_s30  ;;  %s41_s18 = sadd.s32 1, %s4813_s30 }
  0x11   : > { %5682 = sst [smem:[#allocation32_spill]] %s4817_s14  ;;  %s44_s19 = sadd.s32 1, %s4817_s14 }
  0x12   : > { %5683 = sst [smem:[#allocation33_spill]] %s4821_s15  ;;  %p42_p0 = scmp.ge.s32.totalorder %s41_s18, 2 }
  0x13   : > { %s331_s20 = sadd.s32 1, %s4801_s27  ;;  %p341_p1 = scmp.ne.s32.totalorder %s4801_s27, %s4797_s26 }
  0x14   : > { %p342_p2 = scmp.eq.s32.totalorder %s3988_s16, 3  ;;  %s5712_s18 = smov (%p42_p0, %s41_s18), 0 }
  0x15   : > { %5684 = sst [smem:[#allocation34_spill]] %s5712_s18  ;;  %s5714_s19 = smov (!%p42_p0, %s44_s19), %s4817_s14 }
  0x16   : > { %p4965_p3 = por %p342_p2, %p341_p1  ;;  %p347_p4 = scmp.ne.s32.totalorder %s4797_s26, %s4793_s25 }
  0x17   : > { %p46_p5 = scmp.ge.s32.totalorder %s5714_s19, 2  ;;  %p348_p6 = scmp.eq.s32.totalorder %s3989_s17, 3 }
  0x18   : > { %s5685_s21 = scalar_select %p4965_p3, 1, 0 }
  0x19   : > { %p3990_p7 = scmp.ge.s32.totalorder %s4821_s15, 1  ;;  %p355_p8 = scmp.lt.s32.totalorder %s4821_s15, 5 }
  0x1a   : > { %s5716_s19 = smov (%p46_p5, %s5714_s19), 0  ;;  %p4975_p9 = por %p348_p6, %p347_p4 }
  0x1b   : > { %5686 = sst [smem:[#allocation35_spill]] %s5716_s19  ;;  %p4979_p10 = pnand %p3990_p7, %p355_p8 }
  0x1c   : > { %s5687_s22 = scalar_select %p4975_p9, 1, 0 }
  0x1d   : > { %s5689_s23 = scalar_select %p4979_p10, 1, 0 }
  0x1e   : > { %5688 = sst [smem:[#allocation36_spill]] %s5687_s22  ;;  %s328_s24 = ssub.s32 %s4817_s14, %s5716_s19 }
  0x1f   : > { %p329_p11 = scmp.eq.s32.totalorder %s328_s24, 0  ;;  %p4261_p12 = pneg %p4979_p10 }
  0x20   : > { %p4987_p13 = scmp.eq.s32.totalorder %s3988_s16, 0  ;;  %s4823_s22 = smov [#allocation6]  }
  0x21   : > { %s4992_s18 = scalar_select %p329_p11, %s4801_s27, %s331_s20  }
  0x22   : > { %s5690_s17 = scalar_select %p4987_p13, 1, 0 }
  0x23   : > { %5691 = sst [smem:[#allocation37_spill]] %s4992_s18  ;;  %p4996_p0 = pnand %p4987_p13, %p4261_p12 }
  0x24   : > { %s379_s25 = sshll.u32 %s4823_s22, 4  ;;  %s4824_s19 = smov [#allocation9]   ;;  %s380_s25 = int_to_ptr.vmem [resolvable:$true] %s379_s25 }
  0x25   : > { %s403_s24 = sshll.u32 %s4824_s19, 4  ;;  %p5002_p1 = pneg %p4996_p0  ;;  %s404_s24 = int_to_ptr.vmem [resolvable:$true] %s403_s24 }
  0x26   : > { %s4430_s14 = scalar_lea.vmem %s380_s25, 16  ;;  %s4437_s20 = scalar_lea.vmem %s380_s25, 32 }
  0x27   : > { %p4431_p2 = scmp.ne.s32.totalorder %s380_s25, %s4430_s14  ;;  %p4438_p6 = scmp.lt.s32.totalorder %s380_s25, %s380_s25 }
  0x28   : > { %p4439_p7 = scmp.lt.s32.totalorder %s4437_s20, %s4430_s14 }
  0x29   : > { %p4433_p4 = pnand %p4431_p2, %p5002_p1 }
  0x2a   : > { %p4440_p8 = por %p4439_p7, %p4438_p6 }
  0x2b   : > { %p4434_p5 = pneg %p4433_p4 }
  0x2d   : > { %p4441_p11 = pnand %p4440_p8, %p4434_p5 }
  0x2f   : > { %4444 = shalt.err (!%p4441_p11)
}
  0x30   : > { %s5694_s2 = sld [smem:[#allocation39_spill]]  ;;  %s4456_s18 = scalar_lea.vmem %s404_s24, 16 }
  0x31   : > { %p4457_p12 = scmp.ne.s32.totalorder %s404_s24, %s4456_s18  ;;  %s4463_s27 = scalar_lea.vmem %s404_s24, 32 }
  0x32   : > { %p4464_p4 = scmp.lt.s32.totalorder %s404_s24, %s404_s24  ;;  %p4465_p3 = scmp.lt.s32.totalorder %s4463_s27, %s4456_s18 }
  0x33   : > { %p4459_p9 = pnand %p4457_p12, %p5002_p1 }
  0x34   : > { %p4466_p13 = por %p4465_p3, %p4464_p4 }
  0x35   : > { %p4460_p2 = pneg %p4459_p9 }
  0x36   : > { %4267 = dma.hbm_to_vmem [thread:$0]  (!%p4996_p0), %s5694_s2, 16, %s380_s25, [#allocation7]  }
  0x37   : > { %p4467_p6 = pnand %p4466_p13, %p4460_p2 }
  0x39   : > { %4470 = shalt.err (!%p4467_p6)
}
  0x3a   : > { %4273 = dma.hbm_to_vmem [thread:$0]  (!%p4996_p0), %s5655_s4, 16, %s404_s24, [#allocation10]  }
  0x3b   : > { %s4825_s25 = smov [#allocation12]   ;;  %s4826_s22 = smov [#allocation15]  }
  0x3c   : > { %s427_s19 = sshll.u32 %s4825_s25, 4  ;;  %s451_s2 = sshll.u32 %s4826_s22, 4  ;;  %s428_s19 = int_to_ptr.vmem [resolvable:$true] %s427_s19  ;;  %s452_s2 = int_to_ptr.vmem [resolvable:$true] %s451_s2 }
  0x3d   : > { %s4482_s15 = scalar_lea.vmem %s428_s19, 128  ;;  %p4490_p3 = scmp.lt.s32.totalorder %s428_s19, %s428_s19 }
  0x3e   : > { %p4483_p9 = scmp.ne.s32.totalorder %s428_s19, %s4482_s15  ;;  %p4491_p13 = scmp.lt.s32.totalorder %s4482_s15, %s4482_s15 }
  0x40   : > { %p4485_p5 = pnand %p4483_p9, %p5002_p1  ;;  %p4492_p8 = por %p4491_p13, %p4490_p3 }
  0x42   : > { %p4486_p7 = pneg %p4485_p5 }
  0x44   : > { %p4493_p11 = pnand %p4492_p8, %p4486_p7 }
  0x46   : > { %4496 = shalt.err (!%p4493_p11)
}
  0x47   : > { %4279 = dma.hbm_to_vmem [thread:$0]  (!%p4996_p0), %s5657_s6, 128, %s428_s19, [#allocation13]  }
  0x48   : > { %s4508_s24 = scalar_lea.vmem %s452_s2, 64  ;;  %p4516_p6 = scmp.lt.s32.totalorder %s452_s2, %s452_s2 }
  0x49   : > { %p4509_p12 = scmp.ne.s32.totalorder %s452_s2, %s4508_s24  ;;  %p4517_p9 = scmp.lt.s32.totalorder %s4508_s24, %s4508_s24 }
  0x4b   : > { %p4511_p2 = pnand %p4509_p12, %p5002_p1  ;;  %p4518_p5 = por %p4517_p9, %p4516_p6 }
  0x4d   : > { %p4512_p4 = pneg %p4511_p2 }
  0x4f   : > { %p4519_p10 = pnand %p4518_p5, %p4512_p4 }
  0x51   : > { %4522 = shalt.err (!%p4519_p10)
}
  0x52   : > { %4285 = dma.hbm_to_vmem [thread:$0]  (!%p4996_p0), %s5659_s8, 64, %s452_s2, [#allocation16]  }
  0x53   : > { %s4827_s20 = smov [#allocation18]  }
  0x54   : > { %s475_s25 = sshll.u32 %s4827_s20, 4  ;;  %s476_s25 = int_to_ptr.vmem [resolvable:$true] %s475_s25 }
  0x55   : > { %s4534_s19 = scalar_lea.vmem %s476_s25, 32  ;;  %p4542_p8 = scmp.lt.s32.totalorder %s476_s25, %s476_s25 }
  0x56   : > { %p4535_p7 = scmp.ne.s32.totalorder %s476_s25, %s4534_s19  ;;  %p4543_p11 = scmp.lt.s32.totalorder %s4534_s19, %s4534_s19 }
  0x58   : > { %p4537_p3 = pnand %p4535_p7, %p5002_p1  ;;  %p4544_p12 = por %p4543_p11, %p4542_p8 }
  0x5a   : > { %p4538_p13 = pneg %p4537_p3 }
  0x5c   : > { %p4545_p2 = pnand %p4544_p12, %p4538_p13 }
  0x5e   : > { %4548 = shalt.err (!%p4545_p2)
}
  0x5f   : > { %4291 = dma.hbm_to_vmem [thread:$0]  (!%p4996_p0), %s5661_s10, 32, %s476_s25, [#allocation19]  }
  0x60   : > { %s4828_s2 = smov [#allocation3]   ;;  %s4829_s24 = smov [#allocation8]  }
  0x61   : > { %s368_s18 = sshll.u32 %s4828_s2, 4  ;;  %s389_s15 = sshll.u32 %s4829_s24, 4  ;;  %s369_s18 = int_to_ptr.vmem [resolvable:$true] %s368_s18  ;;  %s390_s15 = int_to_ptr.vmem [resolvable:$true] %s389_s15 }
  0x62   : > { %s4560_s14 = scalar_lea.vmem %s369_s18, 32  ;;  %p4568_p9 = scmp.lt.s32.totalorder %s369_s18, %s369_s18 }
  0x63   : > { %p4561_p10 = scmp.ne.s32.totalorder %s369_s18, %s4560_s14  ;;  %p4569_p5 = scmp.lt.s32.totalorder %s4560_s14, %s4560_s14 }
  0x65   : > { %p4563_p4 = pnand %p4561_p10, %p5002_p1  ;;  %p4570_p7 = por %p4569_p5, %p4568_p9 }
  0x67   : > { %p4564_p6 = pneg %p4563_p4 }
  0x69   : > { %p4571_p3 = pnand %p4570_p7, %p4564_p6 }
  0x6b   : > { %4574 = shalt.err (!%p4571_p3)
}
  0x6c   : > { %s5695_s1 = sld [smem:[#allocation38_spill]]  ;;  %s4586_s19 = scalar_lea.vmem %s390_s15, 512 }
  0x6d   : > { %p4587_p13 = scmp.ne.s32.totalorder %s390_s15, %s4586_s19  ;;  %p4594_p12 = scmp.lt.s32.totalorder %s390_s15, %s390_s15 }
  0x6e   : > { %p4595_p2 = scmp.lt.s32.totalorder %s4586_s19, %s4586_s19 }
  0x6f   : > { %p4589_p8 = pnand %p4587_p13, %p5002_p1 }
  0x70   : > { %p4596_p10 = por %p4595_p2, %p4594_p12 }
  0x71   : > { %p4590_p11 = pneg %p4589_p8 }
  0x72   : > { %4264 = dma.hbm_to_vmem [thread:$0]  (!%p4996_p0), %s5695_s1, 32, %s369_s18, [#allocation4]  }
  0x73   : > { %p4597_p4 = pnand %p4596_p10, %p4590_p11 }
  0x75   : > { %4600 = shalt.err (!%p4597_p4)
}
  0x76   : > { %s4830_s22 = smov 64   ;;  %s4831_s27 = smov 4  }
  0x77   : > { %4270 = dma.hbm_to_vmem [thread:$0]  (!%p4996_p0), %s5654_s3, 512, %s390_s15, [#allocation7], %s4830_s22, %s4830_s22, %s4831_s27  }
  0x78   : > { %s4832_s18 = smov [#allocation11]  }
  0x79   : > { %s413_s14 = sshll.u32 %s4832_s18, 4  ;;  %s414_s14 = int_to_ptr.vmem [resolvable:$true] %s413_s14 }
  0x7a   : > { %s4612_s20 = scalar_lea.vmem %s414_s14, 8192  ;;  %p4620_p7 = scmp.lt.s32.totalorder %s414_s14, %s414_s14 }
  0x7b   : > { %p4613_p6 = scmp.ne.s32.totalorder %s414_s14, %s4612_s20  ;;  %p4621_p3 = scmp.lt.s32.totalorder %s4612_s20, %s4612_s20 }
  0x7d   : > { %p4615_p9 = pnand %p4613_p6, %p5002_p1  ;;  %p4622_p13 = por %p4621_p3, %p4620_p7 }
  0x7f   : > { %p4616_p5 = pneg %p4615_p9 }
  0x81   : > { %p4623_p8 = pnand %p4622_p13, %p4616_p5 }
  0x83   : > { %4626 = shalt.err (!%p4623_p8)
}
  0x84   : > { %s4833_s25 = smov 512   ;;  %s4834_s19 = smov 32  }
  0x85   : > { %4276 = dma.hbm_to_vmem [thread:$0]  (!%p4996_p0), %s5656_s5, 8192, %s414_s14, [#allocation10], %s4833_s25, %s4833_s25, %s4834_s19  }
  0x86   : > { %s4835_s22 = smov [#allocation14]   ;;  %s4836_s24 = smov [#allocation17]  }
  0x87   : > { %s437_s27 = sshll.u32 %s4835_s22, 4  ;;  %s461_s18 = sshll.u32 %s4836_s24, 4  ;;  %s438_s27 = int_to_ptr.vmem [resolvable:$true] %s437_s27  ;;  %s462_s18 = int_to_ptr.vmem [resolvable:$true] %s461_s18 }
  0x88   : > { %s4638_s1 = scalar_lea.vmem %s438_s27, 65536  ;;  %p4646_p10 = scmp.lt.s32.totalorder %s438_s27, %s438_s27 }
  0x89   : > { %p4639_p11 = scmp.ne.s32.totalorder %s438_s27, %s4638_s1  ;;  %p4647_p4 = scmp.lt.s32.totalorder %s4638_s1, %s4638_s1 }
  0x8b   : > { %p4641_p12 = pnand %p4639_p11, %p5002_p1  ;;  %p4648_p6 = por %p4647_p4, %p4646_p10 }
  0x8d   : > { %p4642_p2 = pneg %p4641_p12 }
  0x8f   : > { %p4649_p9 = pnand %p4648_p6, %p4642_p2 }
  0x91   : > { %4652 = shalt.err (!%p4649_p9)
}
  0x92   : > { %4282 = dma.hbm_to_vmem [thread:$0]  (!%p4996_p0), %s5658_s7, 65536, %s438_s27, [#allocation13], %s4833_s25, %s4833_s25, %s4834_s19  }
  0x93   : > { %s4664_s14 = scalar_lea.vmem %s462_s18, 16384  ;;  %p4672_p13 = scmp.lt.s32.totalorder %s462_s18, %s462_s18 }
  0x94   : > { %p4665_p5 = scmp.ne.s32.totalorder %s462_s18, %s4664_s14  ;;  %p4673_p8 = scmp.lt.s32.totalorder %s4664_s14, %s4664_s14 }
  0x96   : > { %p4667_p7 = pnand %p4665_p5, %p5002_p1  ;;  %p4674_p11 = por %p4673_p8, %p4672_p13 }
  0x98   : > { %p4668_p3 = pneg %p4667_p7 }
  0x9a   : > { %p4675_p12 = pnand %p4674_p11, %p4668_p3 }
  0x9c   : > { %4678 = shalt.err (!%p4675_p12)
}
  0x9d   : > { %s4837_s1 = smov 256   ;;  %s4838_s15 = smov 16  }
  0x9e   : > { %4288 = dma.hbm_to_vmem [thread:$0]  (!%p4996_p0), %s5660_s9, 16384, %s462_s18, [#allocation16], %s4837_s1, %s4837_s1, %s4838_s15  }
  0x9f   : > { %s4839_s25 = smov [#allocation20]  }
  0xa0   : > { %s489_s19 = sshll.u32 %s4839_s25, 4  ;;  %s490_s19 = int_to_ptr.vmem [resolvable:$true] %s489_s19 }
  0xa1   : > { %s4690_s27 = scalar_lea.vmem %s490_s19, 16  ;;  %s4697_s20 = scalar_lea.vmem %s490_s19, 32 }
  0xa2   : > { %p4691_p2 = scmp.ne.s32.totalorder %s490_s19, %s4690_s27  ;;  %p4698_p6 = scmp.lt.s32.totalorder %s490_s19, %s490_s19 }
  0xa3   : > { %p4699_p9 = scmp.lt.s32.totalorder %s4697_s20, %s4690_s27 }
  0xa4   : > { %p4693_p10 = pnand %p4691_p2, %p5002_p1 }
  0xa5   : > { %p4700_p5 = por %p4699_p9, %p4698_p6 }
  0xa6   : > { %p4694_p4 = pneg %p4693_p10 }
  0xa8   : > { %p4701_p7 = pnand %p4700_p5, %p4694_p4 }
  0xaa   : > { %4704 = shalt.err (!%p4701_p7)
}
  0xab   : > { %4294 = dma.hbm_to_vmem [thread:$0]  (!%p4996_p0), %s5663_s12, 16, %s490_s19, [#allocation19]  }
  0xac   : > { %p5696_p3 = scmp.ne.s32.totalorder %s5689_s23, 0 }
  0xad   : > { %p5697_p13 = scmp.ne.s32.totalorder (!%p5696_p3), %s5690_s17, 0 }
  0xae   : > { %515 = sbr.rel (%p5696_p3) target bundleno = 1859 (0x743), region = 72 }
  0xb3   : > { %4764 = dma.done.wait (%p5697_p13), [#allocation4], 32  }
  0xb4   : > { %4766 = vsyncadd (%p5697_p13), [#allocation4], 4294967264 }
  0xb5   : > { %4768 = dma.done.wait (%p5697_p13), [#allocation7], 528  }
  0xb6   : > { %4770 = vsyncadd (%p5697_p13), [#allocation7], 4294966768 }
  0xb7   : > { %4772 = dma.done.wait (%p5697_p13), [#allocation10], 8208  }
  0xb8   : > { %4774 = vsyncadd (%p5697_p13), [#allocation10], 4294959088 }
  0xb9   : > { %4776 = dma.done.wait (%p5697_p13), [#allocation13], 65664  }
  0xba   : > { %4778 = vsyncadd (%p5697_p13), [#allocation13], 4294901632 }
  0xbb   : > { %4780 = dma.done.wait (%p5697_p13), [#allocation16], 16448  }
  0xbc   : > { %4782 = vsyncadd (%p5697_p13), [#allocation16], 4294950848 }
  0xbd   : > { %4784 = dma.done.wait (%p5697_p13), [#allocation19], 48  }
  0xbe   : > { %4786 = vsyncadd (%p5697_p13), [#allocation19], 4294967248  ;;  %s600_s30 = sand.u32 1, %s4797_s26   ;;  %vm702_vm0 = vcmask 1040384   ;;  %s4015_s23 = sshll.u32 %s4805_s28, 4  ;;  %vm703_vm1 = vcmask 1041408  }
  0xbf   : > { %v4840_v0 = vmov 65535   ;;  %p603_p0 = scmp.lt.s32.totalorder %s4809_s29, 1  ;;  %p605_p1 = scmp.lt.s32.totalorder %s4015_s23, 31  ;;  %vm677_vm2 = vcmask 23552   ;;  %v629_v3 = vld [vmem:[#allocation3] sm:$0x3] }
  0xc0   : > { %v704_v1 = vsel %vm702_vm0, 4294967295, %v4840_v0  ;;  %v4415_v5 = vld [vmem:[#allocation8 + $0x18] sm:$0xff]   ;;  %v4416_v14 = vld [vmem:[#allocation8 + $0x10] sm:$0xff]   ;;  %v4417_v15 = vld [vmem:[#allocation8 + $0x8] sm:$0xff]   ;;  %vm869_vm3 = vcmask 523264   ;;  %s5432_s25 = scalar_lea.vmem [#allocation21], %s600_s30 }
  0xc1   : > { %s604_s16 = scalar_select %p603_p0, %s4809_s29, 1  ;;  %v705_v2 = vsel %vm703_vm1, %v704_v1, 0  ;;  %4191 = vmatprep.subr.bf16.mxu1 %v4415_v5  ;;  %v4418_v16 = vld [vmem:[#allocation8] sm:$0xff]   ;;  %v5124_v19 = vld [vmem:[#allocation11 + $0x1c8] sm:$0xff]  ;;  %v5132_v43 = vld [vmem:[#allocation6] ss:$0 sm:$0xff] }
  0xc2   : > { %s5718_s23 = smov (!%p605_p1, %s4015_s23), 31  ;;  %v707_v4 = vand.u32 %v705_v2, %v629_v3  ;;  %4192 = vmatpush3.bf16.msra.mxu1 %v4415_v5  ;;  %v1071_v17 = vld [vmem:[#allocation11 + $0x1c0] sm:$0xff]  ;;  %v5126_v22 = vld [vmem:[#allocation11 + $0x1e8] sm:$0xff]  ;;  %p4112_p8 = scmp.ne.s32.totalorder %s4805_s28, 0 }
  0xc3   : > { %s4016_s18 = sshll.u32 %s604_s16, 5  ;;  %4193 = vmatprep.subr.bf16.mxu1 %v4416_v14  ;;  %v1075_v18 = vld [vmem:[#allocation11 + $0x1e0] sm:$0xff]  ;;  %v4106_v25 = vcombine.low %v5124_v19, %v5126_v22  ;;  %v4107_v26 = vcombine.high %v5124_v19, %v5126_v22  ;;  %v1064_v54 = vld [vmem:[#allocation11 + $0x188] sm:$0xff] }
  0xc4   : > { %s608_s17 = sadd.s32 %s4016_s18, %s5718_s23  ;;  %4173 = vmatprep.subr.bf16.mxu0 %v707_v4  ;;  %v4104_v20 = vcombine.low %v1071_v17, %v1075_v18  ;;  %v4105_v21 = vcombine.high %v1071_v17, %v1075_v18  ;;  %v1063_v23 = vld [vmem:[#allocation11 + $0x180] sm:$0xff]  ;;  %v1068_v55 = vld [vmem:[#allocation11 + $0x1a8] sm:$0xff] }
  0xc5   : > { %s4017_s1 = sshll.u32 %s608_s17, 2  ;;  %4174 = vmatpush3.bf16.msra.mxu0 %v707_v4  ;;  %v1067_v24 = vld [vmem:[#allocation11 + $0x1a0] sm:$0xff]  ;;  %v4099_v63 = vcombine.high %v1064_v54, %v1068_v55  ;;  %v1056_v1 = vld [vmem:[#allocation11 + $0x148] sm:$0xff] }
  0xc6   : > { %s610_s24 = scalar_lea.vmem %s5651_s0, %s4017_s1  ;;  %4194 = vmatpush3.bf16.msra.mxu1 %v4416_v14  ;;  %v4097_v27 = vcombine.high %v1063_v23, %v1067_v24  ;;  %v1055_v28 = vld [vmem:[#allocation11 + $0x140] sm:$0xff]  ;;  %1441 = vmatprep.subr.bf16.mxu0 %v4105_v21  ;;  %v4096_v30 = vcombine.low %v1063_v23, %v1067_v24  ;;  %v1060_v2 = vld [vmem:[#allocation11 + $0x168] sm:$0xff] }
  0xc7   : > { %v4407_v6 = vld [vmem:[%s610_s24] sm:$0xff]   ;;  %v4408_v7 = vld [vmem:[%s610_s24 + $0x8] sm:$0xff]   ;;  %v4409_v8 = vld [vmem:[%s610_s24 + $0x10] sm:$0xff]   ;;  %4195 = vmatprep.subr.bf16.mxu1 %v4417_v15  ;;  %v4090_v19 = vcombine.low %v1056_v1, %v1060_v2 }
  0xc8   : > { %4175 = vmatprep.mubr.msk.bf16.mxu0 %vm677_vm2, %v4407_v6  ;;  %v4410_v9 = vld [vmem:[%s610_s24 + $0x18] sm:$0xff]   ;;  %v4411_v10 = vld [vmem:[%s610_s24 + $0x20] sm:$0xff]   ;;  %v4412_v11 = vld [vmem:[%s610_s24 + $0x28] sm:$0xff]  }
  0xc9   : > { %4176 = vmatmul.mubr.msk.bf16.vlgmr.msra.gmra.mxu0 %vm677_vm2, %v4408_v7  ;;  %v4413_v12 = vld [vmem:[%s610_s24 + $0x30] sm:$0xff]   ;;  %v4414_v13 = vld [vmem:[%s610_s24 + $0x38] sm:$0xff]  }
  0xca   : > { %4179 = vmatprep.mubr.msk.bf16.mxu0 %vm677_vm2, %v4409_v8  ;;  %4196 = vmatpush3.bf16.msra.mxu1 %v4417_v15  ;;  %v1059_v29 = vld [vmem:[#allocation11 + $0x160] sm:$0xff]  ;;  %v4098_v8 = vcombine.low %v1064_v54, %v1068_v55  ;;  %v1040_v23 = vld [vmem:[#allocation11 + $0xc8] sm:$0xff] }
  0xcb   : > { %4197 = vmatprep.subr.bf16.mxu1 %v4418_v16  ;;  %1442 = vmatpush1.bf16.msra.mxu0 %v4104_v20  ;;  %v4089_v31 = vcombine.high %v1055_v28, %v1059_v29  ;;  %v1047_v32 = vld [vmem:[#allocation11 + $0x100] sm:$0xff]  ;;  %v4088_v34 = vcombine.low %v1055_v28, %v1059_v29  ;;  %v1044_v24 = vld [vmem:[#allocation11 + $0xe8] sm:$0xff] }
  0xcc   : > { %1443 = vmatprep.subr.bf16.mxu0 %v4097_v27  ;;  %v1051_v33 = vld [vmem:[#allocation11 + $0x120] sm:$0xff]  ;;  %v1036_v55 = vld [vmem:[#allocation11 + $0xa8] sm:$0xff] }
  0xcd   : > { %v4081_v35 = vcombine.high %v1047_v32, %v1051_v33  ;;  %v1039_v36 = vld [vmem:[#allocation11 + $0xc0] sm:$0xff]  ;;  %v4080_v38 = vcombine.low %v1047_v32, %v1051_v33  ;;  %v4075_v32 = vcombine.high %v1040_v23, %v1044_v24 }
  0xce   : > { %4198 = vmatpush3.bf16.msra.mxu1 %v4418_v16  ;;  %v1043_v37 = vld [vmem:[#allocation11 + $0xe0] sm:$0xff] }
  0xcf   : > { %1554 = vmatprep.subr.bf16.mxu1 %v4107_v26  ;;  %1444 = vmatpush1.bf16.msra.mxu0 %v4096_v30  ;;  %v4073_v39 = vcombine.high %v1039_v36, %v1043_v37  ;;  %v4072_v40 = vcombine.low %v1039_v36, %v1043_v37 }
  0xd0   : > { %1445 = vmatprep.subr.bf16.mxu0 %v4089_v31 }
  0xd1   : > { %4180 = vmatmul.mubr.msk.bf16.gmra.mxu0 %vm677_vm2, %v4410_v9 }
  0xd2   : > { %4183 = vmatprep.mubr.msk.bf16.mxu0 %vm677_vm2, %v4411_v10  ;;  %v4091_v10 = vcombine.high %v1056_v1, %v1060_v2  ;;  %v1015_v2 = vld [vmem:[#allocation11] sm:$0xff] }
  0xd3   : > { %1446 = vmatpush1.bf16.msra.mxu0 %v4088_v34 }
  0xd4   : > { %1447 = vmatprep.subr.bf16.mxu0 %v4081_v35 }
  0xd7   : > { %1448 = vmatpush1.bf16.msra.mxu0 %v4080_v38 }
  0xd8   : > { %1449 = vmatprep.subr.bf16.mxu0 %v4073_v39  ;;  %v4074_v39 = vcombine.low %v1040_v23, %v1044_v24 }
  0xd9   : > { %4184 = vmatmul.mubr.msk.bf16.gmra.mxu0 %vm677_vm2, %v4412_v11 }
  0xda   : > { %4187 = vmatprep.mubr.msk.bf16.mxu0 %vm677_vm2, %v4413_v12  ;;  %v1048_v12 = vld [vmem:[#allocation11 + $0x108] sm:$0xff] }
  0xdb   : > { %1450 = vmatpush1.bf16.msra.mxu0 %v4072_v40 }
  0xe1   : > { %4188 = vmatmul.mubr.msk.bf16.gmra.mxu0 %vm677_vm2, %v4414_v13  ;;  %v1052_v13 = vld [vmem:[#allocation11 + $0x128] sm:$0xff] }
  0xe2   : > { %v4083_v21 = vcombine.high %v1048_v12, %v1052_v13  ;;  %v4082_v30 = vcombine.low %v1048_v12, %v1052_v13  ;;  %v1077_v12 = vld [vmem:[#allocation11 + $0x1f0] sm:$0xff]  ;;  %v1074_v13 = vld [vmem:[#allocation11 + $0x1d8] sm:$0xff] }
 0x189   : > { %v4177_v41 = vpop.f32.mrf.mxu0 }
 0x18a   : > { %v752_v47 = vadd.f32 %v4177_v41, %v5132_v43 }
 0x18b   : > { %v743_v42 = vpop.f32.mrf.mxu0 }
 0x18c   : > { %v744_v45 = vadd.f32 %v5132_v43, %v743_v42  ;;  %v808_v56 = vmax.f32 %v752_v47, 0.0 }
 0x18d   : > { %v4178_v44 = vpop.f32.mrf.mxu0 }
 0x18e   : > { %v755_v46 = vadd.f32 %v4178_v44, %v5132_v43  ;;  %v806_v52 = vmax.f32 %v744_v45, 0.0 }
 0x18f   : > { %v746_v48 = vpop.f32.mrf.mxu0 }
 0x190   : > { %v747_v49 = vadd.f32 %v5132_v43, %v746_v48  ;;  %v809_v50 = vmax.f32 %v755_v46, 0.0 }
 0x191   : > { %v4181_v51 = vpop.f32.mrf.mxu0 }
 0x192   : > { %v807_v53 = vmax.f32 %v747_v49, 0.0  ;;  %v768_v57 = vadd.f32 %v4181_v51, %v5132_v43  ;;  %v823_v61 = vpack.c.bf16 %v809_v50, %v808_v56  ;;  %v1031_v51 = vld [vmem:[#allocation11 + $0x80] sm:$0xff] }
 0x193   : > { %v759_v58 = vpop.f32.mrf.mxu0 }
 0x194   : > { %v760_v59 = vadd.f32 %v5132_v43, %v759_v58  ;;  %v822_v60 = vpack.c.bf16 %v807_v53, %v806_v52  ;;  %v812_v3 = vmax.f32 %v768_v57, 0.0  ;;  %v1035_v52 = vld [vmem:[#allocation11 + $0xa0] sm:$0xff]  ;;  %v1032_v53 = vld [vmem:[#allocation11 + $0x88] sm:$0xff] }
 0x195   : > { %v4182_v62 = vpop.f32.mrf.mxu0  ;;  %v4065_v54 = vcombine.high %v1031_v51, %v1035_v52  ;;  %v4064_v56 = vcombine.low %v1031_v51, %v1035_v52  ;;  %v4066_v57 = vcombine.low %v1032_v53, %v1036_v55  ;;  %v4067_v58 = vcombine.high %v1032_v53, %v1036_v55  ;;  %v1049_v51 = vld [vmem:[#allocation11 + $0x110] sm:$0xff]  ;;  %v1054_v55 = vld [vmem:[#allocation11 + $0x138] sm:$0xff] }
 0x196   : > { %v771_v0 = vadd.f32 %v4182_v62, %v5132_v43  ;;  %4199 = vmatprep.mubr.msk.bf16.mxu1 %vm869_vm3, %v822_v60  ;;  %v810_v5 = vmax.f32 %v760_v59, 0.0  ;;  %v1027_v59 = vld [vmem:[#allocation11 + $0x60] sm:$0xff]  ;;  %v1024_v60 = vld [vmem:[#allocation11 + $0x48] sm:$0xff]  ;;  %v1053_v53 = vld [vmem:[#allocation11 + $0x130] sm:$0xff] }
 0x197   : > { %v762_v4 = vpop.f32.mrf.mxu0  ;;  %4200 = vmatmul.mubr.msk.bf16.vlgmr.msra.gmra.mxu1 %vm869_vm3, %v823_v61  ;;  %1451 = vmatprep.subr.bf16.mxu0 %v4065_v54  ;;  %v1028_v62 = vld [vmem:[#allocation11 + $0x68] sm:$0xff]  ;;  %v1050_v54 = vld [vmem:[#allocation11 + $0x118] sm:$0xff] }
 0x198   : > { %v813_v6 = vmax.f32 %v771_v0, 0.0  ;;  %v763_v7 = vadd.f32 %v5132_v43, %v762_v4  ;;  %1555 = vmatpush1.bf16.msra.mxu1 %v4106_v25  ;;  %1452 = vmatpush1.bf16.msra.mxu0 %v4064_v56  ;;  %v4058_v0 = vcombine.low %v1024_v60, %v1028_v62  ;;  %v4059_v1 = vcombine.high %v1024_v60, %v1028_v62  ;;  %v1016_v4 = vld [vmem:[#allocation11 + $0x8] sm:$0xff]  ;;  %v1041_v62 = vld [vmem:[#allocation11 + $0xd0] sm:$0xff] }
 0x199   : > { %v4185_v9 = vpop.f32.mrf.mxu0  ;;  %1556 = vmatprep.subr.bf16.mxu1 %v4099_v63  ;;  %v4085_v60 = vcombine.high %v1049_v51, %v1053_v53 }
 0x19a   : > { %v811_v11 = vmax.f32 %v763_v7, 0.0  ;;  %v825_v14 = vpack.c.bf16 %v813_v6, %v812_v3  ;;  %v784_v15 = vadd.f32 %v4185_v9, %v5132_v43  ;;  %v1019_v3 = vld [vmem:[#allocation11 + $0x20] sm:$0xff]  ;;  %v1020_v6 = vld [vmem:[#allocation11 + $0x28] sm:$0xff] }
 0x19b   : > { %v775_v16 = vpop.f32.mrf.mxu0  ;;  %v4048_v7 = vcombine.low %v1015_v2, %v1019_v3  ;;  %v4051_v9 = vcombine.high %v1016_v4, %v1020_v6 }
 0x19c   : > { %v824_v17 = vpack.c.bf16 %v811_v11, %v810_v5  ;;  %v776_v18 = vadd.f32 %v5132_v43, %v775_v16  ;;  %1557 = vmatpush1.bf16.msra.mxu1 %v4098_v8  ;;  %v816_v25 = vmax.f32 %v784_v15, 0.0  ;;  %v4049_v5 = vcombine.high %v1015_v2, %v1019_v3  ;;  %v1073_v11 = vld [vmem:[#allocation11 + $0x1d0] sm:$0xff]  ;;  %v1078_v16 = vld [vmem:[#allocation11 + $0x1f8] sm:$0xff] }
 0x19d   : > { %v4186_v20 = vpop.f32.mrf.mxu0  ;;  %1558 = vmatprep.subr.bf16.mxu1 %v4091_v10  ;;  %v4050_v8 = vcombine.low %v1016_v4, %v1020_v6  ;;  %v4841_v10 = vmov 0   ;;  %v4109_v15 = vcombine.high %v1073_v11, %v1077_v12  ;;  %v1046_v2 = vld [vmem:[#allocation11 + $0xf8] sm:$0xff]  ;;  %v4084_v4 = vcombine.low %v1049_v51, %v1053_v53 }
 0x19e   : > { %4203 = vmatprep.mubr.msk.bf16.mxu1 %vm869_vm3, %v824_v17  ;;  %v787_v22 = vadd.f32 %v4186_v20, %v5132_v43  ;;  %v814_v27 = vmax.f32 %v776_v18, 0.0  ;;  %1473 = vmatprep.mubr.bf16.mxu0 %v4841_v10  ;;  %v4110_v17 = vcombine.low %v1074_v13, %v1078_v16  ;;  %v4111_v18 = vcombine.high %v1074_v13, %v1078_v16  ;;  %v1034_v13 = vld [vmem:[#allocation11 + $0x98] sm:$0xff] }
 0x19f   : > { %4204 = vmatmul.mubr.msk.bf16.gmra.mxu1 %vm869_vm3, %v825_v14  ;;  %v778_v26 = vpop.f32.mrf.mxu0  ;;  %v4108_v14 = vcombine.low %v1073_v11, %v1077_v12  ;;  %v1037_v12 = vld [vmem:[#allocation11 + $0xb0] sm:$0xff] }
 0x1a0   : > { %v817_v28 = vmax.f32 %v787_v22, 0.0  ;;  %v779_v29 = vadd.f32 %v5132_v43, %v778_v26  ;;  %1559 = vmatpush1.bf16.msra.mxu1 %v4090_v19 }
 0x1a1   : > { %v4189_v31 = vpop.f32.mrf.mxu0  ;;  %1560 = vmatprep.subr.bf16.mxu1 %v4083_v21  ;;  %v5160_v21 = vld [vmem:[#allocation9] ss:$0 sm:$0xff] }
 0x1a2   : > { %v815_v33 = vmax.f32 %v779_v29, 0.0  ;;  %v827_v34 = vpack.c.bf16 %v817_v28, %v816_v25  ;;  %v800_v35 = vadd.f32 %v4189_v31, %v5132_v43  ;;  %v1066_v31 = vld [vmem:[#allocation11 + $0x198] sm:$0xff] }
 0x1a3   : > { %v791_v36 = vpop.f32.mrf.mxu0 }
 0x1a4   : > { %v826_v37 = vpack.c.bf16 %v815_v33, %v814_v27  ;;  %v792_v38 = vadd.f32 %v5132_v43, %v791_v36  ;;  %1561 = vmatpush1.bf16.msra.mxu1 %v4082_v30  ;;  %v820_v42 = vmax.f32 %v800_v35, 0.0  ;;  %v1065_v27 = vld [vmem:[#allocation11 + $0x190] sm:$0xff] }
 0x1a5   : > { %v4190_v40 = vpop.f32.mrf.mxu0  ;;  %1562 = vmatprep.subr.bf16.mxu1 %v4075_v32  ;;  %v1069_v30 = vld [vmem:[#allocation11 + $0x1b0] sm:$0xff]  ;;  %v1070_v32 = vld [vmem:[#allocation11 + $0x1b8] sm:$0xff] }
 0x1a6   : > { %4207 = vmatprep.mubr.msk.bf16.mxu1 %vm869_vm3, %v826_v37  ;;  %v803_v41 = vadd.f32 %v4190_v40, %v5132_v43  ;;  %v818_v45 = vmax.f32 %v792_v38, 0.0  ;;  %v1057_v36 = vld [vmem:[#allocation11 + $0x150] sm:$0xff]  ;;  %v4101_v38 = vcombine.high %v1065_v27, %v1069_v30 }
 0x1a7   : > { %4208 = vmatmul.mubr.msk.bf16.gmra.mxu1 %vm869_vm3, %v827_v34  ;;  %v794_v44 = vpop.f32.mrf.mxu0  ;;  %v1061_v40 = vld [vmem:[#allocation11 + $0x170] sm:$0xff] }
 0x1a8   : > { %v821_v46 = vmax.f32 %v803_v41, 0.0  ;;  %v795_v47 = vadd.f32 %v5132_v43, %v794_v44  ;;  %1563 = vmatpush1.bf16.msra.mxu1 %v4074_v39  ;;  %v1023_v43 = vld [vmem:[#allocation11 + $0x40] sm:$0xff]  ;;  %v4103_v39 = vcombine.high %v1066_v31, %v1070_v32  ;;  %v1058_v41 = vld [vmem:[#allocation11 + $0x158] sm:$0xff]  ;;  %v4092_v56 = vcombine.low %v1057_v36, %v1061_v40 }
 0x1a9   : > { %1564 = vmatprep.subr.bf16.mxu1 %v4067_v58  ;;  %v4057_v61 = vcombine.high %v1023_v43, %v1027_v59  ;;  %v4056_v63 = vcombine.low %v1023_v43, %v1027_v59 }
 0x1aa   : > { %v819_v48 = vmax.f32 %v795_v47, 0.0  ;;  %v829_v49 = vpack.c.bf16 %v821_v46, %v820_v42  ;;  %v1062_v42 = vld [vmem:[#allocation11 + $0x178] sm:$0xff]  ;;  %v4102_v46 = vcombine.low %v1066_v31, %v1070_v32 }
 0x1ab   : > { %1453 = vmatprep.subr.bf16.mxu0 %v4057_v61  ;;  %v4094_v43 = vcombine.low %v1058_v41, %v1062_v42  ;;  %v4087_v61 = vcombine.high %v1050_v54, %v1054_v55 }
 0x1ac   : > { %v828_v50 = vpack.c.bf16 %v819_v48, %v818_v45  ;;  %1565 = vmatpush1.bf16.msra.mxu1 %v4066_v57  ;;  %1454 = vmatpush1.bf16.msra.mxu0 %v4056_v63  ;;  %v4100_v45 = vcombine.low %v1065_v27, %v1069_v30  ;;  %v4093_v48 = vcombine.high %v1057_v36, %v1061_v40  ;;  %v1026_v27 = vld [vmem:[#allocation11 + $0x58] sm:$0xff] }
 0x1ad   : > { %1566 = vmatprep.subr.bf16.mxu1 %v4059_v1  ;;  %1455 = vmatprep.subr.bf16.mxu0 %v4049_v5  ;;  %v1042_v1 = vld [vmem:[#allocation11 + $0xd8] sm:$0xff]  ;;  %v4086_v5 = vcombine.low %v1050_v54, %v1054_v55 }
 0x1ae   : > { %4211 = vmatprep.mubr.msk.bf16.mxu1 %vm869_vm3, %v828_v50 }
 0x1af   : > { %4212 = vmatmul.mubr.msk.bf16.gmra.mxu1 %vm869_vm3, %v829_v49  ;;  %v4095_v49 = vcombine.high %v1058_v41, %v1062_v42 }
 0x1b0   : > { %1567 = vmatpush1.bf16.msra.mxu1 %v4058_v0  ;;  %1456 = vmatpush1.bf16.msra.mxu0 %v4048_v7  ;;  %v1045_v0 = vld [vmem:[#allocation11 + $0xf0] sm:$0xff] }
 0x1b1   : > { %1568 = vmatprep.subr.bf16.mxu1 %v4051_v9  ;;  %1586 = vmatprep.mubr.bf16.mxu1 %v4841_v10  ;;  %v4077_v7 = vcombine.high %v1041_v62, %v1045_v0  ;;  %v1033_v9 = vld [vmem:[#allocation11 + $0x90] sm:$0xff] }
 0x1b2   : > { %1667 = vmatprep.subr.bf16.mxu0 %v4109_v15  ;;  %v4076_v15 = vcombine.low %v1041_v62, %v1045_v0  ;;  %v4068_v30 = vcombine.low %v1033_v9, %v1037_v12 }
 0x1b4   : > { %1569 = vmatpush1.bf16.msra.mxu1 %v4050_v8  ;;  %v4079_v8 = vcombine.high %v1042_v1, %v1046_v2 }
 0x1b5   : > { %1780 = vmatprep.subr.bf16.mxu1 %v4111_v18  ;;  %v4078_v18 = vcombine.low %v1042_v1, %v1046_v2 }
 0x257   : > { %v4201_v19 = vpop.f32.mrf.mxu1 }
 0x258   : > { %v937_v44 = vadd.f32 %v4201_v19, %v5160_v21 }
 0x259   : > { %v928_v20 = vpop.f32.mrf.mxu1 }
 0x25a   : > { %v929_v23 = vadd.f32 %v5160_v21, %v928_v20  ;;  %v993_v52 = vmax.f32 %v937_v44, 0.0  ;;  %v4069_v20 = vcombine.high %v1033_v9, %v1037_v12  ;;  %v5246_v9 = vld [vmem:[#allocation12] sm:$0xff] }
 0x25b   : > { %v4202_v22 = vpop.f32.mrf.mxu1 }
 0x25c   : > { %v991_v28 = vmax.f32 %v929_v23, 0.0  ;;  %v940_v34 = vadd.f32 %v4202_v22, %v5160_v21  ;;  %v1025_v23 = vld [vmem:[#allocation11 + $0x50] sm:$0xff] }
 0x25d   : > { %v931_v24 = vpop.f32.mrf.mxu1 }
 0x25e   : > { %v932_v25 = vadd.f32 %v5160_v21, %v931_v24  ;;  %v994_v47 = vmax.f32 %v940_v34, 0.0  ;;  %v1017_v34 = vld [vmem:[#allocation11 + $0x10] sm:$0xff] }
 0x25f   : > { %v5164_v26 = vpop.f32.mrf.mxu1 }
 0x260   : > { %v992_v29 = vmax.f32 %v932_v25, 0.0  ;;  %v5174_v57 = vpack.c.bf16 %v994_v47, %v993_v52  ;;  %v953_v24 = vadd.f32 %v5164_v26, %v5160_v21  ;;  %v1029_v25 = vld [vmem:[#allocation11 + $0x70] sm:$0xff] }
 0x261   : > { %v944_v33 = vpop.f32.mrf.mxu1  ;;  %v4061_v26 = vcombine.high %v1025_v23, %v1029_v25  ;;  %v4060_v40 = vcombine.low %v1025_v23, %v1029_v25 }
 0x262   : > { %v5167_v35 = vpack.c.bf16 %v992_v29, %v991_v28  ;;  %v945_v63 = vadd.f32 %v5160_v21, %v944_v33  ;;  %v1030_v28 = vld [vmem:[#allocation11 + $0x78] sm:$0xff]  ;;  %v997_v36 = vmax.f32 %v953_v24, 0.0 }
 0x263   : > { %v4206_v37 = vpop.f32.mrf.mxu1  ;;  %v4063_v33 = vcombine.high %v1026_v27, %v1030_v28  ;;  %v4062_v41 = vcombine.low %v1026_v27, %v1030_v28 }
 0x264   : > { %1474 = vmatmul.mubr.bf16.vlgmr.msra.gmra.mxu0 %v5167_v35  ;;  %1587 = vmatmul.mubr.bf16.vlgmr.msra.gmra.mxu1 %v5167_v35  ;;  %v995_v11 = vmax.f32 %v945_v63, 0.0  ;;  %v956_v16 = vadd.f32 %v4206_v37, %v5160_v21  ;;  %v1021_v37 = vld [vmem:[#allocation11 + $0x30] sm:$0xff] }
 0x265   : > { %1668 = vmatpush1.bf16.msra.mxu0 %v4108_v14  ;;  %1781 = vmatpush1.bf16.msra.mxu1 %v4110_v17  ;;  %v947_v50 = vpop.f32.mrf.mxu1  ;;  %v1038_v14 = vld [vmem:[#allocation11 + $0xb8] sm:$0xff]  ;;  %v4053_v47 = vcombine.high %v1017_v34, %v1021_v37  ;;  %v4052_v51 = vcombine.low %v1017_v34, %v1021_v37 }
 0x266   : > { %1483 = vmatprep.mubr.bf16.mxu0 %v4841_v10  ;;  %1596 = vmatprep.mubr.bf16.mxu1 %v4841_v10  ;;  %v948_v58 = vadd.f32 %v5160_v21, %v947_v50  ;;  %v4071_v22 = vcombine.high %v1034_v13, %v1038_v14  ;;  %v998_v29 = vmax.f32 %v956_v16, 0.0  ;;  %v4070_v31 = vcombine.low %v1034_v13, %v1038_v14 }
 0x267   : > { %1669 = vmatprep.subr.bf16.mxu0 %v4101_v38  ;;  %1782 = vmatprep.subr.bf16.mxu1 %v4103_v39  ;;  %v5177_v59 = vpop.f32.mrf.mxu1  ;;  %v1018_v38 = vld [vmem:[#allocation11 + $0x18] sm:$0xff] }
 0x268   : > { %v996_v3 = vmax.f32 %v948_v58, 0.0  ;;  %v1022_v39 = vld [vmem:[#allocation11 + $0x38] sm:$0xff]  ;;  %v5193_v42 = vpack.c.bf16 %v998_v29, %v997_v36  ;;  %v969_v54 = vadd.f32 %v5177_v59, %v5160_v21 }
 0x269   : > { %1670 = vmatpush1.bf16.msra.mxu0 %v4100_v45  ;;  %1783 = vmatpush1.bf16.msra.mxu1 %v4102_v46  ;;  %v960_v6 = vpop.f32.mrf.mxu1  ;;  %v4054_v52 = vcombine.low %v1018_v38, %v1022_v39 }
 0x26a   : > { %1671 = vmatprep.subr.bf16.mxu0 %v4093_v48  ;;  %1784 = vmatprep.subr.bf16.mxu1 %v4095_v49  ;;  %v5185_v17 = vpack.c.bf16 %v996_v3, %v995_v11  ;;  %v961_v44 = vadd.f32 %v5160_v21, %v960_v6  ;;  %v4055_v48 = vcombine.high %v1018_v38, %v1022_v39 }
 0x26b   : > { %v4210_v19 = vpop.f32.mrf.mxu1 }
 0x26c   : > { %1484 = vmatmul.mubr.bf16.gmra.mxu0 %v5174_v57  ;;  %1597 = vmatmul.mubr.bf16.gmra.mxu1 %v5174_v57  ;;  %v999_v49 = vmax.f32 %v961_v44, 0.0  ;;  %v972_v55 = vadd.f32 %v4210_v19, %v5160_v21 }
 0x26d   : > { %1493 = vmatprep.mubr.bf16.mxu0 %v4841_v10  ;;  %1606 = vmatprep.mubr.bf16.mxu1 %v4841_v10  ;;  %v963_v32 = vpop.f32.mrf.mxu1 }
 0x26e   : > { %1672 = vmatpush1.bf16.msra.mxu0 %v4092_v56  ;;  %1785 = vmatpush1.bf16.msra.mxu1 %v4094_v43  ;;  %v964_v45 = vadd.f32 %v5160_v21, %v963_v32  ;;  %v1001_v43 = vmax.f32 %v969_v54, 0.0 }
 0x26f   : > { %1673 = vmatprep.subr.bf16.mxu0 %v4085_v60  ;;  %1786 = vmatprep.subr.bf16.mxu1 %v4087_v61  ;;  %v4213_v46 = vpop.f32.mrf.mxu1  ;;  %v1002_v60 = vmax.f32 %v972_v55, 0.0 }
 0x270   : > { %v1000_v50 = vmax.f32 %v964_v45, 0.0  ;;  %v985_v2 = vadd.f32 %v4213_v46, %v5160_v21 }
 0x271   : > { %v976_v53 = vpop.f32.mrf.mxu1  ;;  %v1012_v62 = vpack.c.bf16 %v1002_v60, %v1001_v43 }
 0x272   : > { %1674 = vmatpush1.bf16.msra.mxu0 %v4084_v4  ;;  %1787 = vmatpush1.bf16.msra.mxu1 %v4086_v5  ;;  %v1011_v56 = vpack.c.bf16 %v1000_v50, %v999_v49  ;;  %v977_v63 = vadd.f32 %v5160_v21, %v976_v53  ;;  %v1005_v5 = vmax.f32 %v985_v2, 0.0 }
 0x273   : > { %1675 = vmatprep.subr.bf16.mxu0 %v4077_v7  ;;  %1788 = vmatprep.subr.bf16.mxu1 %v4079_v8  ;;  %v4214_v58 = vpop.f32.mrf.mxu1 }
 0x274   : > { %1494 = vmatmul.mubr.bf16.gmra.mxu0 %v5185_v17  ;;  %1607 = vmatmul.mubr.bf16.gmra.mxu1 %v5185_v17  ;;  %v1003_v0 = vmax.f32 %v977_v63, 0.0  ;;  %v988_v3 = vadd.f32 %v4214_v58, %v5160_v21 }
 0x275   : > { %1503 = vmatprep.mubr.bf16.mxu0 %v4841_v10  ;;  %1616 = vmatprep.mubr.bf16.mxu1 %v4841_v10  ;;  %v979_v61 = vpop.f32.mrf.mxu1 }
 0x276   : > { %1676 = vmatpush1.bf16.msra.mxu0 %v4076_v15  ;;  %1789 = vmatpush1.bf16.msra.mxu1 %v4078_v18  ;;  %v980_v59 = vadd.f32 %v5160_v21, %v979_v61  ;;  %v1006_v6 = vmax.f32 %v988_v3, 0.0  ;;  %v1081_v21 = vlaneseq }
 0x277   : > { %1677 = vmatprep.subr.bf16.mxu0 %v4069_v20  ;;  %1790 = vmatprep.subr.bf16.mxu1 %v4071_v22 }
 0x278   : > { %v1004_v1 = vmax.f32 %v980_v59, 0.0  ;;  %v1014_v7 = vpack.c.bf16 %v1006_v6, %v1005_v5 }
 0x27a   : > { %1678 = vmatpush1.bf16.msra.mxu0 %v4068_v30  ;;  %1791 = vmatpush1.bf16.msra.mxu1 %v4070_v31  ;;  %v1013_v4 = vpack.c.bf16 %v1004_v1, %v1003_v0 }
 0x27b   : > { %1679 = vmatprep.subr.bf16.mxu0 %v4061_v26  ;;  %1792 = vmatprep.subr.bf16.mxu1 %v4063_v33 }
 0x27c   : > { %1504 = vmatmul.mubr.bf16.gmra.mxu0 %v5193_v42  ;;  %1617 = vmatmul.mubr.bf16.gmra.mxu1 %v5193_v42 }
 0x27d   : > { %1513 = vmatprep.mubr.bf16.mxu0 %v4841_v10  ;;  %1626 = vmatprep.mubr.bf16.mxu1 %v4841_v10 }
 0x27e   : > { %1680 = vmatpush1.bf16.msra.mxu0 %v4060_v40  ;;  %1793 = vmatpush1.bf16.msra.mxu1 %v4062_v41 }
 0x27f   : > { %1681 = vmatprep.subr.bf16.mxu0 %v4053_v47  ;;  %1794 = vmatprep.subr.bf16.mxu1 %v4055_v48 }
 0x282   : > { %1682 = vmatpush1.bf16.msra.mxu0 %v4052_v51  ;;  %1795 = vmatpush1.bf16.msra.mxu1 %v4054_v52 }
 0x284   : > { %1514 = vmatmul.mubr.bf16.gmra.mxu0 %v1011_v56  ;;  %1627 = vmatmul.mubr.bf16.gmra.mxu1 %v1011_v56 }
 0x285   : > { %1523 = vmatprep.mubr.bf16.mxu0 %v4841_v10  ;;  %1636 = vmatprep.mubr.bf16.mxu1 %v4841_v10 }
 0x28c   : > { %1524 = vmatmul.mubr.bf16.gmra.mxu0 %v1012_v62  ;;  %1637 = vmatmul.mubr.bf16.gmra.mxu1 %v1012_v62 }
 0x28d   : > { %1533 = vmatprep.mubr.bf16.mxu0 %v4841_v10  ;;  %1646 = vmatprep.mubr.bf16.mxu1 %v4841_v10 }
 0x294   : > { %1534 = vmatmul.mubr.bf16.gmra.mxu0 %v1013_v4  ;;  %1647 = vmatmul.mubr.bf16.gmra.mxu1 %v1013_v4 }
 0x295   : > { %1543 = vmatprep.mubr.bf16.mxu0 %v4841_v10  ;;  %1656 = vmatprep.mubr.bf16.mxu1 %v4841_v10 }
 0x29c   : > { %1544 = vmatmul.mubr.bf16.gmra.mxu0 %v1014_v7  ;;  %1657 = vmatmul.mubr.bf16.gmra.mxu1 %v1014_v7 }
 0x29d   : > { %1699 = vmatprep.mubr.bf16.mxu0 %v4841_v10  ;;  %1812 = vmatprep.mubr.bf16.mxu1 %v4841_v10 }
 0x2a4   : > { %1700 = vmatmul.mubr.bf16.vlgmr.msra.gmra.mxu0 %v5167_v35  ;;  %1813 = vmatmul.mubr.bf16.vlgmr.msra.gmra.mxu1 %v5167_v35  ;;  %v5238_v35 = vshrl.u32 %v1081_v21, 7 }
 0x2a5   : > { %1709 = vmatprep.mubr.bf16.mxu0 %v4841_v10  ;;  %1822 = vmatprep.mubr.bf16.mxu1 %v4841_v10 }
 0x2a6   : > { %v5244_v8 = vsub.s32 2, %v5238_v35  ;;  %v5249_v11 = vsub.s32 1, %v5238_v35  ;;  %v5252_v12 = vsub.s32 3, %v5238_v35 }
 0x2a8   : > { %v5260_v13 = vrot.slane %v5246_v9, %v5244_v8  ;;  %v5264_v16 = vrot.slane %v5246_v9, %v5249_v11 }
 0x2ac   : > { %1710 = vmatmul.mubr.bf16.gmra.mxu0 %v5174_v57  ;;  %1823 = vmatmul.mubr.bf16.gmra.mxu1 %v5174_v57  ;;  %v5241_v57 = vsub.s32 0, %v5238_v35 }
 0x2ad   : > { %1719 = vmatprep.mubr.bf16.mxu0 %v4841_v10  ;;  %1832 = vmatprep.mubr.bf16.mxu1 %v4841_v10 }
 0x2b4   : > { %1720 = vmatmul.mubr.bf16.gmra.mxu0 %v5185_v17  ;;  %1833 = vmatmul.mubr.bf16.gmra.mxu1 %v5185_v17  ;;  %v5268_v17 = vrot.slane %v5246_v9, %v5252_v12 }
 0x2b5   : > { %1729 = vmatprep.mubr.bf16.mxu0 %v4841_v10  ;;  %1842 = vmatprep.mubr.bf16.mxu1 %v4841_v10 }
 0x2bc   : > { %1730 = vmatmul.mubr.bf16.gmra.mxu0 %v5193_v42  ;;  %1843 = vmatmul.mubr.bf16.gmra.mxu1 %v5193_v42 }
 0x2bd   : > { %1739 = vmatprep.mubr.bf16.mxu0 %v4841_v10  ;;  %1852 = vmatprep.mubr.bf16.mxu1 %v4841_v10 }
 0x2c4   : > { %1740 = vmatmul.mubr.bf16.gmra.mxu0 %v1011_v56  ;;  %1853 = vmatmul.mubr.bf16.gmra.mxu1 %v1011_v56 }
 0x2c5   : > { %1749 = vmatprep.mubr.bf16.mxu0 %v4841_v10  ;;  %1862 = vmatprep.mubr.bf16.mxu1 %v4841_v10 }
 0x2cc   : > { %1750 = vmatmul.mubr.bf16.gmra.mxu0 %v1012_v62  ;;  %1863 = vmatmul.mubr.bf16.gmra.mxu1 %v1012_v62 }
 0x2cd   : > { %1759 = vmatprep.mubr.bf16.mxu0 %v4841_v10  ;;  %1872 = vmatprep.mubr.bf16.mxu1 %v4841_v10 }
 0x2d4   : > { %1760 = vmatmul.mubr.bf16.gmra.mxu0 %v1013_v4  ;;  %1873 = vmatmul.mubr.bf16.gmra.mxu1 %v1013_v4 }
 0x2d5   : > { %1769 = vmatprep.mubr.bf16.mxu0 %v4841_v10  ;;  %1882 = vmatprep.mubr.bf16.mxu1 %v4841_v10  ;;  %v5256_v10 = vrot.slane %v5246_v9, %v5241_v57 }
 0x2dc   : > { %1770 = vmatmul.mubr.bf16.gmra.mxu0 %v1014_v7  ;;  %1883 = vmatmul.mubr.bf16.gmra.mxu1 %v1014_v7 }
 0x324   : > { %v1475_v14 = vpop.f32.mrf.mxu0  ;;  %v1588_v15 = vpop.f32.mrf.mxu1 }
 0x325   : > { %v1476_v18 = vadd.f32 %v1475_v14, %v5256_v10  ;;  %v1589_v19 = vadd.f32 %v1588_v15, %v5260_v13 }
 0x326   : > { %v1477_v20 = vpop.f32.mrf.mxu0  ;;  %v1590_v22 = vpop.f32.mrf.mxu1 }
 0x327   : > { %v1478_v23 = vadd.f32 %v1477_v20, %v5264_v16  ;;  %v1591_v24 = vadd.f32 %v1590_v22, %v5268_v17  ;;  %v1893_v30 = vmax.f32 %v1476_v18, 0.0  ;;  %v1895_v31 = vmax.f32 %v1589_v19, 0.0 }
 0x328   : > { %v1479_v25 = vpop.f32.mrf.mxu0  ;;  %v1592_v27 = vpop.f32.mrf.mxu1 }
 0x329   : > { %v1480_v28 = vadd.f32 %v1479_v25, %v5256_v10  ;;  %v1593_v29 = vadd.f32 %v1592_v27, %v5260_v13  ;;  %v1894_v38 = vmax.f32 %v1478_v23, 0.0  ;;  %v1896_v39 = vmax.f32 %v1591_v24, 0.0 }
 0x32a   : > { %v1481_v32 = vpop.f32.mrf.mxu0  ;;  %v1594_v26 = vpop.f32.mrf.mxu1 }
 0x32b   : > { %v1901_v33 = vmax.f32 %v1480_v28, 0.0  ;;  %v1903_v34 = vmax.f32 %v1593_v29, 0.0  ;;  %v1482_v36 = vadd.f32 %v1481_v32, %v5264_v16  ;;  %v1595_v37 = vadd.f32 %v1594_v26, %v5268_v17 }
 0x32c   : > { %v1485_v40 = vpop.f32.mrf.mxu0  ;;  %v1598_v41 = vpop.f32.mrf.mxu1 }
 0x32d   : > { %v2021_v42 = vmax.f32 %v1893_v30, %v1901_v33  ;;  %v2063_v44 = vmax.f32 %v1895_v31, %v1903_v34  ;;  %v1902_v45 = vmax.f32 %v1482_v36, 0.0  ;;  %v1904_v46 = vmax.f32 %v1595_v37, 0.0 }
 0x32e   : > { %v1486_v47 = vadd.f32 %v1485_v40, %v5256_v10  ;;  %v1599_v48 = vadd.f32 %v1598_v41, %v5260_v13  ;;  %v1487_v49 = vpop.f32.mrf.mxu0  ;;  %v1600_v50 = vpop.f32.mrf.mxu1 }
 0x32f   : > { %v2042_v51 = vmax.f32 %v1894_v38, %v1902_v45  ;;  %v2084_v52 = vmax.f32 %v1896_v39, %v1904_v46  ;;  %v1488_v53 = vadd.f32 %v1487_v49, %v5264_v16  ;;  %v1601_v54 = vadd.f32 %v1600_v50, %v5268_v17 }
 0x330   : > { %v1909_v55 = vmax.f32 %v1486_v47, 0.0  ;;  %v1911_v56 = vmax.f32 %v1599_v48, 0.0  ;;  %v1489_v58 = vpop.f32.mrf.mxu0  ;;  %v1602_v43 = vpop.f32.mrf.mxu1 }
 0x331   : > { %v1910_v60 = vmax.f32 %v1488_v53, 0.0  ;;  %v1912_v61 = vmax.f32 %v1601_v54, 0.0  ;;  %v1490_v62 = vadd.f32 %v1489_v58, %v5256_v10  ;;  %v1603_v63 = vadd.f32 %v1602_v43, %v5260_v13 }
 0x332   : > { %v2022_v59 = vmax.f32 %v2021_v42, %v1909_v55  ;;  %v2064_v0 = vmax.f32 %v2063_v44, %v1911_v56  ;;  %v1491_v1 = vpop.f32.mrf.mxu0  ;;  %v1604_v2 = vpop.f32.mrf.mxu1 }
 0x333   : > { %v2043_v3 = vmax.f32 %v2042_v51, %v1910_v60  ;;  %v2085_v4 = vmax.f32 %v2084_v52, %v1912_v61  ;;  %v1917_v5 = vmax.f32 %v1490_v62, 0.0  ;;  %v1919_v6 = vmax.f32 %v1603_v63, 0.0 }
 0x334   : > { %v1492_v7 = vadd.f32 %v1491_v1, %v5264_v16  ;;  %v1605_v21 = vadd.f32 %v1604_v2, %v5268_v17  ;;  %v1495_v14 = vpop.f32.mrf.mxu0  ;;  %v1608_v15 = vpop.f32.mrf.mxu1 }
 0x335   : > { %v2023_v18 = vmax.f32 %v2022_v59, %v1917_v5  ;;  %v2065_v19 = vmax.f32 %v2064_v0, %v1919_v6  ;;  %v1496_v20 = vadd.f32 %v1495_v14, %v5256_v10  ;;  %v1609_v22 = vadd.f32 %v1608_v15, %v5260_v13 }
 0x336   : > { %v1918_v23 = vmax.f32 %v1492_v7, 0.0  ;;  %v1920_v24 = vmax.f32 %v1605_v21, 0.0  ;;  %v1497_v25 = vpop.f32.mrf.mxu0  ;;  %v1610_v27 = vpop.f32.mrf.mxu1 }
 0x337   : > { %v1925_v28 = vmax.f32 %v1496_v20, 0.0  ;;  %v1927_v29 = vmax.f32 %v1609_v22, 0.0  ;;  %v1498_v30 = vadd.f32 %v1497_v25, %v5264_v16  ;;  %v1611_v31 = vadd.f32 %v1610_v27, %v5268_v17 }
 0x338   : > { %v2044_v32 = vmax.f32 %v2043_v3, %v1918_v23  ;;  %v2086_v26 = vmax.f32 %v2085_v4, %v1920_v24  ;;  %v1499_v33 = vpop.f32.mrf.mxu0  ;;  %v1612_v34 = vpop.f32.mrf.mxu1 }
 0x339   : > { %v2024_v36 = vmax.f32 %v2023_v18, %v1925_v28  ;;  %v2066_v37 = vmax.f32 %v2065_v19, %v1927_v29  ;;  %v1926_v38 = vmax.f32 %v1498_v30, 0.0  ;;  %v1928_v39 = vmax.f32 %v1611_v31, 0.0 }
 0x33a   : > { %v1500_v40 = vadd.f32 %v1499_v33, %v5256_v10  ;;  %v1613_v41 = vadd.f32 %v1612_v34, %v5260_v13  ;;  %v1501_v42 = vpop.f32.mrf.mxu0  ;;  %v1614_v44 = vpop.f32.mrf.mxu1 }
 0x33b   : > { %v2045_v45 = vmax.f32 %v2044_v32, %v1926_v38  ;;  %v2087_v46 = vmax.f32 %v2086_v26, %v1928_v39  ;;  %v1502_v47 = vadd.f32 %v1501_v42, %v5264_v16  ;;  %v1615_v48 = vadd.f32 %v1614_v44, %v5268_v17 }
 0x33c   : > { %v1933_v49 = vmax.f32 %v1500_v40, 0.0  ;;  %v1935_v50 = vmax.f32 %v1613_v41, 0.0  ;;  %v1505_v51 = vpop.f32.mrf.mxu0  ;;  %v1618_v52 = vpop.f32.mrf.mxu1 }
 0x33d   : > { %v1934_v53 = vmax.f32 %v1502_v47, 0.0  ;;  %v1936_v54 = vmax.f32 %v1615_v48, 0.0  ;;  %v1506_v55 = vadd.f32 %v1505_v51, %v5256_v10  ;;  %v1619_v56 = vadd.f32 %v1618_v52, %v5260_v13 }
 0x33e   : > { %v2025_v58 = vmax.f32 %v2024_v36, %v1933_v49  ;;  %v2067_v43 = vmax.f32 %v2066_v37, %v1935_v50  ;;  %v1507_v60 = vpop.f32.mrf.mxu0  ;;  %v1620_v61 = vpop.f32.mrf.mxu1 }
 0x33f   : > { %v2046_v62 = vmax.f32 %v2045_v45, %v1934_v53  ;;  %v2088_v63 = vmax.f32 %v2087_v46, %v1936_v54  ;;  %v1941_v59 = vmax.f32 %v1506_v55, 0.0  ;;  %v1943_v0 = vmax.f32 %v1619_v56, 0.0 }
 0x340   : > { %v1508_v1 = vadd.f32 %v1507_v60, %v5264_v16  ;;  %v1621_v2 = vadd.f32 %v1620_v61, %v5268_v17  ;;  %v1509_v3 = vpop.f32.mrf.mxu0  ;;  %v1622_v4 = vpop.f32.mrf.mxu1 }
 0x341   : > { %v2026_v5 = vmax.f32 %v2025_v58, %v1941_v59  ;;  %v2068_v6 = vmax.f32 %v2067_v43, %v1943_v0  ;;  %v1510_v7 = vadd.f32 %v1509_v3, %v5256_v10  ;;  %v1623_v21 = vadd.f32 %v1622_v4, %v5260_v13 }
 0x342   : > { %v1942_v14 = vmax.f32 %v1508_v1, 0.0  ;;  %v1944_v15 = vmax.f32 %v1621_v2, 0.0  ;;  %v1511_v18 = vpop.f32.mrf.mxu0  ;;  %v1624_v19 = vpop.f32.mrf.mxu1 }
 0x343   : > { %v1949_v20 = vmax.f32 %v1510_v7, 0.0  ;;  %v1951_v22 = vmax.f32 %v1623_v21, 0.0  ;;  %v1512_v23 = vadd.f32 %v1511_v18, %v5264_v16  ;;  %v1625_v24 = vadd.f32 %v1624_v19, %v5268_v17 }
 0x344   : > { %v2047_v25 = vmax.f32 %v2046_v62, %v1942_v14  ;;  %v2089_v27 = vmax.f32 %v2088_v63, %v1944_v15  ;;  %v1515_v28 = vpop.f32.mrf.mxu0  ;;  %v1628_v29 = vpop.f32.mrf.mxu1 }
 0x345   : > { %v2027_v30 = vmax.f32 %v2026_v5, %v1949_v20  ;;  %v2069_v31 = vmax.f32 %v2068_v6, %v1951_v22  ;;  %v1950_v32 = vmax.f32 %v1512_v23, 0.0  ;;  %v1952_v26 = vmax.f32 %v1625_v24, 0.0 }
 0x346   : > { %v1516_v33 = vadd.f32 %v1515_v28, %v5256_v10  ;;  %v1629_v34 = vadd.f32 %v1628_v29, %v5260_v13  ;;  %v1517_v36 = vpop.f32.mrf.mxu0  ;;  %v1630_v37 = vpop.f32.mrf.mxu1 }
 0x347   : > { %v2048_v38 = vmax.f32 %v2047_v25, %v1950_v32  ;;  %v2090_v39 = vmax.f32 %v2089_v27, %v1952_v26  ;;  %v1518_v40 = vadd.f32 %v1517_v36, %v5264_v16  ;;  %v1631_v41 = vadd.f32 %v1630_v37, %v5268_v17 }
 0x348   : > { %v1957_v42 = vmax.f32 %v1516_v33, 0.0  ;;  %v1959_v44 = vmax.f32 %v1629_v34, 0.0  ;;  %v1519_v45 = vpop.f32.mrf.mxu0  ;;  %v1632_v46 = vpop.f32.mrf.mxu1 }
 0x349   : > { %v1958_v47 = vmax.f32 %v1518_v40, 0.0  ;;  %v1960_v48 = vmax.f32 %v1631_v41, 0.0  ;;  %v1520_v49 = vadd.f32 %v1519_v45, %v5256_v10  ;;  %v1633_v50 = vadd.f32 %v1632_v46, %v5260_v13 }
 0x34a   : > { %v2028_v51 = vmax.f32 %v2027_v30, %v1957_v42  ;;  %v2070_v52 = vmax.f32 %v2069_v31, %v1959_v44  ;;  %v1521_v53 = vpop.f32.mrf.mxu0  ;;  %v1634_v54 = vpop.f32.mrf.mxu1 }
 0x34b   : > { %v2049_v55 = vmax.f32 %v2048_v38, %v1958_v47  ;;  %v2091_v56 = vmax.f32 %v2090_v39, %v1960_v48  ;;  %v1965_v58 = vmax.f32 %v1520_v49, 0.0  ;;  %v1967_v43 = vmax.f32 %v1633_v50, 0.0 }
 0x34c   : > { %v1522_v60 = vadd.f32 %v1521_v53, %v5264_v16  ;;  %v1635_v61 = vadd.f32 %v1634_v54, %v5268_v17  ;;  %v1525_v62 = vpop.f32.mrf.mxu0  ;;  %v1638_v63 = vpop.f32.mrf.mxu1 }
 0x34d   : > { %v2029_v59 = vmax.f32 %v2028_v51, %v1965_v58  ;;  %v2071_v0 = vmax.f32 %v2070_v52, %v1967_v43  ;;  %v1526_v1 = vadd.f32 %v1525_v62, %v5256_v10  ;;  %v1639_v2 = vadd.f32 %v1638_v63, %v5260_v13 }
 0x34e   : > { %v1966_v3 = vmax.f32 %v1522_v60, 0.0  ;;  %v1968_v4 = vmax.f32 %v1635_v61, 0.0  ;;  %v1527_v5 = vpop.f32.mrf.mxu0  ;;  %v1640_v6 = vpop.f32.mrf.mxu1 }
 0x34f   : > { %v1973_v7 = vmax.f32 %v1526_v1, 0.0  ;;  %v1975_v21 = vmax.f32 %v1639_v2, 0.0  ;;  %v1528_v14 = vadd.f32 %v1527_v5, %v5264_v16  ;;  %v1641_v15 = vadd.f32 %v1640_v6, %v5268_v17 }
 0x350   : > { %v2050_v18 = vmax.f32 %v2049_v55, %v1966_v3  ;;  %v2092_v19 = vmax.f32 %v2091_v56, %v1968_v4  ;;  %v1529_v20 = vpop.f32.mrf.mxu0  ;;  %v1642_v22 = vpop.f32.mrf.mxu1 }
 0x351   : > { %v2030_v23 = vmax.f32 %v2029_v59, %v1973_v7  ;;  %v2072_v24 = vmax.f32 %v2071_v0, %v1975_v21  ;;  %v1974_v25 = vmax.f32 %v1528_v14, 0.0  ;;  %v1976_v27 = vmax.f32 %v1641_v15, 0.0 }
 0x352   : > { %v1530_v28 = vadd.f32 %v1529_v20, %v5256_v10  ;;  %v1643_v29 = vadd.f32 %v1642_v22, %v5260_v13  ;;  %v1531_v30 = vpop.f32.mrf.mxu0  ;;  %v1644_v31 = vpop.f32.mrf.mxu1 }
 0x353   : > { %v2051_v32 = vmax.f32 %v2050_v18, %v1974_v25  ;;  %v2093_v26 = vmax.f32 %v2092_v19, %v1976_v27  ;;  %v1532_v33 = vadd.f32 %v1531_v30, %v5264_v16  ;;  %v1645_v34 = vadd.f32 %v1644_v31, %v5268_v17 }
 0x354   : > { %v1981_v36 = vmax.f32 %v1530_v28, 0.0  ;;  %v1983_v37 = vmax.f32 %v1643_v29, 0.0  ;;  %v1535_v38 = vpop.f32.mrf.mxu0  ;;  %v1648_v39 = vpop.f32.mrf.mxu1 }
 0x355   : > { %v1982_v40 = vmax.f32 %v1532_v33, 0.0  ;;  %v1984_v41 = vmax.f32 %v1645_v34, 0.0  ;;  %v1536_v42 = vadd.f32 %v1535_v38, %v5256_v10  ;;  %v1649_v44 = vadd.f32 %v1648_v39, %v5260_v13 }
 0x356   : > { %v2031_v45 = vmax.f32 %v2030_v23, %v1981_v36  ;;  %v2073_v46 = vmax.f32 %v2072_v24, %v1983_v37  ;;  %v1537_v47 = vpop.f32.mrf.mxu0  ;;  %v1650_v48 = vpop.f32.mrf.mxu1 }
 0x357   : > { %v2052_v49 = vmax.f32 %v2051_v32, %v1982_v40  ;;  %v2094_v50 = vmax.f32 %v2093_v26, %v1984_v41  ;;  %v1989_v51 = vmax.f32 %v1536_v42, 0.0  ;;  %v1991_v52 = vmax.f32 %v1649_v44, 0.0 }
 0x358   : > { %v1538_v53 = vadd.f32 %v1537_v47, %v5264_v16  ;;  %v1651_v54 = vadd.f32 %v1650_v48, %v5268_v17  ;;  %v1539_v55 = vpop.f32.mrf.mxu0  ;;  %v1652_v56 = vpop.f32.mrf.mxu1 }
 0x359   : > { %v2032_v58 = vmax.f32 %v2031_v45, %v1989_v51  ;;  %v2074_v43 = vmax.f32 %v2073_v46, %v1991_v52  ;;  %v1540_v60 = vadd.f32 %v1539_v55, %v5256_v10  ;;  %v1653_v61 = vadd.f32 %v1652_v56, %v5260_v13 }
 0x35a   : > { %v1990_v62 = vmax.f32 %v1538_v53, 0.0  ;;  %v1992_v63 = vmax.f32 %v1651_v54, 0.0  ;;  %v1541_v59 = vpop.f32.mrf.mxu0  ;;  %v1654_v0 = vpop.f32.mrf.mxu1 }
 0x35b   : > { %v1997_v1 = vmax.f32 %v1540_v60, 0.0  ;;  %v1999_v2 = vmax.f32 %v1653_v61, 0.0  ;;  %v1542_v3 = vadd.f32 %v1541_v59, %v5264_v16  ;;  %v1655_v4 = vadd.f32 %v1654_v0, %v5268_v17 }
 0x35c   : > { %v2053_v5 = vmax.f32 %v2052_v49, %v1990_v62  ;;  %v2095_v6 = vmax.f32 %v2094_v50, %v1992_v63  ;;  %v1545_v7 = vpop.f32.mrf.mxu0  ;;  %v1658_v21 = vpop.f32.mrf.mxu1 }
 0x35d   : > { %v2033_v14 = vmax.f32 %v2032_v58, %v1997_v1  ;;  %v2075_v15 = vmax.f32 %v2074_v43, %v1999_v2  ;;  %v1998_v18 = vmax.f32 %v1542_v3, 0.0  ;;  %v2000_v19 = vmax.f32 %v1655_v4, 0.0 }
 0x35e   : > { %v1546_v20 = vadd.f32 %v1545_v7, %v5256_v10  ;;  %v1659_v22 = vadd.f32 %v1658_v21, %v5260_v13  ;;  %v1547_v23 = vpop.f32.mrf.mxu0  ;;  %v1660_v24 = vpop.f32.mrf.mxu1 }
 0x35f   : > { %v2054_v25 = vmax.f32 %v2053_v5, %v1998_v18  ;;  %v2096_v27 = vmax.f32 %v2095_v6, %v2000_v19  ;;  %v1548_v28 = vadd.f32 %v1547_v23, %v5264_v16  ;;  %v1661_v29 = vadd.f32 %v1660_v24, %v5268_v17 }
 0x360   : > { %v2005_v30 = vmax.f32 %v1546_v20, 0.0  ;;  %v2007_v31 = vmax.f32 %v1659_v22, 0.0  ;;  %v1549_v32 = vpop.f32.mrf.mxu0  ;;  %v1662_v26 = vpop.f32.mrf.mxu1 }
 0x361   : > { %v2006_v33 = vmax.f32 %v1548_v28, 0.0  ;;  %v2008_v34 = vmax.f32 %v1661_v29, 0.0  ;;  %v1550_v36 = vadd.f32 %v1549_v32, %v5256_v10  ;;  %v1663_v37 = vadd.f32 %v1662_v26, %v5260_v13 }
 0x362   : > { %v2034_v38 = vmax.f32 %v2033_v14, %v2005_v30  ;;  %v2076_v39 = vmax.f32 %v2075_v15, %v2007_v31  ;;  %v1551_v40 = vpop.f32.mrf.mxu0  ;;  %v1664_v41 = vpop.f32.mrf.mxu1  ;;  %v1103_v32 = vsub.s32 5, %v5238_v35  ;;  %v1111_v26 = vsub.s32 7, %v5238_v35 }
 0x363   : > { %v2055_v42 = vmax.f32 %v2054_v25, %v2006_v33  ;;  %v2097_v44 = vmax.f32 %v2096_v27, %v2008_v34  ;;  %v2013_v45 = vmax.f32 %v1550_v36, 0.0  ;;  %v2015_v46 = vmax.f32 %v1663_v37, 0.0 }
 0x364   : > { %v1552_v47 = vadd.f32 %v1551_v40, %v5264_v16  ;;  %v1665_v48 = vadd.f32 %v1664_v41, %v5268_v17  ;;  %v1701_v49 = vpop.f32.mrf.mxu0  ;;  %v1814_v50 = vpop.f32.mrf.mxu1  ;;  %v1099_v25 = vsub.s32 4, %v5238_v35  ;;  %v1107_v27 = vsub.s32 6, %v5238_v35 }
 0x365   : > { %v2035_v51 = vmax.f32 %v2034_v38, %v2013_v45  ;;  %v2077_v52 = vmax.f32 %v2076_v39, %v2015_v46  ;;  %v5359_v45 = vrot.slane %v5246_v9, %v1103_v32  ;;  %v5364_v46 = vrot.slane %v5246_v9, %v1111_v26 }
 0x366   : > { %v2014_v53 = vmax.f32 %v1552_v47, 0.0  ;;  %v2016_v10 = vmax.f32 %v1665_v48, 0.0  ;;  %v1703_v54 = vpop.f32.mrf.mxu0  ;;  %v1816_v13 = vpop.f32.mrf.mxu1  ;;  %v5349_v40 = vrot.slane %v5246_v9, %v1099_v25  ;;  %v5354_v41 = vrot.slane %v5246_v9, %v1107_v27 }
 0x367   : > { %v2036_v55 = vrot.slane %v2035_v51, 4  ;;  %v2078_v56 = vrot.slane %v2077_v52, 4  ;;  %v1817_v9 = vadd.f32 %v1816_v13, %v5364_v46 }
 0x368   : > { %v2056_v58 = vmax.f32 %v2055_v42, %v2014_v53  ;;  %v2098_v43 = vmax.f32 %v2097_v44, %v2016_v10  ;;  %v1705_v60 = vpop.f32.mrf.mxu0  ;;  %v1818_v61 = vpop.f32.mrf.mxu1  ;;  %v1702_v53 = vadd.f32 %v1701_v49, %v5349_v40  ;;  %v1815_v10 = vadd.f32 %v1814_v50, %v5354_v41 }
 0x369   : > { %v2037_v62 = vmax.f32 %v2035_v51, %v2036_v55  ;;  %v2079_v63 = vmax.f32 %v2077_v52, %v2078_v56  ;;  %v1706_v47 = vadd.f32 %v1705_v60, %v5349_v40  ;;  %v1819_v48 = vadd.f32 %v1818_v61, %v5354_v41 }
 0x36a   : > { %v2057_v59 = vrot.slane %v2056_v58, 4  ;;  %v2099_v16 = vrot.slane %v2098_v43, 4  ;;  %v1707_v0 = vpop.f32.mrf.mxu0  ;;  %v1820_v17 = vpop.f32.mrf.mxu1 }
 0x36b   : > { %v2038_v1 = vrot.slane %v2037_v62, 2  ;;  %v2080_v2 = vrot.slane %v2079_v63, 2  ;;  %v1708_v55 = vadd.f32 %v1707_v0, %v5359_v45  ;;  %v1821_v56 = vadd.f32 %v1820_v17, %v5364_v46 }
 0x36c   : > { %v2058_v3 = vmax.f32 %v2056_v58, %v2057_v59  ;;  %v2100_v4 = vmax.f32 %v2098_v43, %v2099_v16  ;;  %v1711_v5 = vpop.f32.mrf.mxu0  ;;  %v1824_v6 = vpop.f32.mrf.mxu1  ;;  %v1907_v59 = vmax.f32 %v1819_v48, 0.0 }
 0x36d   : > { %v2039_v7 = vmax.f32 %v2037_v62, %v2038_v1  ;;  %v2081_v21 = vmax.f32 %v2079_v63, %v2080_v2  ;;  %v1704_v62 = vadd.f32 %v1703_v54, %v5359_v45  ;;  %v1712_v60 = vadd.f32 %v1711_v5, %v5349_v40 }
 0x36e   : > { %v2059_v14 = vrot.slane %v2058_v3, 2  ;;  %v2101_v15 = vrot.slane %v2100_v4, 2  ;;  %v1713_v18 = vpop.f32.mrf.mxu0  ;;  %v1826_v19 = vpop.f32.mrf.mxu1  ;;  %v1825_v61 = vadd.f32 %v1824_v6, %v5354_v41  ;;  %v1905_v63 = vmax.f32 %v1706_v47, 0.0 }
 0x36f   : > { %v2040_v20 = vrot.slane %v2039_v7, 1  ;;  %v2082_v22 = vrot.slane %v2081_v21, 1  ;;  %v1714_v50 = vadd.f32 %v1713_v18, %v5359_v45  ;;  %v1827_v0 = vadd.f32 %v1826_v19, %v5364_v46 }
 0x370   : > { %v2060_v23 = vmax.f32 %v2058_v3, %v2059_v14  ;;  %v2102_v24 = vmax.f32 %v2100_v4, %v2101_v15  ;;  %v1715_v28 = vpop.f32.mrf.mxu0  ;;  %v1828_v29 = vpop.f32.mrf.mxu1  ;;  %v1897_v2 = vmax.f32 %v1702_v53, 0.0  ;;  %v1899_v54 = vmax.f32 %v1815_v10, 0.0 }
 0x371   : > { %v5336_v30 = vmax.f32 %v2039_v7, %v2040_v20  ;;  %v5338_v31 = vmax.f32 %v2081_v21, %v2082_v22  ;;  %v1716_v17 = vadd.f32 %v1715_v28, %v5349_v40  ;;  %v1829_v1 = vadd.f32 %v1828_v29, %v5354_v41 }
 0x372   : > { %v2061_v33 = vrot.slane %v2060_v23, 1  ;;  %v2103_v34 = vrot.slane %v2102_v24, 1  ;;  %v1717_v36 = vpop.f32.mrf.mxu0  ;;  %v1830_v37 = vpop.f32.mrf.mxu1  ;;  %v1906_v3 = vmax.f32 %v1708_v55, 0.0  ;;  %v1908_v13 = vmax.f32 %v1821_v56, 0.0 }
 0x373   : > { %v1898_v7 = vmax.f32 %v1704_v62, 0.0  ;;  %v1900_v6 = vmax.f32 %v1817_v9, 0.0  ;;  %v1913_v21 = vmax.f32 %v1712_v60, 0.0  ;;  %v1915_v14 = vmax.f32 %v1825_v61, 0.0 }
 0x374   : > { %v5342_v38 = vmax.f32 %v2060_v23, %v2061_v33  ;;  %v5344_v39 = vmax.f32 %v2102_v24, %v2103_v34  ;;  %v1721_v42 = vpop.f32.mrf.mxu0  ;;  %v1834_v44 = vpop.f32.mrf.mxu1  ;;  %v2105_v15 = vmax.f32 %v1897_v2, %v1905_v63  ;;  %v2147_v20 = vmax.f32 %v1899_v54, %v1907_v59 }
 0x375   : > { %v1718_v18 = vadd.f32 %v1717_v36, %v5359_v45  ;;  %v1831_v19 = vadd.f32 %v1830_v37, %v5364_v46  ;;  %v1914_v24 = vmax.f32 %v1714_v50, 0.0  ;;  %v1916_v28 = vmax.f32 %v1827_v0, 0.0 }
 0x376   : > { %v1723_v51 = vpop.f32.mrf.mxu0  ;;  %v1836_v52 = vpop.f32.mrf.mxu1  ;;  %v1921_v29 = vmax.f32 %v1716_v17, 0.0  ;;  %v1923_v33 = vmax.f32 %v1829_v1, 0.0  ;;  %v2126_v34 = vmax.f32 %v1898_v7, %v1906_v3  ;;  %v2168_v47 = vmax.f32 %v1900_v6, %v1908_v13 }
 0x377   : > { %v1722_v48 = vadd.f32 %v1721_v42, %v5349_v40  ;;  %v1835_v53 = vadd.f32 %v1834_v44, %v5354_v41  ;;  %v2106_v56 = vmax.f32 %v2105_v15, %v1913_v21  ;;  %v2148_v62 = vmax.f32 %v2147_v20, %v1915_v14 }
 0x378   : > { %v1725_v58 = vpop.f32.mrf.mxu0  ;;  %v1838_v43 = vpop.f32.mrf.mxu1  ;;  %v1724_v36 = vadd.f32 %v1723_v51, %v5359_v45  ;;  %v1837_v37 = vadd.f32 %v1836_v52, %v5364_v46  ;;  %v1922_v9 = vmax.f32 %v1718_v18, 0.0  ;;  %v1924_v60 = vmax.f32 %v1831_v19, 0.0 }
 0x379   : > { %v1726_v61 = vadd.f32 %v1725_v58, %v5349_v40  ;;  %v1839_v63 = vadd.f32 %v1838_v43, %v5354_v41  ;;  %v2127_v0 = vmax.f32 %v2126_v34, %v1914_v24  ;;  %v2169_v42 = vmax.f32 %v2168_v47, %v1916_v28 }
 0x37a   : > { %v1727_v16 = vpop.f32.mrf.mxu0  ;;  %v1840_v49 = vpop.f32.mrf.mxu1  ;;  %v2107_v17 = vmax.f32 %v2106_v56, %v1921_v29  ;;  %v2149_v44 = vmax.f32 %v2148_v62, %v1923_v33  ;;  %v1929_v1 = vmax.f32 %v1722_v48, 0.0  ;;  %v1931_v2 = vmax.f32 %v1835_v53, 0.0 }
 0x37b   : > { %v1728_v54 = vadd.f32 %v1727_v16, %v5359_v45  ;;  %v1841_v51 = vadd.f32 %v1840_v49, %v5364_v46  ;;  %v1930_v13 = vmax.f32 %v1724_v36, 0.0  ;;  %v1932_v7 = vmax.f32 %v1837_v37, 0.0 }
 0x37c   : > { %v1731_v4 = vpop.f32.mrf.mxu0  ;;  %v1844_v5 = vpop.f32.mrf.mxu1  ;;  %v2128_v6 = vmax.f32 %v2127_v0, %v1922_v9  ;;  %v2170_v21 = vmax.f32 %v2169_v42, %v1924_v60  ;;  %v1937_v14 = vmax.f32 %v1726_v61, 0.0  ;;  %v1939_v15 = vmax.f32 %v1839_v63, 0.0 }
 0x37d   : > { %v1732_v58 = vadd.f32 %v1731_v4, %v5349_v40  ;;  %v1845_v43 = vadd.f32 %v1844_v5, %v5354_v41  ;;  %v2108_v28 = vmax.f32 %v2107_v17, %v1929_v1  ;;  %v2150_v29 = vmax.f32 %v2149_v44, %v1931_v2 }
 0x37e   : > { %v1733_v22 = vpop.f32.mrf.mxu0  ;;  %v1846_v23 = vpop.f32.mrf.mxu1  ;;  %v1938_v33 = vmax.f32 %v1728_v54, 0.0  ;;  %v1940_v4 = vmax.f32 %v1841_v51, 0.0  ;;  %v2129_v47 = vmax.f32 %v2128_v6, %v1930_v13  ;;  %v2171_v48 = vmax.f32 %v2170_v21, %v1932_v7 }
 0x37f   : > { %v1734_v19 = vadd.f32 %v1733_v22, %v5359_v45  ;;  %v1847_v16 = vadd.f32 %v1846_v23, %v5364_v46  ;;  %v1945_v53 = vmax.f32 %v1732_v58, 0.0  ;;  %v1947_v56 = vmax.f32 %v1845_v43, 0.0 }
 0x380   : > { %v1735_v10 = vpop.f32.mrf.mxu0  ;;  %v1848_v55 = vpop.f32.mrf.mxu1  ;;  %v2109_v62 = vmax.f32 %v2108_v28, %v1937_v14  ;;  %v2151_v36 = vmax.f32 %v2150_v29, %v1939_v15  ;;  %v2130_v63 = vmax.f32 %v2129_v47, %v1938_v33  ;;  %v2172_v0 = vmax.f32 %v2171_v48, %v1940_v4 }
 0x381   : > { %v1736_v49 = vadd.f32 %v1735_v10, %v5349_v40  ;;  %v1849_v24 = vadd.f32 %v1848_v55, %v5354_v41  ;;  %v1946_v9 = vmax.f32 %v1734_v19, 0.0  ;;  %v1948_v55 = vmax.f32 %v1847_v16, 0.0 }
 0x382   : > { %v1737_v59 = vpop.f32.mrf.mxu0  ;;  %v1850_v50 = vpop.f32.mrf.mxu1  ;;  %v2110_v2 = vmax.f32 %v2109_v62, %v1945_v53  ;;  %v2152_v54 = vmax.f32 %v2151_v36, %v1947_v56 }
 0x383   : > { %v1738_v22 = vadd.f32 %v1737_v59, %v5359_v45  ;;  %v1851_v23 = vadd.f32 %v1850_v50, %v5364_v46  ;;  %v1953_v60 = vmax.f32 %v1736_v49, 0.0  ;;  %v1955_v61 = vmax.f32 %v1849_v24, 0.0 }
 0x384   : > { %v1741_v3 = vpop.f32.mrf.mxu0  ;;  %v1854_v52 = vpop.f32.mrf.mxu1  ;;  %v2131_v21 = vmax.f32 %v2130_v63, %v1946_v9 }
 0x385   : > { %v1742_v42 = vadd.f32 %v1741_v3, %v5349_v40  ;;  %v1855_v17 = vadd.f32 %v1854_v52, %v5354_v41  ;;  %v1954_v51 = vmax.f32 %v1738_v22, 0.0  ;;  %v1956_v13 = vmax.f32 %v1851_v23, 0.0 }
 0x386   : > { %v1743_v20 = vpop.f32.mrf.mxu0  ;;  %v1856_v18 = vpop.f32.mrf.mxu1  ;;  %v2173_v3 = vmax.f32 %v2172_v0, %v1948_v55  ;;  %v2111_v14 = vmax.f32 %v2110_v2, %v1953_v60  ;;  %v2153_v52 = vmax.f32 %v2152_v54, %v1955_v61 }
 0x387   : > { %v1744_v59 = vadd.f32 %v1743_v20, %v5359_v45  ;;  %v1857_v50 = vadd.f32 %v1856_v18, %v5364_v46  ;;  %v1961_v15 = vmax.f32 %v1742_v42, 0.0  ;;  %v1963_v19 = vmax.f32 %v1855_v17, 0.0 }
 0x388   : > { %v1745_v34 = vpop.f32.mrf.mxu0  ;;  %v1858_v5 = vpop.f32.mrf.mxu1  ;;  %v2132_v4 = vmax.f32 %v2131_v21, %v1954_v51 }
 0x389   : > { %v1746_v7 = vadd.f32 %v1745_v34, %v5349_v40  ;;  %v1859_v58 = vadd.f32 %v1858_v5, %v5354_v41  ;;  %v1962_v24 = vmax.f32 %v1744_v59, 0.0  ;;  %v1964_v28 = vmax.f32 %v1857_v50, 0.0 }
 0x38a   : > { %v1747_v37 = vpop.f32.mrf.mxu0  ;;  %v1860_v10 = vpop.f32.mrf.mxu1  ;;  %v2174_v34 = vmax.f32 %v2173_v3, %v1956_v13  ;;  %v2112_v23 = vmax.f32 %v2111_v14, %v1961_v15 }
 0x38b   : > { %v1748_v16 = vadd.f32 %v1747_v37, %v5359_v45  ;;  %v1861_v20 = vadd.f32 %v1860_v10, %v5364_v46  ;;  %v1969_v5 = vmax.f32 %v1746_v7, 0.0  ;;  %v1971_v47 = vmax.f32 %v1859_v58, 0.0 }
 0x38c   : > { %v1751_v44 = vpop.f32.mrf.mxu0  ;;  %v1864_v1 = vpop.f32.mrf.mxu1  ;;  %v2154_v37 = vmax.f32 %v2153_v52, %v1963_v19  ;;  %v2133_v61 = vmax.f32 %v2132_v4, %v1962_v24  ;;  %v2175_v63 = vmax.f32 %v2174_v34, %v1964_v28 }
 0x38d   : > { %v1752_v29 = vadd.f32 %v1751_v44, %v5349_v40  ;;  %v1865_v33 = vadd.f32 %v1864_v1, %v5354_v41  ;;  %v1970_v10 = vmax.f32 %v1748_v16, 0.0  ;;  %v1972_v9 = vmax.f32 %v1861_v20, 0.0 }
 0x38e   : > { %v1753_v43 = vpop.f32.mrf.mxu0  ;;  %v1866_v6 = vpop.f32.mrf.mxu1  ;;  %v2113_v17 = vmax.f32 %v2112_v23, %v1969_v5  ;;  %v2155_v44 = vmax.f32 %v2154_v37, %v1971_v47 }
 0x38f   : > { %v1754_v56 = vadd.f32 %v1753_v43, %v5359_v45  ;;  %v1867_v62 = vadd.f32 %v1866_v6, %v5364_v46  ;;  %v1977_v0 = vmax.f32 %v1752_v29, 0.0  ;;  %v1979_v42 = vmax.f32 %v1865_v33, 0.0 }
 0x390   : > { %v1755_v49 = vpop.f32.mrf.mxu0  ;;  %v1868_v18 = vpop.f32.mrf.mxu1  ;;  %v2134_v58 = vmax.f32 %v2133_v61, %v1970_v10  ;;  %v2176_v43 = vmax.f32 %v2175_v63, %v1972_v9 }
 0x391   : > { %v1756_v36 = vadd.f32 %v1755_v49, %v5349_v40  ;;  %v1869_v22 = vadd.f32 %v1868_v18, %v5354_v41  ;;  %v1978_v50 = vmax.f32 %v1754_v56, 0.0  ;;  %v1980_v51 = vmax.f32 %v1867_v62, 0.0 }
 0x392   : > { %v1757_v48 = vpop.f32.mrf.mxu0  ;;  %v1870_v53 = vpop.f32.mrf.mxu1  ;;  %v2114_v52 = vmax.f32 %v2113_v17, %v1977_v0  ;;  %v2156_v15 = vmax.f32 %v2155_v44, %v1979_v42 }
 0x393   : > { %v1758_v1 = vadd.f32 %v1757_v48, %v5359_v45  ;;  %v1871_v2 = vadd.f32 %v1870_v53, %v5364_v46  ;;  %v1985_v13 = vmax.f32 %v1756_v36, 0.0  ;;  %v1987_v7 = vmax.f32 %v1869_v22, 0.0 }
 0x394   : > { %v1761_v55 = vpop.f32.mrf.mxu0  ;;  %v1874_v60 = vpop.f32.mrf.mxu1  ;;  %v2135_v33 = vmax.f32 %v2134_v58, %v1978_v50  ;;  %v2177_v4 = vmax.f32 %v2176_v43, %v1980_v51 }
 0x395   : > { %v1762_v6 = vadd.f32 %v1761_v55, %v5349_v40  ;;  %v1875_v21 = vadd.f32 %v1874_v60, %v5354_v41  ;;  %v1986_v20 = vmax.f32 %v1758_v1, 0.0  ;;  %v1988_v49 = vmax.f32 %v1871_v2, 0.0 }
 0x396   : > { %v1763_v54 = vpop.f32.mrf.mxu0  ;;  %v1876_v59 = vpop.f32.mrf.mxu1  ;;  %v2115_v34 = vmax.f32 %v2114_v52, %v1985_v13  ;;  %v2157_v5 = vmax.f32 %v2156_v15, %v1987_v7 }
 0x397   : > { %v1764_v19 = vadd.f32 %v1763_v54, %v5359_v45  ;;  %v1877_v16 = vadd.f32 %v1876_v59, %v5364_v46  ;;  %v1993_v47 = vmax.f32 %v1762_v6, 0.0  ;;  %v1995_v48 = vmax.f32 %v1875_v21, 0.0 }
 0x398   : > { %v1765_v3 = vpop.f32.mrf.mxu0  ;;  %v1878_v14 = vpop.f32.mrf.mxu1  ;;  %v2136_v9 = vmax.f32 %v2135_v33, %v1986_v20  ;;  %v2178_v55 = vmax.f32 %v2177_v4, %v1988_v49 }
 0x399   : > { %v1766_v18 = vadd.f32 %v1765_v3, %v5349_v40  ;;  %v1879_v24 = vadd.f32 %v1878_v14, %v5354_v41  ;;  %v1994_v22 = vmax.f32 %v1764_v19, 0.0  ;;  %v1996_v23 = vmax.f32 %v1877_v16, 0.0 }
 0x39a   : > { %v1767_v28 = vpop.f32.mrf.mxu0  ;;  %v1880_v29 = vpop.f32.mrf.mxu1  ;;  %v2116_v2 = vmax.f32 %v2115_v34, %v1993_v47  ;;  %v2158_v54 = vmax.f32 %v2157_v5, %v1995_v48 }
 0x39b   : > { %v1768_v53 = vadd.f32 %v1767_v28, %v5359_v45  ;;  %v1881_v56 = vadd.f32 %v1880_v29, %v5364_v46  ;;  %v2001_v60 = vmax.f32 %v1766_v18, 0.0  ;;  %v2003_v61 = vmax.f32 %v1879_v24, 0.0 }
 0x39c   : > { %v1771_v62 = vpop.f32.mrf.mxu0  ;;  %v1884_v36 = vpop.f32.mrf.mxu1  ;;  %v2137_v7 = vmax.f32 %v2136_v9, %v1994_v22  ;;  %v2179_v58 = vmax.f32 %v2178_v55, %v1996_v23 }
 0x39d   : > { %v1772_v37 = vadd.f32 %v1771_v62, %v5349_v40  ;;  %v1885_v10 = vadd.f32 %v1884_v36, %v5354_v41  ;;  %v2002_v42 = vmax.f32 %v1768_v53, 0.0  ;;  %v2004_v17 = vmax.f32 %v1881_v56, 0.0 }
 0x39e   : > { %v1773_v63 = vpop.f32.mrf.mxu0  ;;  %v1886_v0 = vpop.f32.mrf.mxu1  ;;  %v2117_v21 = vmax.f32 %v2116_v2, %v2001_v60  ;;  %v2159_v3 = vmax.f32 %v2158_v54, %v2003_v61 }
 0x39f   : > { %v1774_v44 = vadd.f32 %v1773_v63, %v5359_v45  ;;  %v1887_v1 = vadd.f32 %v1886_v0, %v5364_v46  ;;  %v2009_v59 = vmax.f32 %v1772_v37, 0.0  ;;  %v2011_v50 = vmax.f32 %v1885_v10, 0.0 }
 0x3a0   : > { %v1775_v51 = vpop.f32.mrf.mxu0  ;;  %v1888_v13 = vpop.f32.mrf.mxu1  ;;  %v2138_v16 = vmax.f32 %v2137_v7, %v2002_v42  ;;  %v2180_v20 = vmax.f32 %v2179_v58, %v2004_v17 }
 0x3a1   : > { %v2010_v43 = vmax.f32 %v1774_v44, 0.0  ;;  %v2012_v6 = vmax.f32 %v1887_v1, 0.0  ;;  %v1776_v14 = vadd.f32 %v1775_v51, %v5349_v40  ;;  %v1889_v52 = vadd.f32 %v1888_v13, %v5354_v41 }
 0x3a2   : > { %v1777_v15 = vpop.f32.mrf.mxu0  ;;  %v1890_v19 = vpop.f32.mrf.mxu1  ;;  %v2118_v24 = vmax.f32 %v2117_v21, %v2009_v59  ;;  %v2160_v28 = vmax.f32 %v2159_v3, %v2011_v50 }
 0x3a3   : > { %v1778_v49 = vadd.f32 %v1777_v15, %v5359_v45  ;;  %v1891_v18 = vadd.f32 %v1890_v19, %v5364_v46  ;;  %v2017_v29 = vmax.f32 %v1776_v14, 0.0  ;;  %v2019_v33 = vmax.f32 %v1889_v52, 0.0 }
 0x3a4   : > { %v2139_v4 = vmax.f32 %v2138_v16, %v2010_v43  ;;  %v2181_v34 = vmax.f32 %v2180_v20, %v2012_v6 }
 0x3a5   : > { %v2018_v5 = vmax.f32 %v1778_v49, 0.0  ;;  %v2020_v47 = vmax.f32 %v1891_v18, 0.0  ;;  %v2119_v48 = vmax.f32 %v2118_v24, %v2017_v29  ;;  %v2161_v40 = vmax.f32 %v2160_v28, %v2019_v33 }
 0x3a7   : > { %v2140_v53 = vmax.f32 %v2139_v4, %v2018_v5  ;;  %v2182_v41 = vmax.f32 %v2181_v34, %v2020_v47  ;;  %v2120_v56 = vrot.slane %v2119_v48, 4  ;;  %v2162_v62 = vrot.slane %v2161_v40, 4 }
 0x3a9   : > { %v2141_v36 = vrot.slane %v2140_v53, 4  ;;  %v2183_v22 = vrot.slane %v2182_v41, 4  ;;  %v2121_v23 = vmax.f32 %v2119_v48, %v2120_v56  ;;  %v2163_v45 = vmax.f32 %v2161_v40, %v2162_v62 }
 0x3ab   : > { %v2142_v37 = vmax.f32 %v2140_v53, %v2141_v36  ;;  %v2184_v46 = vmax.f32 %v2182_v41, %v2183_v22  ;;  %v2122_v10 = vrot.slane %v2121_v23, 2  ;;  %v2164_v9 = vrot.slane %v2163_v45, 2 }
 0x3ad   : > { %v2143_v55 = vrot.slane %v2142_v37, 2  ;;  %v2185_v60 = vrot.slane %v2184_v46, 2  ;;  %v2123_v61 = vmax.f32 %v2121_v23, %v2122_v10  ;;  %v2165_v63 = vmax.f32 %v2163_v45, %v2164_v9 }
 0x3af   : > { %v2144_v0 = vmax.f32 %v2142_v37, %v2143_v55  ;;  %v2186_v42 = vmax.f32 %v2184_v46, %v2185_v60  ;;  %v2124_v17 = vrot.slane %v2123_v61, 1  ;;  %v2166_v44 = vrot.slane %v2165_v63, 1  ;;  %2192 = sbr.rel (%p4112_p8) target bundleno = 950 (0x3b6), region = 120 }
 0x3b1   : > { %v2145_v1 = vrot.slane %v2144_v0, 1  ;;  %v2187_v2 = vrot.slane %v2186_v42, 1  ;;  %v2125_v54 = vmax.f32 %v2123_v61, %v2124_v17  ;;  %v2167_v59 = vmax.f32 %v2165_v63, %v2166_v44 }
 0x3b3   : > { %v2146_v50 = vmax.f32 %v2144_v0, %v2145_v1  ;;  %v2188_v51 = vmax.f32 %v2186_v42, %v2187_v2 }
 0x3b4   : > { %v4842_v13 = vmov -inf  }
 0x3b5   : > { %2193 = vst [vmem:[#allocation2] sm:$0xff] %v4842_v13 }
 0x3b6 PF: > { %v4843_v7 = vmov 1966171168   ;;  %v2203_v43 = vcombine.low %v5336_v30, %v5342_v38  ;;  %v2204_v6 = vcombine.low %v5338_v31, %v5344_v39  ;;  %v2205_v21 = vcombine.low %v2125_v54, %v2146_v50  ;;  %p4113_p11 = scmp.ne.s32.totalorder %s4805_s28, 1 }
 0x3b7   : > { %v2208_v58 = vunpack.c.l.s4 %v4843_v7  ;;  %v2206_v3 = vcombine.low %v2167_v59, %v2188_v51 }
 0x3b9   : > { %v2209_v14 = vunpack.c.0.s8 %v2208_v58 }
 0x3bb   : > { %v2212_v52 = vsub.s32 %v2209_v14, %v5238_v35 }
 0x3bc   : > { %v2194_v29 = vld [vmem:[#allocation2] sm:$0xff] }
 0x3bd   : > { %v2213_v15 = vrot.slane %v2203_v43, %v2212_v52  ;;  %v2220_v19 = vrot.slane %v2204_v6, %v2212_v52  ;;  %v2227_v16 = vrot.slane %v2205_v21, %v2212_v52  ;;  %v2234_v20 = vrot.slane %v2206_v3, %v2212_v52 }
 0x3bf   : > { %v2235_v49 = vcombine.low %v2213_v15, %v2220_v19  ;;  %v2236_v18 = vcombine.low %v2227_v16, %v2234_v20 }
 0x3c1   : > { %v2243_v24 = vrot.slane %v2235_v49, %v2212_v52  ;;  %v2250_v28 = vrot.slane %v2236_v18, %v2212_v52 }
 0x3c3   : > { %v2251_v33 = vcombine.low %v2243_v24, %v2250_v28  ;;  %2258 = sbr.rel (%p4113_p11) target bundleno = 1835 (0x72b), region = 124 }
 0x3c5   : > { %v2253_v4 = vmax.f32 %v2194_v29, %v2251_v33 }
 0x3c7   : > { %2254 = vst [vmem:[#allocation2] sm:$0xff] %v2253_v4 }
 0x3c8   : > { %v2321_v30 = vld [vmem:[#allocation14 + $0x1e8] sm:$0xff]  ;;  %v2320_v38 = vld [vmem:[#allocation14 + $0x1e0] sm:$0xff]  ;;  %v2318_v35 = vld [vmem:[#allocation14 + $0x1d0] sm:$0xff]  ;;  %vm3794_vm4 = vcmask 65536  }
 0x3c9   : > { %v2449_v31 = vld [vmem:[#allocation14 + $0x5e8] sm:$0xff]  ;;  %2835 = vmatprep.subr.mxu0 %v2321_v30  ;;  %v2448_v39 = vld [vmem:[#allocation14 + $0x5e0] sm:$0xff] }
 0x3ca   : > { %2906 = vmatprep.subr.mxu1 %v2449_v31  ;;  %v2317_v34 = vld [vmem:[#allocation14 + $0x1c8] sm:$0xff]  ;;  %2836 = vmatpush1.msra.mxu0 %v2320_v38  ;;  %v2316_v47 = vld [vmem:[#allocation14 + $0x1c0] sm:$0xff] }
 0x3cb   : > { %v2445_v5 = vld [vmem:[#allocation14 + $0x5c8] sm:$0xff]  ;;  %2907 = vmatpush1.msra.mxu1 %v2448_v39  ;;  %v2444_v48 = vld [vmem:[#allocation14 + $0x5c0] sm:$0xff]  ;;  %2837 = vmatprep.subr.mxu0 %v2317_v34 }
 0x3cc   : > { %v2313_v40 = vld [vmem:[#allocation14 + $0x1a8] sm:$0xff]  ;;  %2908 = vmatprep.subr.mxu1 %v2445_v5  ;;  %v2312_v41 = vld [vmem:[#allocation14 + $0x1a0] sm:$0xff]  ;;  %2838 = vmatpush1.msra.mxu0 %v2316_v47 }
 0x3cd   : > { %v2441_v53 = vld [vmem:[#allocation14 + $0x5a8] sm:$0xff]  ;;  %v2440_v56 = vld [vmem:[#allocation14 + $0x5a0] sm:$0xff]  ;;  %2909 = vmatpush1.msra.mxu1 %v2444_v48  ;;  %2839 = vmatprep.subr.mxu0 %v2313_v40 }
 0x3ce   : > { %v2309_v62 = vld [vmem:[#allocation14 + $0x188] sm:$0xff]  ;;  %2910 = vmatprep.subr.mxu1 %v2441_v53  ;;  %v2308_v22 = vld [vmem:[#allocation14 + $0x180] sm:$0xff]  ;;  %2840 = vmatpush1.msra.mxu0 %v2312_v41 }
 0x3cf   : > { %v2437_v36 = vld [vmem:[#allocation14 + $0x588] sm:$0xff]  ;;  %v2436_v23 = vld [vmem:[#allocation14 + $0x580] sm:$0xff]  ;;  %2911 = vmatpush1.msra.mxu1 %v2440_v56  ;;  %2841 = vmatprep.subr.mxu0 %v2309_v62 }
 0x3d0   : > { %v2305_v45 = vld [vmem:[#allocation14 + $0x168] sm:$0xff]  ;;  %2912 = vmatprep.subr.mxu1 %v2437_v36  ;;  %v2304_v46 = vld [vmem:[#allocation14 + $0x160] sm:$0xff]  ;;  %2842 = vmatpush1.msra.mxu0 %v2308_v22 }
 0x3d1   : > { %v2433_v37 = vld [vmem:[#allocation14 + $0x568] sm:$0xff]  ;;  %v2432_v10 = vld [vmem:[#allocation14 + $0x560] sm:$0xff]  ;;  %2913 = vmatpush1.msra.mxu1 %v2436_v23  ;;  %2843 = vmatprep.subr.mxu0 %v2305_v45 }
 0x3d2   : > { %v2301_v9 = vld [vmem:[#allocation14 + $0x148] sm:$0xff]  ;;  %2914 = vmatprep.subr.mxu1 %v2433_v37  ;;  %v2300_v60 = vld [vmem:[#allocation14 + $0x140] sm:$0xff]  ;;  %2844 = vmatpush1.msra.mxu0 %v2304_v46 }
 0x3d3   : > { %v2429_v55 = vld [vmem:[#allocation14 + $0x548] sm:$0xff]  ;;  %v2428_v61 = vld [vmem:[#allocation14 + $0x540] sm:$0xff]  ;;  %2915 = vmatpush1.msra.mxu1 %v2432_v10  ;;  %2845 = vmatprep.subr.mxu0 %v2301_v9 }
 0x3d4   : > { %v2297_v63 = vld [vmem:[#allocation14 + $0x128] sm:$0xff]  ;;  %2916 = vmatprep.subr.mxu1 %v2429_v55  ;;  %v2296_v42 = vld [vmem:[#allocation14 + $0x120] sm:$0xff]  ;;  %2846 = vmatpush1.msra.mxu0 %v2300_v60 }
 0x3d5   : > { %v2425_v0 = vld [vmem:[#allocation14 + $0x528] sm:$0xff]  ;;  %v2424_v17 = vld [vmem:[#allocation14 + $0x520] sm:$0xff]  ;;  %2917 = vmatpush1.msra.mxu1 %v2428_v61  ;;  %2847 = vmatprep.subr.mxu0 %v2297_v63 }
 0x3d6   : > { %v2293_v44 = vld [vmem:[#allocation14 + $0x108] sm:$0xff]  ;;  %2918 = vmatprep.subr.mxu1 %v2425_v0  ;;  %v2292_v2 = vld [vmem:[#allocation14 + $0x100] sm:$0xff]  ;;  %2848 = vmatpush1.msra.mxu0 %v2296_v42 }
 0x3d7   : > { %v2421_v1 = vld [vmem:[#allocation14 + $0x508] sm:$0xff]  ;;  %v2420_v54 = vld [vmem:[#allocation14 + $0x500] sm:$0xff]  ;;  %2919 = vmatpush1.msra.mxu1 %v2424_v17  ;;  %2849 = vmatprep.subr.mxu0 %v2293_v44 }
 0x3d8   : > { %v2289_v59 = vld [vmem:[#allocation14 + $0xe8] sm:$0xff]  ;;  %2920 = vmatprep.subr.mxu1 %v2421_v1  ;;  %v2288_v51 = vld [vmem:[#allocation14 + $0xe0] sm:$0xff]  ;;  %2850 = vmatpush1.msra.mxu0 %v2292_v2 }
 0x3d9   : > { %v2417_v50 = vld [vmem:[#allocation14 + $0x4e8] sm:$0xff]  ;;  %v2416_v13 = vld [vmem:[#allocation14 + $0x4e0] sm:$0xff]  ;;  %2921 = vmatpush1.msra.mxu1 %v2420_v54  ;;  %2851 = vmatprep.subr.mxu0 %v2289_v59 }
 0x3da   : > { %v2285_v7 = vld [vmem:[#allocation14 + $0xc8] sm:$0xff]  ;;  %2922 = vmatprep.subr.mxu1 %v2417_v50  ;;  %v2284_v43 = vld [vmem:[#allocation14 + $0xc0] sm:$0xff]  ;;  %2852 = vmatpush1.msra.mxu0 %v2288_v51 }
 0x3db   : > { %v2413_v58 = vld [vmem:[#allocation14 + $0x4c8] sm:$0xff]  ;;  %v2412_v6 = vld [vmem:[#allocation14 + $0x4c0] sm:$0xff]  ;;  %2923 = vmatpush1.msra.mxu1 %v2416_v13  ;;  %2853 = vmatprep.subr.mxu0 %v2285_v7 }
 0x3dc   : > { %v2281_v21 = vld [vmem:[#allocation14 + $0xa8] sm:$0xff]  ;;  %2924 = vmatprep.subr.mxu1 %v2413_v58  ;;  %v2280_v14 = vld [vmem:[#allocation14 + $0xa0] sm:$0xff]  ;;  %2854 = vmatpush1.msra.mxu0 %v2284_v43 }
 0x3dd   : > { %v2409_v3 = vld [vmem:[#allocation14 + $0x4a8] sm:$0xff]  ;;  %v2408_v52 = vld [vmem:[#allocation14 + $0x4a0] sm:$0xff]  ;;  %2925 = vmatpush1.msra.mxu1 %v2412_v6  ;;  %2855 = vmatprep.subr.mxu0 %v2281_v21 }
 0x3de   : > { %v2277_v15 = vld [vmem:[#allocation14 + $0x88] sm:$0xff]  ;;  %2926 = vmatprep.subr.mxu1 %v2409_v3  ;;  %v2276_v16 = vld [vmem:[#allocation14 + $0x80] sm:$0xff]  ;;  %2856 = vmatpush1.msra.mxu0 %v2280_v14 }
 0x3df   : > { %v2405_v19 = vld [vmem:[#allocation14 + $0x488] sm:$0xff]  ;;  %v2404_v20 = vld [vmem:[#allocation14 + $0x480] sm:$0xff]  ;;  %2927 = vmatpush1.msra.mxu1 %v2408_v52  ;;  %2857 = vmatprep.subr.mxu0 %v2277_v15 }
 0x3e0   : > { %v2273_v49 = vld [vmem:[#allocation14 + $0x68] sm:$0xff]  ;;  %2928 = vmatprep.subr.mxu1 %v2405_v19  ;;  %v2272_v24 = vld [vmem:[#allocation14 + $0x60] sm:$0xff]  ;;  %2858 = vmatpush1.msra.mxu0 %v2276_v16 }
 0x3e1   : > { %v2401_v18 = vld [vmem:[#allocation14 + $0x468] sm:$0xff]  ;;  %v2400_v28 = vld [vmem:[#allocation14 + $0x460] sm:$0xff]  ;;  %2929 = vmatpush1.msra.mxu1 %v2404_v20  ;;  %2859 = vmatprep.subr.mxu0 %v2273_v49 }
 0x3e2   : > { %v2269_v29 = vld [vmem:[#allocation14 + $0x48] sm:$0xff]  ;;  %2930 = vmatprep.subr.mxu1 %v2401_v18  ;;  %v2268_v4 = vld [vmem:[#allocation14 + $0x40] sm:$0xff]  ;;  %2860 = vmatpush1.msra.mxu0 %v2272_v24 }
 0x3e3   : > { %v2397_v33 = vld [vmem:[#allocation14 + $0x448] sm:$0xff]  ;;  %v2396_v30 = vld [vmem:[#allocation14 + $0x440] sm:$0xff]  ;;  %2931 = vmatpush1.msra.mxu1 %v2400_v28  ;;  %2861 = vmatprep.subr.mxu0 %v2269_v29 }
 0x3e4   : > { %v2265_v31 = vld [vmem:[#allocation14 + $0x28] sm:$0xff]  ;;  %2932 = vmatprep.subr.mxu1 %v2397_v33  ;;  %v2264_v39 = vld [vmem:[#allocation14 + $0x20] sm:$0xff]  ;;  %2862 = vmatpush1.msra.mxu0 %v2268_v4 }
 0x3e5   : > { %v2393_v38 = vld [vmem:[#allocation14 + $0x428] sm:$0xff]  ;;  %v2392_v34 = vld [vmem:[#allocation14 + $0x420] sm:$0xff]  ;;  %2933 = vmatpush1.msra.mxu1 %v2396_v30  ;;  %2863 = vmatprep.subr.mxu0 %v2265_v31 }
 0x3e6   : > { %v2261_v5 = vld [vmem:[#allocation14 + $0x8] sm:$0xff]  ;;  %2934 = vmatprep.subr.mxu1 %v2393_v38  ;;  %v2260_v48 = vld [vmem:[#allocation14] sm:$0xff]  ;;  %2864 = vmatpush1.msra.mxu0 %v2264_v39 }
 0x3e7   : > { %v2389_v47 = vld [vmem:[#allocation14 + $0x408] sm:$0xff]  ;;  %v2388_v40 = vld [vmem:[#allocation14 + $0x400] sm:$0xff]  ;;  %2935 = vmatpush1.msra.mxu1 %v2392_v34  ;;  %2865 = vmatprep.subr.mxu0 %v2261_v5 }
 0x3e8   : > { %v2385_v53 = vld [vmem:[#allocation14 + $0x3e8] sm:$0xff]  ;;  %2936 = vmatprep.subr.mxu1 %v2389_v47  ;;  %v2384_v56 = vld [vmem:[#allocation14 + $0x3e0] sm:$0xff]  ;;  %2866 = vmatpush1.msra.mxu0 %v2260_v48 }
 0x3e9   : > { %v2513_v41 = vld [vmem:[#allocation14 + $0x7e8] sm:$0xff]  ;;  %v2512_v62 = vld [vmem:[#allocation14 + $0x7e0] sm:$0xff]  ;;  %2937 = vmatpush1.msra.mxu1 %v2388_v40  ;;  %2867 = vmatprep.subr.mxu0 %v2385_v53 }
 0x3ea   : > { %v2381_v36 = vld [vmem:[#allocation14 + $0x3c8] sm:$0xff]  ;;  %2938 = vmatprep.subr.mxu1 %v2513_v41  ;;  %v2380_v23 = vld [vmem:[#allocation14 + $0x3c0] sm:$0xff]  ;;  %2868 = vmatpush2.msra.mxu0 %v2384_v56 }
 0x3eb   : > { %v2509_v22 = vld [vmem:[#allocation14 + $0x7c8] sm:$0xff]  ;;  %v2508_v45 = vld [vmem:[#allocation14 + $0x7c0] sm:$0xff]  ;;  %2939 = vmatpush2.msra.mxu1 %v2512_v62  ;;  %2869 = vmatprep.subr.mxu0 %v2381_v36 }
 0x3ec   : > { %v2377_v37 = vld [vmem:[#allocation14 + $0x3a8] sm:$0xff]  ;;  %2940 = vmatprep.subr.mxu1 %v2509_v22  ;;  %v2376_v10 = vld [vmem:[#allocation14 + $0x3a0] sm:$0xff]  ;;  %2870 = vmatpush2.msra.mxu0 %v2380_v23 }
 0x3ed   : > { %v2505_v46 = vld [vmem:[#allocation14 + $0x7a8] sm:$0xff]  ;;  %v2504_v9 = vld [vmem:[#allocation14 + $0x7a0] sm:$0xff]  ;;  %2941 = vmatpush2.msra.mxu1 %v2508_v45  ;;  %2871 = vmatprep.subr.mxu0 %v2377_v37 }
 0x3ee   : > { %v2373_v55 = vld [vmem:[#allocation14 + $0x388] sm:$0xff]  ;;  %2942 = vmatprep.subr.mxu1 %v2505_v46  ;;  %v2372_v61 = vld [vmem:[#allocation14 + $0x380] sm:$0xff]  ;;  %2872 = vmatpush2.msra.mxu0 %v2376_v10 }
 0x3ef   : > { %v2501_v60 = vld [vmem:[#allocation14 + $0x788] sm:$0xff]  ;;  %v2500_v63 = vld [vmem:[#allocation14 + $0x780] sm:$0xff]  ;;  %2943 = vmatpush2.msra.mxu1 %v2504_v9  ;;  %2873 = vmatprep.subr.mxu0 %v2373_v55 }
 0x3f0   : > { %v2369_v0 = vld [vmem:[#allocation14 + $0x368] sm:$0xff]  ;;  %2944 = vmatprep.subr.mxu1 %v2501_v60  ;;  %v2368_v17 = vld [vmem:[#allocation14 + $0x360] sm:$0xff]  ;;  %2874 = vmatpush2.msra.mxu0 %v2372_v61 }
 0x3f1   : > { %v2497_v42 = vld [vmem:[#allocation14 + $0x768] sm:$0xff]  ;;  %v2496_v44 = vld [vmem:[#allocation14 + $0x760] sm:$0xff]  ;;  %2945 = vmatpush2.msra.mxu1 %v2500_v63  ;;  %2875 = vmatprep.subr.mxu0 %v2369_v0 }
 0x3f2   : > { %v2365_v1 = vld [vmem:[#allocation14 + $0x348] sm:$0xff]  ;;  %2946 = vmatprep.subr.mxu1 %v2497_v42  ;;  %v2364_v54 = vld [vmem:[#allocation14 + $0x340] sm:$0xff]  ;;  %2876 = vmatpush2.msra.mxu0 %v2368_v17 }
 0x3f3   : > { %v2493_v2 = vld [vmem:[#allocation14 + $0x748] sm:$0xff]  ;;  %v2492_v59 = vld [vmem:[#allocation14 + $0x740] sm:$0xff]  ;;  %2947 = vmatpush2.msra.mxu1 %v2496_v44  ;;  %2877 = vmatprep.subr.mxu0 %v2365_v1 }
 0x3f4   : > { %v2361_v50 = vld [vmem:[#allocation14 + $0x328] sm:$0xff]  ;;  %2948 = vmatprep.subr.mxu1 %v2493_v2  ;;  %v2360_v13 = vld [vmem:[#allocation14 + $0x320] sm:$0xff]  ;;  %2878 = vmatpush2.msra.mxu0 %v2364_v54 }
 0x3f5   : > { %v2489_v51 = vld [vmem:[#allocation14 + $0x728] sm:$0xff]  ;;  %v2488_v7 = vld [vmem:[#allocation14 + $0x720] sm:$0xff]  ;;  %2949 = vmatpush2.msra.mxu1 %v2492_v59  ;;  %2879 = vmatprep.subr.mxu0 %v2361_v50 }
 0x3f6   : > { %v2357_v58 = vld [vmem:[#allocation14 + $0x308] sm:$0xff]  ;;  %2950 = vmatprep.subr.mxu1 %v2489_v51  ;;  %v2356_v6 = vld [vmem:[#allocation14 + $0x300] sm:$0xff]  ;;  %2880 = vmatpush2.msra.mxu0 %v2360_v13 }
 0x3f7   : > { %v2485_v43 = vld [vmem:[#allocation14 + $0x708] sm:$0xff]  ;;  %v2484_v21 = vld [vmem:[#allocation14 + $0x700] sm:$0xff]  ;;  %2951 = vmatpush2.msra.mxu1 %v2488_v7  ;;  %2881 = vmatprep.subr.mxu0 %v2357_v58 }
 0x3f8   : > { %v2353_v3 = vld [vmem:[#allocation14 + $0x2e8] sm:$0xff]  ;;  %2952 = vmatprep.subr.mxu1 %v2485_v43  ;;  %v2352_v52 = vld [vmem:[#allocation14 + $0x2e0] sm:$0xff]  ;;  %2882 = vmatpush2.msra.mxu0 %v2356_v6 }
 0x3f9   : > { %v2481_v14 = vld [vmem:[#allocation14 + $0x6e8] sm:$0xff]  ;;  %v2480_v15 = vld [vmem:[#allocation14 + $0x6e0] sm:$0xff]  ;;  %2953 = vmatpush2.msra.mxu1 %v2484_v21  ;;  %2883 = vmatprep.subr.mxu0 %v2353_v3 }
 0x3fa   : > { %v2349_v19 = vld [vmem:[#allocation14 + $0x2c8] sm:$0xff]  ;;  %2954 = vmatprep.subr.mxu1 %v2481_v14  ;;  %v2348_v20 = vld [vmem:[#allocation14 + $0x2c0] sm:$0xff]  ;;  %2884 = vmatpush2.msra.mxu0 %v2352_v52 }
 0x3fb   : > { %v2477_v16 = vld [vmem:[#allocation14 + $0x6c8] sm:$0xff]  ;;  %v2476_v49 = vld [vmem:[#allocation14 + $0x6c0] sm:$0xff]  ;;  %2955 = vmatpush2.msra.mxu1 %v2480_v15  ;;  %2885 = vmatprep.subr.mxu0 %v2349_v19 }
 0x3fc   : > { %v2345_v18 = vld [vmem:[#allocation14 + $0x2a8] sm:$0xff]  ;;  %2956 = vmatprep.subr.mxu1 %v2477_v16  ;;  %v2344_v28 = vld [vmem:[#allocation14 + $0x2a0] sm:$0xff]  ;;  %2886 = vmatpush2.msra.mxu0 %v2348_v20 }
 0x3fd   : > { %v2473_v24 = vld [vmem:[#allocation14 + $0x6a8] sm:$0xff]  ;;  %v2472_v29 = vld [vmem:[#allocation14 + $0x6a0] sm:$0xff]  ;;  %2957 = vmatpush2.msra.mxu1 %v2476_v49  ;;  %2887 = vmatprep.subr.mxu0 %v2345_v18 }
 0x3fe   : > { %v2341_v33 = vld [vmem:[#allocation14 + $0x288] sm:$0xff]  ;;  %2958 = vmatprep.subr.mxu1 %v2473_v24  ;;  %v2340_v30 = vld [vmem:[#allocation14 + $0x280] sm:$0xff]  ;;  %2888 = vmatpush2.msra.mxu0 %v2344_v28 }
 0x3ff   : > { %v2469_v4 = vld [vmem:[#allocation14 + $0x688] sm:$0xff]  ;;  %v2468_v31 = vld [vmem:[#allocation14 + $0x680] sm:$0xff]  ;;  %2959 = vmatpush2.msra.mxu1 %v2472_v29  ;;  %2889 = vmatprep.subr.mxu0 %v2341_v33 }
 0x400   : > { %v2337_v38 = vld [vmem:[#allocation14 + $0x268] sm:$0xff]  ;;  %2960 = vmatprep.subr.mxu1 %v2469_v4  ;;  %v2336_v34 = vld [vmem:[#allocation14 + $0x260] sm:$0xff]  ;;  %2890 = vmatpush2.msra.mxu0 %v2340_v30 }
 0x401   : > { %v2465_v39 = vld [vmem:[#allocation14 + $0x668] sm:$0xff]  ;;  %v2464_v5 = vld [vmem:[#allocation14 + $0x660] sm:$0xff]  ;;  %2961 = vmatpush2.msra.mxu1 %v2468_v31  ;;  %2891 = vmatprep.subr.mxu0 %v2337_v38 }
 0x402   : > { %v2333_v47 = vld [vmem:[#allocation14 + $0x248] sm:$0xff]  ;;  %2962 = vmatprep.subr.mxu1 %v2465_v39  ;;  %v2332_v40 = vld [vmem:[#allocation14 + $0x240] sm:$0xff]  ;;  %2892 = vmatpush2.msra.mxu0 %v2336_v34 }
 0x403   : > { %v2461_v48 = vld [vmem:[#allocation14 + $0x648] sm:$0xff]  ;;  %v2460_v53 = vld [vmem:[#allocation14 + $0x640] sm:$0xff]  ;;  %2963 = vmatpush2.msra.mxu1 %v2464_v5  ;;  %2893 = vmatprep.subr.mxu0 %v2333_v47 }
 0x404   : > { %v5441_v41 = vld [vmem:[#allocation2] sm:$0xff]  ;;  %2964 = vmatprep.subr.mxu1 %v2461_v48  ;;  %v2328_v36 = vld [vmem:[#allocation14 + $0x220] sm:$0xff]  ;;  %2894 = vmatpush2.msra.mxu0 %v2332_v40 }
 0x405   : > { %v2329_v56 = vld [vmem:[#allocation14 + $0x228] sm:$0xff]  ;;  %v2456_v22 = vld [vmem:[#allocation14 + $0x620] sm:$0xff]  ;;  %2965 = vmatpush2.msra.mxu1 %v2460_v53  ;;  %v5445_v37 = vrot.slane %v5441_v41, %v5249_v11  ;;  %v5449_v10 = vrot.slane %v5441_v41, %v5241_v57  ;;  %v5453_v55 = vrot.slane %v5441_v41, %v5252_v12  ;;  %v5457_v61 = vrot.slane %v5441_v41, %v5244_v8 }
 0x406   : > { %v2457_v62 = vld [vmem:[#allocation14 + $0x628] sm:$0xff]  ;;  %2895 = vmatprep.subr.mxu0 %v2329_v56  ;;  %v2324_v46 = vld [vmem:[#allocation14 + $0x200] sm:$0xff] }
 0x407   : > { %v2325_v23 = vld [vmem:[#allocation14 + $0x208] sm:$0xff]  ;;  %2966 = vmatprep.subr.mxu1 %v2457_v62  ;;  %2896 = vmatpush2.msra.mxu0 %v2328_v36  ;;  %v2452_v9 = vld [vmem:[#allocation14 + $0x600] sm:$0xff] }
 0x408   : > { %v2453_v45 = vld [vmem:[#allocation14 + $0x608] sm:$0xff]  ;;  %2967 = vmatpush2.msra.mxu1 %v2456_v22  ;;  %2897 = vmatprep.subr.mxu0 %v2325_v23  ;;  %v2576_v0 = vld [vmem:[#allocation14 + $0x9e0] sm:$0xff] }
 0x409   : > { %2968 = vmatprep.subr.mxu1 %v2453_v45  ;;  %v2577_v60 = vld [vmem:[#allocation14 + $0x9e8] sm:$0xff]  ;;  %2898 = vmatpush2.msra.mxu0 %v2324_v46  ;;  %v2704_v42 = vld [vmem:[#allocation14 + $0xde0] sm:$0xff] }
 0x40a   : > { %2899 = vmatprep.mubr.f32.mxu0 %v5445_v37  ;;  %v2705_v63 = vld [vmem:[#allocation14 + $0xde8] sm:$0xff]  ;;  %2969 = vmatpush2.msra.mxu1 %v2452_v9  ;;  %v2572_v1 = vld [vmem:[#allocation14 + $0x9c0] sm:$0xff] }
 0x40b   : > { %2900 = vmatmul.mubr.f32.vlgmr.msra.gmra.mxu0 %v5449_v10  ;;  %2970 = vmatprep.mubr.f32.mxu1 %v5453_v55  ;;  %v2573_v17 = vld [vmem:[#allocation14 + $0x9c8] sm:$0xff]  ;;  %v2700_v2 = vld [vmem:[#allocation14 + $0xdc0] sm:$0xff] }
 0x40c   : > { %2977 = vmatprep.subr.mxu0 %v2577_v60  ;;  %v2701_v44 = vld [vmem:[#allocation14 + $0xdc8] sm:$0xff]  ;;  %3048 = vmatprep.subr.mxu1 %v2705_v63  ;;  %v2568_v50 = vld [vmem:[#allocation14 + $0x9a0] sm:$0xff] }
 0x40d   : > { %2971 = vmatmul.mubr.f32.vlgmr.msra.gmra.mxu1 %v5457_v61  ;;  %2978 = vmatpush1.msra.mxu0 %v2576_v0  ;;  %v2569_v54 = vld [vmem:[#allocation14 + $0x9a8] sm:$0xff]  ;;  %v2696_v51 = vld [vmem:[#allocation14 + $0xda0] sm:$0xff] }
 0x40e   : > { %3049 = vmatpush1.msra.mxu1 %v2704_v42  ;;  %v2697_v59 = vld [vmem:[#allocation14 + $0xda8] sm:$0xff]  ;;  %2979 = vmatprep.subr.mxu0 %v2573_v17  ;;  %v2564_v58 = vld [vmem:[#allocation14 + $0x980] sm:$0xff] }
 0x40f   : > { %3050 = vmatprep.subr.mxu1 %v2701_v44  ;;  %2980 = vmatpush1.msra.mxu0 %v2572_v1  ;;  %v2565_v13 = vld [vmem:[#allocation14 + $0x988] sm:$0xff]  ;;  %v2692_v43 = vld [vmem:[#allocation14 + $0xd80] sm:$0xff] }
 0x410   : > { %3051 = vmatpush1.msra.mxu1 %v2700_v2  ;;  %v2693_v7 = vld [vmem:[#allocation14 + $0xd88] sm:$0xff]  ;;  %2981 = vmatprep.subr.mxu0 %v2569_v54  ;;  %v2560_v3 = vld [vmem:[#allocation14 + $0x960] sm:$0xff] }
 0x411   : > { %3052 = vmatprep.subr.mxu1 %v2697_v59  ;;  %2982 = vmatpush1.msra.mxu0 %v2568_v50  ;;  %v2561_v6 = vld [vmem:[#allocation14 + $0x968] sm:$0xff]  ;;  %v2688_v14 = vld [vmem:[#allocation14 + $0xd60] sm:$0xff] }
 0x412   : > { %3053 = vmatpush1.msra.mxu1 %v2696_v51  ;;  %v2689_v21 = vld [vmem:[#allocation14 + $0xd68] sm:$0xff]  ;;  %2983 = vmatprep.subr.mxu0 %v2565_v13  ;;  %v2556_v19 = vld [vmem:[#allocation14 + $0x940] sm:$0xff] }
 0x413   : > { %3054 = vmatprep.subr.mxu1 %v2693_v7  ;;  %2984 = vmatpush1.msra.mxu0 %v2564_v58  ;;  %v2557_v52 = vld [vmem:[#allocation14 + $0x948] sm:$0xff]  ;;  %v2684_v16 = vld [vmem:[#allocation14 + $0xd40] sm:$0xff] }
 0x414   : > { %3055 = vmatpush1.msra.mxu1 %v2692_v43  ;;  %v2685_v15 = vld [vmem:[#allocation14 + $0xd48] sm:$0xff]  ;;  %2985 = vmatprep.subr.mxu0 %v2561_v6  ;;  %v2552_v18 = vld [vmem:[#allocation14 + $0x920] sm:$0xff] }
 0x415   : > { %3056 = vmatprep.subr.mxu1 %v2689_v21  ;;  %2986 = vmatpush1.msra.mxu0 %v2560_v3  ;;  %v2553_v20 = vld [vmem:[#allocation14 + $0x928] sm:$0xff]  ;;  %v2680_v24 = vld [vmem:[#allocation14 + $0xd20] sm:$0xff] }
 0x416   : > { %3057 = vmatpush1.msra.mxu1 %v2688_v14  ;;  %v2681_v49 = vld [vmem:[#allocation14 + $0xd28] sm:$0xff]  ;;  %2987 = vmatprep.subr.mxu0 %v2557_v52  ;;  %v2548_v33 = vld [vmem:[#allocation14 + $0x900] sm:$0xff] }
 0x417   : > { %3058 = vmatprep.subr.mxu1 %v2685_v15  ;;  %2988 = vmatpush1.msra.mxu0 %v2556_v19  ;;  %v2549_v28 = vld [vmem:[#allocation14 + $0x908] sm:$0xff]  ;;  %v2676_v4 = vld [vmem:[#allocation14 + $0xd00] sm:$0xff] }
 0x418   : > { %3059 = vmatpush1.msra.mxu1 %v2684_v16  ;;  %v2677_v29 = vld [vmem:[#allocation14 + $0xd08] sm:$0xff]  ;;  %2989 = vmatprep.subr.mxu0 %v2553_v20  ;;  %v2544_v38 = vld [vmem:[#allocation14 + $0x8e0] sm:$0xff] }
 0x419   : > { %3060 = vmatprep.subr.mxu1 %v2681_v49  ;;  %2990 = vmatpush1.msra.mxu0 %v2552_v18  ;;  %v2545_v30 = vld [vmem:[#allocation14 + $0x8e8] sm:$0xff]  ;;  %v2672_v39 = vld [vmem:[#allocation14 + $0xce0] sm:$0xff] }
 0x41a   : > { %3061 = vmatpush1.msra.mxu1 %v2680_v24  ;;  %v2673_v31 = vld [vmem:[#allocation14 + $0xce8] sm:$0xff]  ;;  %2991 = vmatprep.subr.mxu0 %v2549_v28  ;;  %v2540_v47 = vld [vmem:[#allocation14 + $0x8c0] sm:$0xff] }
 0x41b   : > { %3062 = vmatprep.subr.mxu1 %v2677_v29  ;;  %2992 = vmatpush1.msra.mxu0 %v2548_v33  ;;  %v2541_v34 = vld [vmem:[#allocation14 + $0x8c8] sm:$0xff]  ;;  %v2668_v48 = vld [vmem:[#allocation14 + $0xcc0] sm:$0xff] }
 0x41c   : > { %3063 = vmatpush1.msra.mxu1 %v2676_v4  ;;  %v2669_v5 = vld [vmem:[#allocation14 + $0xcc8] sm:$0xff]  ;;  %2993 = vmatprep.subr.mxu0 %v2545_v30  ;;  %v2536_v56 = vld [vmem:[#allocation14 + $0x8a0] sm:$0xff] }
 0x41d   : > { %3064 = vmatprep.subr.mxu1 %v2673_v31  ;;  %2994 = vmatpush1.msra.mxu0 %v2544_v38  ;;  %v2537_v40 = vld [vmem:[#allocation14 + $0x8a8] sm:$0xff]  ;;  %v2664_v62 = vld [vmem:[#allocation14 + $0xca0] sm:$0xff] }
 0x41e   : > { %3065 = vmatpush1.msra.mxu1 %v2672_v39  ;;  %v2665_v53 = vld [vmem:[#allocation14 + $0xca8] sm:$0xff]  ;;  %2995 = vmatprep.subr.mxu0 %v2541_v34  ;;  %v2532_v23 = vld [vmem:[#allocation14 + $0x880] sm:$0xff] }
 0x41f   : > { %3066 = vmatprep.subr.mxu1 %v2669_v5  ;;  %2996 = vmatpush1.msra.mxu0 %v2540_v47  ;;  %v2533_v36 = vld [vmem:[#allocation14 + $0x888] sm:$0xff]  ;;  %v2660_v45 = vld [vmem:[#allocation14 + $0xc80] sm:$0xff] }
 0x420   : > { %3067 = vmatpush1.msra.mxu1 %v2668_v48  ;;  %v2661_v22 = vld [vmem:[#allocation14 + $0xc88] sm:$0xff]  ;;  %2997 = vmatprep.subr.mxu0 %v2537_v40  ;;  %v2528_v60 = vld [vmem:[#allocation14 + $0x860] sm:$0xff] }
 0x421   : > { %3068 = vmatprep.subr.mxu1 %v2665_v53  ;;  %2998 = vmatpush1.msra.mxu0 %v2536_v56  ;;  %v2529_v46 = vld [vmem:[#allocation14 + $0x868] sm:$0xff]  ;;  %v2656_v63 = vld [vmem:[#allocation14 + $0xc60] sm:$0xff] }
 0x422   : > { %3069 = vmatpush1.msra.mxu1 %v2664_v62  ;;  %v2657_v9 = vld [vmem:[#allocation14 + $0xc68] sm:$0xff]  ;;  %2999 = vmatprep.subr.mxu0 %v2533_v36  ;;  %v2524_v17 = vld [vmem:[#allocation14 + $0x840] sm:$0xff] }
 0x423   : > { %3070 = vmatprep.subr.mxu1 %v2661_v22  ;;  %3000 = vmatpush1.msra.mxu0 %v2532_v23  ;;  %v2525_v0 = vld [vmem:[#allocation14 + $0x848] sm:$0xff]  ;;  %v2652_v44 = vld [vmem:[#allocation14 + $0xc40] sm:$0xff] }
 0x424   : > { %3071 = vmatpush1.msra.mxu1 %v2660_v45  ;;  %v2653_v42 = vld [vmem:[#allocation14 + $0xc48] sm:$0xff]  ;;  %3001 = vmatprep.subr.mxu0 %v2529_v46  ;;  %v2520_v54 = vld [vmem:[#allocation14 + $0x820] sm:$0xff] }
 0x425   : > { %3072 = vmatprep.subr.mxu1 %v2657_v9  ;;  %3002 = vmatpush1.msra.mxu0 %v2528_v60  ;;  %v2521_v1 = vld [vmem:[#allocation14 + $0x828] sm:$0xff]  ;;  %v2648_v59 = vld [vmem:[#allocation14 + $0xc20] sm:$0xff] }
 0x426   : > { %3073 = vmatpush1.msra.mxu1 %v2656_v63  ;;  %v2649_v2 = vld [vmem:[#allocation14 + $0xc28] sm:$0xff]  ;;  %3003 = vmatprep.subr.mxu0 %v2525_v0  ;;  %v2516_v13 = vld [vmem:[#allocation14 + $0x800] sm:$0xff] }
 0x427   : > { %3074 = vmatprep.subr.mxu1 %v2653_v42  ;;  %3004 = vmatpush1.msra.mxu0 %v2524_v17  ;;  %v2517_v50 = vld [vmem:[#allocation14 + $0x808] sm:$0xff]  ;;  %v2644_v7 = vld [vmem:[#allocation14 + $0xc00] sm:$0xff] }
 0x428   : > { %3075 = vmatpush1.msra.mxu1 %v2652_v44  ;;  %v2645_v51 = vld [vmem:[#allocation14 + $0xc08] sm:$0xff]  ;;  %3005 = vmatprep.subr.mxu0 %v2521_v1  ;;  %v2640_v6 = vld [vmem:[#allocation14 + $0xbe0] sm:$0xff] }
 0x429   : > { %3076 = vmatprep.subr.mxu1 %v2649_v2  ;;  %3006 = vmatpush1.msra.mxu0 %v2520_v54  ;;  %v2641_v58 = vld [vmem:[#allocation14 + $0xbe8] sm:$0xff]  ;;  %v2768_v21 = vld [vmem:[#allocation14 + $0xfe0] sm:$0xff] }
 0x42a   : > { %3077 = vmatpush1.msra.mxu1 %v2648_v59  ;;  %v2769_v43 = vld [vmem:[#allocation14 + $0xfe8] sm:$0xff]  ;;  %3007 = vmatprep.subr.mxu0 %v2517_v50  ;;  %v2636_v52 = vld [vmem:[#allocation14 + $0xbc0] sm:$0xff] }
 0x42b   : > { %3078 = vmatprep.subr.mxu1 %v2645_v51  ;;  %3008 = vmatpush1.msra.mxu0 %v2516_v13  ;;  %v2637_v3 = vld [vmem:[#allocation14 + $0xbc8] sm:$0xff]  ;;  %v2764_v15 = vld [vmem:[#allocation14 + $0xfc0] sm:$0xff] }
 0x42c   : > { %3079 = vmatpush1.msra.mxu1 %v2644_v7  ;;  %v2765_v14 = vld [vmem:[#allocation14 + $0xfc8] sm:$0xff]  ;;  %3009 = vmatprep.subr.mxu0 %v2641_v58  ;;  %v2632_v20 = vld [vmem:[#allocation14 + $0xba0] sm:$0xff] }
 0x42d   : > { %3080 = vmatprep.subr.mxu1 %v2769_v43  ;;  %3010 = vmatpush2.msra.mxu0 %v2640_v6  ;;  %v2633_v19 = vld [vmem:[#allocation14 + $0xba8] sm:$0xff]  ;;  %v2760_v49 = vld [vmem:[#allocation14 + $0xfa0] sm:$0xff] }
 0x42e   : > { %3081 = vmatpush2.msra.mxu1 %v2768_v21  ;;  %v2761_v16 = vld [vmem:[#allocation14 + $0xfa8] sm:$0xff]  ;;  %3011 = vmatprep.subr.mxu0 %v2637_v3  ;;  %v2628_v28 = vld [vmem:[#allocation14 + $0xb80] sm:$0xff] }
 0x42f   : > { %3082 = vmatprep.subr.mxu1 %v2765_v14  ;;  %3012 = vmatpush2.msra.mxu0 %v2636_v52  ;;  %v2629_v18 = vld [vmem:[#allocation14 + $0xb88] sm:$0xff]  ;;  %v2756_v29 = vld [vmem:[#allocation14 + $0xf80] sm:$0xff] }
 0x430   : > { %3083 = vmatpush2.msra.mxu1 %v2764_v15  ;;  %v2757_v24 = vld [vmem:[#allocation14 + $0xf88] sm:$0xff]  ;;  %3013 = vmatprep.subr.mxu0 %v2633_v19  ;;  %v2624_v30 = vld [vmem:[#allocation14 + $0xb60] sm:$0xff] }
 0x431   : > { %3084 = vmatprep.subr.mxu1 %v2761_v16  ;;  %3014 = vmatpush2.msra.mxu0 %v2632_v20  ;;  %v2625_v33 = vld [vmem:[#allocation14 + $0xb68] sm:$0xff]  ;;  %v2752_v31 = vld [vmem:[#allocation14 + $0xf60] sm:$0xff] }
 0x432   : > { %3085 = vmatpush2.msra.mxu1 %v2760_v49  ;;  %v2753_v4 = vld [vmem:[#allocation14 + $0xf68] sm:$0xff]  ;;  %3015 = vmatprep.subr.mxu0 %v2629_v18  ;;  %v2620_v34 = vld [vmem:[#allocation14 + $0xb40] sm:$0xff]  ;;  %v5466_v18 = vrot.slane %v5441_v41, %v1103_v32  ;;  %v2323_v32 = vld [vmem:[#allocation14 + $0x1f8] sm:$0xff] }
 0x433   : > { %3086 = vmatprep.subr.mxu1 %v2757_v24  ;;  %3016 = vmatpush2.msra.mxu0 %v2628_v28  ;;  %v2621_v38 = vld [vmem:[#allocation14 + $0xb48] sm:$0xff]  ;;  %v2748_v5 = vld [vmem:[#allocation14 + $0xf40] sm:$0xff]  ;;  %v5471_v28 = vrot.slane %v5441_v41, %v1099_v25  ;;  %v2451_v25 = vld [vmem:[#allocation14 + $0x5f8] sm:$0xff] }
 0x434   : > { %3087 = vmatpush2.msra.mxu1 %v2756_v29  ;;  %v2749_v39 = vld [vmem:[#allocation14 + $0xf48] sm:$0xff]  ;;  %3017 = vmatprep.subr.mxu0 %v2625_v33  ;;  %v2616_v40 = vld [vmem:[#allocation14 + $0xb20] sm:$0xff]  ;;  %v5476_v33 = vrot.slane %v5441_v41, %v1111_v26  ;;  %v2319_v26 = vld [vmem:[#allocation14 + $0x1d8] sm:$0xff] }
 0x435   : > { %3088 = vmatprep.subr.mxu1 %v2753_v4  ;;  %3018 = vmatpush2.msra.mxu0 %v2624_v30  ;;  %v2617_v47 = vld [vmem:[#allocation14 + $0xb28] sm:$0xff]  ;;  %v2744_v53 = vld [vmem:[#allocation14 + $0xf20] sm:$0xff]  ;;  %v5481_v4 = vrot.slane %v5441_v41, %v1107_v27  ;;  %v2322_v30 = vld [vmem:[#allocation14 + $0x1f0] sm:$0xff] }
 0x436   : > { %3089 = vmatpush2.msra.mxu1 %v2752_v31  ;;  %v2745_v48 = vld [vmem:[#allocation14 + $0xf28] sm:$0xff]  ;;  %3019 = vmatprep.subr.mxu0 %v2621_v38  ;;  %v2612_v36 = vld [vmem:[#allocation14 + $0xb00] sm:$0xff]  ;;  %v2450_v31 = vld [vmem:[#allocation14 + $0x5f0] sm:$0xff] }
 0x437   : > { %3090 = vmatprep.subr.mxu1 %v2749_v39  ;;  %3020 = vmatpush2.msra.mxu0 %v2620_v34  ;;  %v2613_v56 = vld [vmem:[#allocation14 + $0xb08] sm:$0xff]  ;;  %v2740_v22 = vld [vmem:[#allocation14 + $0xf00] sm:$0xff]  ;;  %v2447_v38 = vld [vmem:[#allocation14 + $0x5d8] sm:$0xff] }
 0x438   : > { %3091 = vmatpush2.msra.mxu1 %v2748_v5  ;;  %v2741_v62 = vld [vmem:[#allocation14 + $0xf08] sm:$0xff]  ;;  %3021 = vmatprep.subr.mxu0 %v2617_v47  ;;  %v2608_v46 = vld [vmem:[#allocation14 + $0xae0] sm:$0xff]  ;;  %v2446_v27 = vld [vmem:[#allocation14 + $0x5d0] sm:$0xff] }
 0x439   : > { %3092 = vmatprep.subr.mxu1 %v2745_v48  ;;  %3022 = vmatpush2.msra.mxu0 %v2616_v40  ;;  %v2609_v23 = vld [vmem:[#allocation14 + $0xae8] sm:$0xff]  ;;  %v2736_v9 = vld [vmem:[#allocation14 + $0xee0] sm:$0xff]  ;;  %v2315_v41 = vld [vmem:[#allocation14 + $0x1b8] sm:$0xff] }
 0x43a   : > { %3093 = vmatpush2.msra.mxu1 %v2744_v53  ;;  %v2737_v45 = vld [vmem:[#allocation14 + $0xee8] sm:$0xff]  ;;  %3023 = vmatprep.subr.mxu0 %v2613_v56  ;;  %v2604_v0 = vld [vmem:[#allocation14 + $0xac0] sm:$0xff]  ;;  %v2443_v39 = vld [vmem:[#allocation14 + $0x5b8] sm:$0xff] }
 0x43b   : > { %3094 = vmatprep.subr.mxu1 %v2741_v62  ;;  %3024 = vmatpush2.msra.mxu0 %v2612_v36  ;;  %v2605_v60 = vld [vmem:[#allocation14 + $0xac8] sm:$0xff]  ;;  %v2732_v42 = vld [vmem:[#allocation14 + $0xec0] sm:$0xff]  ;;  %v2314_v34 = vld [vmem:[#allocation14 + $0x1b0] sm:$0xff] }
 0x43c   : > { %3095 = vmatpush2.msra.mxu1 %v2740_v22  ;;  %v2733_v63 = vld [vmem:[#allocation14 + $0xec8] sm:$0xff]  ;;  %3025 = vmatprep.subr.mxu0 %v2609_v23  ;;  %v2600_v1 = vld [vmem:[#allocation14 + $0xaa0] sm:$0xff]  ;;  %v2442_v5 = vld [vmem:[#allocation14 + $0x5b0] sm:$0xff] }
 0x43d   : > { %3096 = vmatprep.subr.mxu1 %v2737_v45  ;;  %3026 = vmatpush2.msra.mxu0 %v2608_v46  ;;  %v2601_v17 = vld [vmem:[#allocation14 + $0xaa8] sm:$0xff]  ;;  %v2728_v2 = vld [vmem:[#allocation14 + $0xea0] sm:$0xff]  ;;  %v2311_v47 = vld [vmem:[#allocation14 + $0x198] sm:$0xff] }
 0x43e   : > { %3097 = vmatpush2.msra.mxu1 %v2736_v9  ;;  %v2729_v44 = vld [vmem:[#allocation14 + $0xea8] sm:$0xff]  ;;  %3027 = vmatprep.subr.mxu0 %v2605_v60  ;;  %v2596_v50 = vld [vmem:[#allocation14 + $0xa80] sm:$0xff]  ;;  %v2439_v48 = vld [vmem:[#allocation14 + $0x598] sm:$0xff] }
 0x43f   : > { %3098 = vmatprep.subr.mxu1 %v2733_v63  ;;  %3028 = vmatpush2.msra.mxu0 %v2604_v0  ;;  %v2597_v54 = vld [vmem:[#allocation14 + $0xa88] sm:$0xff]  ;;  %v2724_v51 = vld [vmem:[#allocation14 + $0xe80] sm:$0xff]  ;;  %v2310_v40 = vld [vmem:[#allocation14 + $0x190] sm:$0xff] }
 0x440   : > { %3099 = vmatpush2.msra.mxu1 %v2732_v42  ;;  %v2725_v59 = vld [vmem:[#allocation14 + $0xe88] sm:$0xff]  ;;  %3029 = vmatprep.subr.mxu0 %v2601_v17  ;;  %v2592_v58 = vld [vmem:[#allocation14 + $0xa60] sm:$0xff]  ;;  %v2438_v53 = vld [vmem:[#allocation14 + $0x590] sm:$0xff] }
 0x441   : > { %3100 = vmatprep.subr.mxu1 %v2729_v44  ;;  %3030 = vmatpush2.msra.mxu0 %v2600_v1  ;;  %v2593_v13 = vld [vmem:[#allocation14 + $0xa68] sm:$0xff]  ;;  %v2720_v43 = vld [vmem:[#allocation14 + $0xe60] sm:$0xff]  ;;  %v2307_v56 = vld [vmem:[#allocation14 + $0x178] sm:$0xff] }
 0x442   : > { %3101 = vmatpush2.msra.mxu1 %v2728_v2  ;;  %v2721_v7 = vld [vmem:[#allocation14 + $0xe68] sm:$0xff]  ;;  %3031 = vmatprep.subr.mxu0 %v2597_v54  ;;  %v2588_v3 = vld [vmem:[#allocation14 + $0xa40] sm:$0xff]  ;;  %v2435_v62 = vld [vmem:[#allocation14 + $0x578] sm:$0xff] }
 0x443   : > { %3102 = vmatprep.subr.mxu1 %v2725_v59  ;;  %3032 = vmatpush2.msra.mxu0 %v2596_v50  ;;  %v2589_v6 = vld [vmem:[#allocation14 + $0xa48] sm:$0xff]  ;;  %v2716_v14 = vld [vmem:[#allocation14 + $0xe40] sm:$0xff]  ;;  %v2306_v36 = vld [vmem:[#allocation14 + $0x170] sm:$0xff] }
 0x444   : > { %3103 = vmatpush2.msra.mxu1 %v2724_v51  ;;  %v2717_v21 = vld [vmem:[#allocation14 + $0xe48] sm:$0xff]  ;;  %3033 = vmatprep.subr.mxu0 %v2593_v13  ;;  %v2584_v19 = vld [vmem:[#allocation14 + $0xa20] sm:$0xff]  ;;  %v2434_v22 = vld [vmem:[#allocation14 + $0x570] sm:$0xff] }
 0x445   : > { %3104 = vmatprep.subr.mxu1 %v2721_v7  ;;  %3034 = vmatpush2.msra.mxu0 %v2592_v58  ;;  %v2585_v52 = vld [vmem:[#allocation14 + $0xa28] sm:$0xff]  ;;  %v2712_v16 = vld [vmem:[#allocation14 + $0xe20] sm:$0xff]  ;;  %v2303_v23 = vld [vmem:[#allocation14 + $0x158] sm:$0xff] }
 0x446   : > { %3105 = vmatpush2.msra.mxu1 %v2720_v43  ;;  %v2713_v15 = vld [vmem:[#allocation14 + $0xe28] sm:$0xff]  ;;  %3035 = vmatprep.subr.mxu0 %v2589_v6  ;;  %v2580_v24 = vld [vmem:[#allocation14 + $0xa00] sm:$0xff]  ;;  %v2431_v45 = vld [vmem:[#allocation14 + $0x558] sm:$0xff] }
 0x447   : > { %3106 = vmatprep.subr.mxu1 %v2717_v21  ;;  %3036 = vmatpush2.msra.mxu0 %v2588_v3  ;;  %v2581_v20 = vld [vmem:[#allocation14 + $0xa08] sm:$0xff]  ;;  %v2708_v29 = vld [vmem:[#allocation14 + $0xe00] sm:$0xff]  ;;  %v2302_v46 = vld [vmem:[#allocation14 + $0x150] sm:$0xff] }
 0x448   : > { %3107 = vmatpush2.msra.mxu1 %v2716_v14  ;;  %v2709_v49 = vld [vmem:[#allocation14 + $0xe08] sm:$0xff]  ;;  %3037 = vmatprep.subr.mxu0 %v2585_v52  ;;  %v2430_v9 = vld [vmem:[#allocation14 + $0x550] sm:$0xff]  ;;  %v2299_v60 = vld [vmem:[#allocation14 + $0x138] sm:$0xff] }
 0x449   : > { %3108 = vmatprep.subr.mxu1 %v2713_v15  ;;  %3038 = vmatpush2.msra.mxu0 %v2584_v19  ;;  %v2427_v63 = vld [vmem:[#allocation14 + $0x538] sm:$0xff]  ;;  %v2298_v0 = vld [vmem:[#allocation14 + $0x130] sm:$0xff] }
 0x44a   : > { %3109 = vmatpush2.msra.mxu1 %v2712_v16  ;;  %3039 = vmatprep.subr.mxu0 %v2581_v20  ;;  %v2426_v42 = vld [vmem:[#allocation14 + $0x530] sm:$0xff]  ;;  %v2295_v17 = vld [vmem:[#allocation14 + $0x118] sm:$0xff] }
 0x44b   : > { %3110 = vmatprep.subr.mxu1 %v2709_v49  ;;  %3040 = vmatpush2.msra.mxu0 %v2580_v24  ;;  %v2423_v44 = vld [vmem:[#allocation14 + $0x518] sm:$0xff]  ;;  %v2294_v1 = vld [vmem:[#allocation14 + $0x110] sm:$0xff] }
 0x44c   : > { %3041 = vmatprep.mubr.f32.mxu0 %v5466_v18  ;;  %3111 = vmatpush2.msra.mxu1 %v2708_v29  ;;  %v2422_v2 = vld [vmem:[#allocation14 + $0x510] sm:$0xff]  ;;  %v2291_v54 = vld [vmem:[#allocation14 + $0xf8] sm:$0xff] }
 0x44d   : > { %3042 = vmatmul.mubr.f32.vlgmr.msra.gmra.mxu0 %v5471_v28  ;;  %3112 = vmatprep.mubr.f32.mxu1 %v5476_v33  ;;  %v2419_v59 = vld [vmem:[#allocation14 + $0x4f8] sm:$0xff]  ;;  %v2290_v50 = vld [vmem:[#allocation14 + $0xf0] sm:$0xff] }
 0x44e   : > { %3119 = vmatprep.subr.mxu0 %v2323_v32  ;;  %3190 = vmatprep.subr.mxu1 %v2451_v25  ;;  %v2418_v51 = vld [vmem:[#allocation14 + $0x4f0] sm:$0xff]  ;;  %v2287_v13 = vld [vmem:[#allocation14 + $0xd8] sm:$0xff] }
 0x44f   : > { %3113 = vmatmul.mubr.f32.vlgmr.msra.gmra.mxu1 %v5481_v4  ;;  %3120 = vmatpush1.msra.mxu0 %v2322_v30  ;;  %v2415_v7 = vld [vmem:[#allocation14 + $0x4d8] sm:$0xff]  ;;  %v2286_v58 = vld [vmem:[#allocation14 + $0xd0] sm:$0xff] }
 0x450   : > { %3191 = vmatpush1.msra.mxu1 %v2450_v31  ;;  %3121 = vmatprep.subr.mxu0 %v2319_v26  ;;  %v2414_v43 = vld [vmem:[#allocation14 + $0x4d0] sm:$0xff]  ;;  %v2283_v6 = vld [vmem:[#allocation14 + $0xb8] sm:$0xff] }
 0x451   : > { %3192 = vmatprep.subr.mxu1 %v2447_v38  ;;  %3122 = vmatpush1.msra.mxu0 %v2318_v35  ;;  %v2411_v21 = vld [vmem:[#allocation14 + $0x4b8] sm:$0xff]  ;;  %v2282_v3 = vld [vmem:[#allocation14 + $0xb0] sm:$0xff] }
 0x452   : > { %3193 = vmatpush1.msra.mxu1 %v2446_v27  ;;  %3123 = vmatprep.subr.mxu0 %v2315_v41  ;;  %v2410_v14 = vld [vmem:[#allocation14 + $0x4b0] sm:$0xff]  ;;  %v2279_v52 = vld [vmem:[#allocation14 + $0x98] sm:$0xff] }
 0x453   : > { %3194 = vmatprep.subr.mxu1 %v2443_v39  ;;  %3124 = vmatpush1.msra.mxu0 %v2314_v34  ;;  %v2407_v15 = vld [vmem:[#allocation14 + $0x498] sm:$0xff]  ;;  %v2278_v19 = vld [vmem:[#allocation14 + $0x90] sm:$0xff] }
 0x454   : > { %3195 = vmatpush1.msra.mxu1 %v2442_v5  ;;  %3125 = vmatprep.subr.mxu0 %v2311_v47  ;;  %v2406_v16 = vld [vmem:[#allocation14 + $0x490] sm:$0xff]  ;;  %v2275_v20 = vld [vmem:[#allocation14 + $0x78] sm:$0xff] }
 0x455   : > { %3196 = vmatprep.subr.mxu1 %v2439_v48  ;;  %3126 = vmatpush1.msra.mxu0 %v2310_v40  ;;  %v2403_v49 = vld [vmem:[#allocation14 + $0x478] sm:$0xff]  ;;  %v2274_v24 = vld [vmem:[#allocation14 + $0x70] sm:$0xff] }
 0x456   : > { %3197 = vmatpush1.msra.mxu1 %v2438_v53  ;;  %3127 = vmatprep.subr.mxu0 %v2307_v56  ;;  %v2402_v29 = vld [vmem:[#allocation14 + $0x470] sm:$0xff]  ;;  %v2271_v32 = vld [vmem:[#allocation14 + $0x58] sm:$0xff] }
 0x457   : > { %3198 = vmatprep.subr.mxu1 %v2435_v62  ;;  %3128 = vmatpush1.msra.mxu0 %v2306_v36  ;;  %v2399_v25 = vld [vmem:[#allocation14 + $0x458] sm:$0xff]  ;;  %v2270_v30 = vld [vmem:[#allocation14 + $0x50] sm:$0xff] }
 0x458   : > { %3199 = vmatpush1.msra.mxu1 %v2434_v22  ;;  %3129 = vmatprep.subr.mxu0 %v2303_v23  ;;  %v2398_v31 = vld [vmem:[#allocation14 + $0x450] sm:$0xff]  ;;  %v2267_v26 = vld [vmem:[#allocation14 + $0x38] sm:$0xff] }
 0x459   : > { %3200 = vmatprep.subr.mxu1 %v2431_v45  ;;  %3130 = vmatpush1.msra.mxu0 %v2302_v46  ;;  %v2395_v38 = vld [vmem:[#allocation14 + $0x438] sm:$0xff]  ;;  %v2266_v35 = vld [vmem:[#allocation14 + $0x30] sm:$0xff] }
 0x45a   : > { %3201 = vmatpush1.msra.mxu1 %v2430_v9  ;;  %3131 = vmatprep.subr.mxu0 %v2299_v60  ;;  %v2394_v27 = vld [vmem:[#allocation14 + $0x430] sm:$0xff]  ;;  %v2263_v41 = vld [vmem:[#allocation14 + $0x18] sm:$0xff] }
 0x45b   : > { %3202 = vmatprep.subr.mxu1 %v2427_v63  ;;  %3132 = vmatpush1.msra.mxu0 %v2298_v0  ;;  %v2391_v39 = vld [vmem:[#allocation14 + $0x418] sm:$0xff]  ;;  %v2262_v34 = vld [vmem:[#allocation14 + $0x10] sm:$0xff] }
 0x45c   : > { %3203 = vmatpush1.msra.mxu1 %v2426_v42  ;;  %3133 = vmatprep.subr.mxu0 %v2295_v17  ;;  %v2390_v5 = vld [vmem:[#allocation14 + $0x410] sm:$0xff]  ;;  %v2387_v47 = vld [vmem:[#allocation14 + $0x3f8] sm:$0xff] }
 0x45d   : > { %3204 = vmatprep.subr.mxu1 %v2423_v44  ;;  %3134 = vmatpush1.msra.mxu0 %v2294_v1  ;;  %v2515_v48 = vld [vmem:[#allocation14 + $0x7f8] sm:$0xff]  ;;  %v2386_v40 = vld [vmem:[#allocation14 + $0x3f0] sm:$0xff] }
 0x45e   : > { %3205 = vmatpush1.msra.mxu1 %v2422_v2  ;;  %3135 = vmatprep.subr.mxu0 %v2291_v54  ;;  %v2514_v53 = vld [vmem:[#allocation14 + $0x7f0] sm:$0xff]  ;;  %v2383_v56 = vld [vmem:[#allocation14 + $0x3d8] sm:$0xff] }
 0x45f   : > { %3206 = vmatprep.subr.mxu1 %v2419_v59  ;;  %3136 = vmatpush1.msra.mxu0 %v2290_v50  ;;  %v2511_v62 = vld [vmem:[#allocation14 + $0x7d8] sm:$0xff]  ;;  %v2382_v36 = vld [vmem:[#allocation14 + $0x3d0] sm:$0xff] }
 0x460   : > { %3207 = vmatpush1.msra.mxu1 %v2418_v51  ;;  %3137 = vmatprep.subr.mxu0 %v2287_v13  ;;  %v2510_v22 = vld [vmem:[#allocation14 + $0x7d0] sm:$0xff]  ;;  %v2379_v23 = vld [vmem:[#allocation14 + $0x3b8] sm:$0xff] }
 0x461   : > { %3208 = vmatprep.subr.mxu1 %v2415_v7  ;;  %3138 = vmatpush1.msra.mxu0 %v2286_v58  ;;  %v2507_v45 = vld [vmem:[#allocation14 + $0x7b8] sm:$0xff]  ;;  %v2378_v46 = vld [vmem:[#allocation14 + $0x3b0] sm:$0xff] }
 0x462   : > { %3209 = vmatpush1.msra.mxu1 %v2414_v43  ;;  %3139 = vmatprep.subr.mxu0 %v2283_v6  ;;  %v2506_v9 = vld [vmem:[#allocation14 + $0x7b0] sm:$0xff]  ;;  %v2375_v60 = vld [vmem:[#allocation14 + $0x398] sm:$0xff] }
 0x463   : > { %3210 = vmatprep.subr.mxu1 %v2411_v21  ;;  %3140 = vmatpush1.msra.mxu0 %v2282_v3  ;;  %v2503_v63 = vld [vmem:[#allocation14 + $0x798] sm:$0xff]  ;;  %v2374_v0 = vld [vmem:[#allocation14 + $0x390] sm:$0xff] }
 0x464   : > { %3211 = vmatpush1.msra.mxu1 %v2410_v14  ;;  %3141 = vmatprep.subr.mxu0 %v2279_v52  ;;  %v2502_v42 = vld [vmem:[#allocation14 + $0x790] sm:$0xff]  ;;  %v2371_v17 = vld [vmem:[#allocation14 + $0x378] sm:$0xff] }
 0x465   : > { %3212 = vmatprep.subr.mxu1 %v2407_v15  ;;  %3142 = vmatpush1.msra.mxu0 %v2278_v19  ;;  %v2499_v44 = vld [vmem:[#allocation14 + $0x778] sm:$0xff]  ;;  %v2370_v1 = vld [vmem:[#allocation14 + $0x370] sm:$0xff] }
 0x466   : > { %3213 = vmatpush1.msra.mxu1 %v2406_v16  ;;  %3143 = vmatprep.subr.mxu0 %v2275_v20  ;;  %v2498_v2 = vld [vmem:[#allocation14 + $0x770] sm:$0xff]  ;;  %v2367_v54 = vld [vmem:[#allocation14 + $0x358] sm:$0xff] }
 0x467   : > { %3214 = vmatprep.subr.mxu1 %v2403_v49  ;;  %3144 = vmatpush1.msra.mxu0 %v2274_v24  ;;  %v2495_v59 = vld [vmem:[#allocation14 + $0x758] sm:$0xff]  ;;  %v2366_v50 = vld [vmem:[#allocation14 + $0x350] sm:$0xff] }
 0x468   : > { %3215 = vmatpush1.msra.mxu1 %v2402_v29  ;;  %3145 = vmatprep.subr.mxu0 %v2271_v32  ;;  %v2494_v51 = vld [vmem:[#allocation14 + $0x750] sm:$0xff]  ;;  %v2363_v13 = vld [vmem:[#allocation14 + $0x338] sm:$0xff] }
 0x469   : > { %3216 = vmatprep.subr.mxu1 %v2399_v25  ;;  %3146 = vmatpush1.msra.mxu0 %v2270_v30  ;;  %v2491_v7 = vld [vmem:[#allocation14 + $0x738] sm:$0xff]  ;;  %v2362_v58 = vld [vmem:[#allocation14 + $0x330] sm:$0xff] }
 0x46a   : > { %3217 = vmatpush1.msra.mxu1 %v2398_v31  ;;  %3147 = vmatprep.subr.mxu0 %v2267_v26  ;;  %v2490_v43 = vld [vmem:[#allocation14 + $0x730] sm:$0xff]  ;;  %v2359_v6 = vld [vmem:[#allocation14 + $0x318] sm:$0xff] }
 0x46b   : > { %3218 = vmatprep.subr.mxu1 %v2395_v38  ;;  %3148 = vmatpush1.msra.mxu0 %v2266_v35  ;;  %v2487_v21 = vld [vmem:[#allocation14 + $0x718] sm:$0xff]  ;;  %v2358_v3 = vld [vmem:[#allocation14 + $0x310] sm:$0xff] }
 0x46c   : > { %3219 = vmatpush1.msra.mxu1 %v2394_v27  ;;  %3149 = vmatprep.subr.mxu0 %v2263_v41  ;;  %v2486_v14 = vld [vmem:[#allocation14 + $0x710] sm:$0xff]  ;;  %v2355_v52 = vld [vmem:[#allocation14 + $0x2f8] sm:$0xff] }
 0x46d   : > { %3220 = vmatprep.subr.mxu1 %v2391_v39  ;;  %3150 = vmatpush1.msra.mxu0 %v2262_v34  ;;  %v2483_v15 = vld [vmem:[#allocation14 + $0x6f8] sm:$0xff]  ;;  %v2354_v19 = vld [vmem:[#allocation14 + $0x2f0] sm:$0xff] }
 0x46e   : > { %3221 = vmatpush1.msra.mxu1 %v2390_v5  ;;  %3151 = vmatprep.subr.mxu0 %v2387_v47  ;;  %v2482_v16 = vld [vmem:[#allocation14 + $0x6f0] sm:$0xff]  ;;  %v2351_v20 = vld [vmem:[#allocation14 + $0x2d8] sm:$0xff] }
 0x46f   : > { %3222 = vmatprep.subr.mxu1 %v2515_v48  ;;  %3152 = vmatpush2.msra.mxu0 %v2386_v40  ;;  %v2479_v49 = vld [vmem:[#allocation14 + $0x6d8] sm:$0xff]  ;;  %v2350_v24 = vld [vmem:[#allocation14 + $0x2d0] sm:$0xff] }
 0x470   : > { %3223 = vmatpush2.msra.mxu1 %v2514_v53  ;;  %3153 = vmatprep.subr.mxu0 %v2383_v56  ;;  %v2478_v29 = vld [vmem:[#allocation14 + $0x6d0] sm:$0xff]  ;;  %v2347_v32 = vld [vmem:[#allocation14 + $0x2b8] sm:$0xff] }
 0x471   : > { %3224 = vmatprep.subr.mxu1 %v2511_v62  ;;  %3154 = vmatpush2.msra.mxu0 %v2382_v36  ;;  %v2475_v25 = vld [vmem:[#allocation14 + $0x6b8] sm:$0xff]  ;;  %v2346_v30 = vld [vmem:[#allocation14 + $0x2b0] sm:$0xff] }
 0x472   : > { %3225 = vmatpush2.msra.mxu1 %v2510_v22  ;;  %3155 = vmatprep.subr.mxu0 %v2379_v23  ;;  %v2474_v31 = vld [vmem:[#allocation14 + $0x6b0] sm:$0xff]  ;;  %v2343_v26 = vld [vmem:[#allocation14 + $0x298] sm:$0xff] }
 0x473   : > { %3226 = vmatprep.subr.mxu1 %v2507_v45  ;;  %3156 = vmatpush2.msra.mxu0 %v2378_v46  ;;  %v2471_v38 = vld [vmem:[#allocation14 + $0x698] sm:$0xff]  ;;  %v2342_v35 = vld [vmem:[#allocation14 + $0x290] sm:$0xff] }
 0x474   : > { %3227 = vmatpush2.msra.mxu1 %v2506_v9  ;;  %3157 = vmatprep.subr.mxu0 %v2375_v60  ;;  %v2470_v27 = vld [vmem:[#allocation14 + $0x690] sm:$0xff]  ;;  %v2339_v41 = vld [vmem:[#allocation14 + $0x278] sm:$0xff] }
 0x475   : > { %3228 = vmatprep.subr.mxu1 %v2503_v63  ;;  %3158 = vmatpush2.msra.mxu0 %v2374_v0  ;;  %v2467_v39 = vld [vmem:[#allocation14 + $0x678] sm:$0xff]  ;;  %v2338_v34 = vld [vmem:[#allocation14 + $0x270] sm:$0xff] }
 0x476   : > { %3229 = vmatpush2.msra.mxu1 %v2502_v42  ;;  %3159 = vmatprep.subr.mxu0 %v2371_v17  ;;  %v2466_v5 = vld [vmem:[#allocation14 + $0x670] sm:$0xff]  ;;  %v2335_v47 = vld [vmem:[#allocation14 + $0x258] sm:$0xff] }
 0x477   : > { %3230 = vmatprep.subr.mxu1 %v2499_v44  ;;  %3160 = vmatpush2.msra.mxu0 %v2370_v1  ;;  %v2463_v48 = vld [vmem:[#allocation14 + $0x658] sm:$0xff]  ;;  %v2334_v40 = vld [vmem:[#allocation14 + $0x250] sm:$0xff] }
 0x478   : > { %3231 = vmatpush2.msra.mxu1 %v2498_v2  ;;  %3161 = vmatprep.subr.mxu0 %v2367_v54  ;;  %v2462_v53 = vld [vmem:[#allocation14 + $0x650] sm:$0xff]  ;;  %v2331_v56 = vld [vmem:[#allocation14 + $0x238] sm:$0xff] }
 0x479   : > { %3232 = vmatprep.subr.mxu1 %v2495_v59  ;;  %3162 = vmatpush2.msra.mxu0 %v2366_v50  ;;  %v2459_v62 = vld [vmem:[#allocation14 + $0x638] sm:$0xff]  ;;  %v2330_v36 = vld [vmem:[#allocation14 + $0x230] sm:$0xff] }
 0x47a   : > { %3233 = vmatpush2.msra.mxu1 %v2494_v51  ;;  %3163 = vmatprep.subr.mxu0 %v2363_v13  ;;  %v2458_v22 = vld [vmem:[#allocation14 + $0x630] sm:$0xff]  ;;  %v2327_v23 = vld [vmem:[#allocation14 + $0x218] sm:$0xff] }
 0x47b   : > { %3234 = vmatprep.subr.mxu1 %v2491_v7  ;;  %3164 = vmatpush2.msra.mxu0 %v2362_v58  ;;  %v2455_v45 = vld [vmem:[#allocation14 + $0x618] sm:$0xff]  ;;  %v2326_v46 = vld [vmem:[#allocation14 + $0x210] sm:$0xff] }
 0x47c   : > { %3235 = vmatpush2.msra.mxu1 %v2490_v43  ;;  %3165 = vmatprep.subr.mxu0 %v2359_v6  ;;  %v2454_v9 = vld [vmem:[#allocation14 + $0x610] sm:$0xff]  ;;  %v2579_v60 = vld [vmem:[#allocation14 + $0x9f8] sm:$0xff] }
 0x47d   : > { %3236 = vmatprep.subr.mxu1 %v2487_v21  ;;  %3166 = vmatpush2.msra.mxu0 %v2358_v3  ;;  %v2707_v63 = vld [vmem:[#allocation14 + $0xdf8] sm:$0xff]  ;;  %v2578_v0 = vld [vmem:[#allocation14 + $0x9f0] sm:$0xff] }
 0x47e   : > { %3237 = vmatpush2.msra.mxu1 %v2486_v14  ;;  %3167 = vmatprep.subr.mxu0 %v2355_v52  ;;  %v2706_v42 = vld [vmem:[#allocation14 + $0xdf0] sm:$0xff]  ;;  %v2575_v17 = vld [vmem:[#allocation14 + $0x9d8] sm:$0xff] }
 0x47f   : > { %3238 = vmatprep.subr.mxu1 %v2483_v15  ;;  %3168 = vmatpush2.msra.mxu0 %v2354_v19  ;;  %v2703_v44 = vld [vmem:[#allocation14 + $0xdd8] sm:$0xff]  ;;  %v2574_v1 = vld [vmem:[#allocation14 + $0x9d0] sm:$0xff] }
 0x480   : > { %3239 = vmatpush2.msra.mxu1 %v2482_v16  ;;  %3169 = vmatprep.subr.mxu0 %v2351_v20  ;;  %v2702_v2 = vld [vmem:[#allocation14 + $0xdd0] sm:$0xff]  ;;  %v2571_v54 = vld [vmem:[#allocation14 + $0x9b8] sm:$0xff] }
 0x481   : > { %3240 = vmatprep.subr.mxu1 %v2479_v49  ;;  %3170 = vmatpush2.msra.mxu0 %v2350_v24  ;;  %v2570_v59 = vld [vmem:[#allocation14 + $0x9b0] sm:$0xff]  ;;  %v2567_v50 = vld [vmem:[#allocation14 + $0x998] sm:$0xff] }
 0x482   : > { %3241 = vmatpush2.msra.mxu1 %v2478_v29  ;;  %3171 = vmatprep.subr.mxu0 %v2347_v32  ;;  %v2566_v51 = vld [vmem:[#allocation14 + $0x990] sm:$0xff]  ;;  %v2691_v7 = vld [vmem:[#allocation14 + $0xd78] sm:$0xff] }
 0x483   : > { %3242 = vmatprep.subr.mxu1 %v2475_v25  ;;  %3172 = vmatpush2.msra.mxu0 %v2346_v30  ;;  %v2694_v13 = vld [vmem:[#allocation14 + $0xd90] sm:$0xff]  ;;  %v2559_v6 = vld [vmem:[#allocation14 + $0x958] sm:$0xff] }
 0x484   : > { %3243 = vmatpush2.msra.mxu1 %v2474_v31  ;;  %3173 = vmatprep.subr.mxu0 %v2343_v26  ;;  %v2562_v58 = vld [vmem:[#allocation14 + $0x970] sm:$0xff]  ;;  %v2687_v21 = vld [vmem:[#allocation14 + $0xd58] sm:$0xff] }
 0x485   : > { %3244 = vmatprep.subr.mxu1 %v2471_v38  ;;  %3174 = vmatpush2.msra.mxu0 %v2342_v35  ;;  %v2690_v43 = vld [vmem:[#allocation14 + $0xd70] sm:$0xff]  ;;  %v2555_v52 = vld [vmem:[#allocation14 + $0x938] sm:$0xff] }
 0x486   : > { %3245 = vmatpush2.msra.mxu1 %v2470_v27  ;;  %3175 = vmatprep.subr.mxu0 %v2339_v41  ;;  %v2558_v3 = vld [vmem:[#allocation14 + $0x950] sm:$0xff]  ;;  %v2683_v15 = vld [vmem:[#allocation14 + $0xd38] sm:$0xff] }
 0x487   : > { %3246 = vmatprep.subr.mxu1 %v2467_v39  ;;  %3176 = vmatpush2.msra.mxu0 %v2338_v34  ;;  %v2686_v14 = vld [vmem:[#allocation14 + $0xd50] sm:$0xff]  ;;  %v2551_v20 = vld [vmem:[#allocation14 + $0x918] sm:$0xff] }
 0x488   : > { %3247 = vmatpush2.msra.mxu1 %v2466_v5  ;;  %3177 = vmatprep.subr.mxu0 %v2335_v47  ;;  %v2554_v19 = vld [vmem:[#allocation14 + $0x930] sm:$0xff]  ;;  %v2679_v49 = vld [vmem:[#allocation14 + $0xd18] sm:$0xff] }
 0x489   : > { %3248 = vmatprep.subr.mxu1 %v2463_v48  ;;  %3178 = vmatpush2.msra.mxu0 %v2334_v40  ;;  %v2682_v16 = vld [vmem:[#allocation14 + $0xd30] sm:$0xff]  ;;  %v2547_v32 = vld [vmem:[#allocation14 + $0x8f8] sm:$0xff] }
 0x48a   : > { %3249 = vmatpush2.msra.mxu1 %v2462_v53  ;;  %3179 = vmatprep.subr.mxu0 %v2331_v56  ;;  %v2550_v24 = vld [vmem:[#allocation14 + $0x910] sm:$0xff]  ;;  %v2675_v25 = vld [vmem:[#allocation14 + $0xcf8] sm:$0xff] }
 0x48b   : > { %3250 = vmatprep.subr.mxu1 %v2459_v62  ;;  %3180 = vmatpush2.msra.mxu0 %v2330_v36  ;;  %v2678_v29 = vld [vmem:[#allocation14 + $0xd10] sm:$0xff]  ;;  %v2543_v26 = vld [vmem:[#allocation14 + $0x8d8] sm:$0xff] }
 0x48c   : > { %3251 = vmatpush2.msra.mxu1 %v2458_v22  ;;  %3181 = vmatprep.subr.mxu0 %v2327_v23  ;;  %v2546_v30 = vld [vmem:[#allocation14 + $0x8f0] sm:$0xff]  ;;  %v2671_v38 = vld [vmem:[#allocation14 + $0xcd8] sm:$0xff] }
 0x48d   : > { %3252 = vmatprep.subr.mxu1 %v2455_v45  ;;  %3182 = vmatpush2.msra.mxu0 %v2326_v46  ;;  %v2674_v31 = vld [vmem:[#allocation14 + $0xcf0] sm:$0xff]  ;;  %v2539_v41 = vld [vmem:[#allocation14 + $0x8b8] sm:$0xff] }
 0x48e   : > { %3183 = vmatprep.mubr.f32.mxu0 %v5445_v37  ;;  %3253 = vmatpush2.msra.mxu1 %v2454_v9  ;;  %v2699_v37 = vld [vmem:[#allocation14 + $0xdb8] sm:$0xff]  ;;  %v2542_v35 = vld [vmem:[#allocation14 + $0x8d0] sm:$0xff] }
 0x48f   : > { %3184 = vmatmul.mubr.f32.vlgmr.msra.gmra.mxu0 %v5449_v10  ;;  %3254 = vmatprep.mubr.f32.mxu1 %v5453_v55  ;;  %v2698_v10 = vld [vmem:[#allocation14 + $0xdb0] sm:$0xff]  ;;  %v2695_v55 = vld [vmem:[#allocation14 + $0xd98] sm:$0xff] }
 0x490   : > { %3261 = vmatprep.subr.mxu0 %v2579_v60  ;;  %3332 = vmatprep.subr.mxu1 %v2707_v63  ;;  %v2670_v27 = vld [vmem:[#allocation14 + $0xcd0] sm:$0xff]  ;;  %v2667_v39 = vld [vmem:[#allocation14 + $0xcb8] sm:$0xff] }
 0x491   : > { %3255 = vmatmul.mubr.f32.vlgmr.msra.gmra.mxu1 %v5457_v61  ;;  %3262 = vmatpush1.msra.mxu0 %v2578_v0  ;;  %v2563_v61 = vld [vmem:[#allocation14 + $0x978] sm:$0xff]  ;;  %v2538_v34 = vld [vmem:[#allocation14 + $0x8b0] sm:$0xff] }
 0x492   : > { %3333 = vmatpush1.msra.mxu1 %v2706_v42  ;;  %3263 = vmatprep.subr.mxu0 %v2575_v17  ;;  %v2666_v5 = vld [vmem:[#allocation14 + $0xcb0] sm:$0xff]  ;;  %v2535_v47 = vld [vmem:[#allocation14 + $0x898] sm:$0xff] }
 0x493   : > { %3334 = vmatprep.subr.mxu1 %v2703_v44  ;;  %3264 = vmatpush1.msra.mxu0 %v2574_v1  ;;  %v2663_v48 = vld [vmem:[#allocation14 + $0xc98] sm:$0xff]  ;;  %v2534_v40 = vld [vmem:[#allocation14 + $0x890] sm:$0xff] }
 0x494   : > { %3335 = vmatpush1.msra.mxu1 %v2702_v2  ;;  %3265 = vmatprep.subr.mxu0 %v2571_v54  ;;  %v2662_v53 = vld [vmem:[#allocation14 + $0xc90] sm:$0xff]  ;;  %v2531_v56 = vld [vmem:[#allocation14 + $0x878] sm:$0xff] }
 0x495   : > { %3336 = vmatprep.subr.mxu1 %v2699_v37  ;;  %3266 = vmatpush1.msra.mxu0 %v2570_v59  ;;  %v2659_v62 = vld [vmem:[#allocation14 + $0xc78] sm:$0xff]  ;;  %v2530_v36 = vld [vmem:[#allocation14 + $0x870] sm:$0xff] }
 0x496   : > { %3337 = vmatpush1.msra.mxu1 %v2698_v10  ;;  %3267 = vmatprep.subr.mxu0 %v2567_v50  ;;  %v2658_v22 = vld [vmem:[#allocation14 + $0xc70] sm:$0xff]  ;;  %v2527_v23 = vld [vmem:[#allocation14 + $0x858] sm:$0xff] }
 0x497   : > { %3338 = vmatprep.subr.mxu1 %v2695_v55  ;;  %3268 = vmatpush1.msra.mxu0 %v2566_v51  ;;  %v2655_v45 = vld [vmem:[#allocation14 + $0xc58] sm:$0xff]  ;;  %v2526_v46 = vld [vmem:[#allocation14 + $0x850] sm:$0xff] }
 0x498   : > { %3339 = vmatpush1.msra.mxu1 %v2694_v13  ;;  %3269 = vmatprep.subr.mxu0 %v2563_v61  ;;  %v2654_v9 = vld [vmem:[#allocation14 + $0xc50] sm:$0xff]  ;;  %v2523_v60 = vld [vmem:[#allocation14 + $0x838] sm:$0xff] }
 0x499   : > { %3340 = vmatprep.subr.mxu1 %v2691_v7  ;;  %3270 = vmatpush1.msra.mxu0 %v2562_v58  ;;  %v2651_v63 = vld [vmem:[#allocation14 + $0xc38] sm:$0xff]  ;;  %v2522_v0 = vld [vmem:[#allocation14 + $0x830] sm:$0xff] }
 0x49a   : > { %3341 = vmatpush1.msra.mxu1 %v2690_v43  ;;  %3271 = vmatprep.subr.mxu0 %v2559_v6  ;;  %v2650_v42 = vld [vmem:[#allocation14 + $0xc30] sm:$0xff]  ;;  %v2519_v17 = vld [vmem:[#allocation14 + $0x818] sm:$0xff] }
 0x49b   : > { %3342 = vmatprep.subr.mxu1 %v2687_v21  ;;  %3272 = vmatpush1.msra.mxu0 %v2558_v3  ;;  %v2647_v44 = vld [vmem:[#allocation14 + $0xc18] sm:$0xff]  ;;  %v2518_v1 = vld [vmem:[#allocation14 + $0x810] sm:$0xff] }
 0x49c   : > { %3343 = vmatpush1.msra.mxu1 %v2686_v14  ;;  %3273 = vmatprep.subr.mxu0 %v2555_v52  ;;  %v2646_v2 = vld [vmem:[#allocation14 + $0xc10] sm:$0xff]  ;;  %v2643_v54 = vld [vmem:[#allocation14 + $0xbf8] sm:$0xff] }
 0x49d   : > { %3344 = vmatprep.subr.mxu1 %v2683_v15  ;;  %3274 = vmatpush1.msra.mxu0 %v2554_v19  ;;  %v2771_v37 = vld [vmem:[#allocation14 + $0xff8] sm:$0xff]  ;;  %v2642_v59 = vld [vmem:[#allocation14 + $0xbf0] sm:$0xff] }
 0x49e   : > { %3345 = vmatpush1.msra.mxu1 %v2682_v16  ;;  %3275 = vmatprep.subr.mxu0 %v2551_v20  ;;  %v2770_v10 = vld [vmem:[#allocation14 + $0xff0] sm:$0xff]  ;;  %v2639_v50 = vld [vmem:[#allocation14 + $0xbd8] sm:$0xff] }
 0x49f   : > { %3346 = vmatprep.subr.mxu1 %v2679_v49  ;;  %3276 = vmatpush1.msra.mxu0 %v2550_v24  ;;  %v2767_v55 = vld [vmem:[#allocation14 + $0xfd8] sm:$0xff]  ;;  %v2638_v51 = vld [vmem:[#allocation14 + $0xbd0] sm:$0xff] }
 0x4a0   : > { %3347 = vmatpush1.msra.mxu1 %v2678_v29  ;;  %3277 = vmatprep.subr.mxu0 %v2547_v32  ;;  %v2766_v13 = vld [vmem:[#allocation14 + $0xfd0] sm:$0xff]  ;;  %v2635_v61 = vld [vmem:[#allocation14 + $0xbb8] sm:$0xff] }
 0x4a1   : > { %3348 = vmatprep.subr.mxu1 %v2675_v25  ;;  %3278 = vmatpush1.msra.mxu0 %v2546_v30  ;;  %v2763_v7 = vld [vmem:[#allocation14 + $0xfb8] sm:$0xff]  ;;  %v2634_v58 = vld [vmem:[#allocation14 + $0xbb0] sm:$0xff] }
 0x4a2   : > { %3349 = vmatpush1.msra.mxu1 %v2674_v31  ;;  %3279 = vmatprep.subr.mxu0 %v2543_v26  ;;  %v2762_v43 = vld [vmem:[#allocation14 + $0xfb0] sm:$0xff]  ;;  %v2631_v6 = vld [vmem:[#allocation14 + $0xb98] sm:$0xff] }
 0x4a3   : > { %3350 = vmatprep.subr.mxu1 %v2671_v38  ;;  %3280 = vmatpush1.msra.mxu0 %v2542_v35  ;;  %v2759_v21 = vld [vmem:[#allocation14 + $0xf98] sm:$0xff]  ;;  %v2630_v3 = vld [vmem:[#allocation14 + $0xb90] sm:$0xff] }
 0x4a4   : > { %3351 = vmatpush1.msra.mxu1 %v2670_v27  ;;  %3281 = vmatprep.subr.mxu0 %v2539_v41  ;;  %v2758_v14 = vld [vmem:[#allocation14 + $0xf90] sm:$0xff]  ;;  %v2627_v52 = vld [vmem:[#allocation14 + $0xb78] sm:$0xff] }
 0x4a5   : > { %3352 = vmatprep.subr.mxu1 %v2667_v39  ;;  %3282 = vmatpush1.msra.mxu0 %v2538_v34  ;;  %v2755_v15 = vld [vmem:[#allocation14 + $0xf78] sm:$0xff]  ;;  %v2626_v19 = vld [vmem:[#allocation14 + $0xb70] sm:$0xff] }
 0x4a6   : > { %3353 = vmatpush1.msra.mxu1 %v2666_v5  ;;  %3283 = vmatprep.subr.mxu0 %v2535_v47  ;;  %v2754_v16 = vld [vmem:[#allocation14 + $0xf70] sm:$0xff]  ;;  %v2623_v20 = vld [vmem:[#allocation14 + $0xb58] sm:$0xff] }
 0x4a7   : > { %3354 = vmatprep.subr.mxu1 %v2663_v48  ;;  %3284 = vmatpush1.msra.mxu0 %v2534_v40  ;;  %v2751_v49 = vld [vmem:[#allocation14 + $0xf58] sm:$0xff]  ;;  %v2622_v24 = vld [vmem:[#allocation14 + $0xb50] sm:$0xff] }
 0x4a8   : > { %3355 = vmatpush1.msra.mxu1 %v2662_v53  ;;  %3285 = vmatprep.subr.mxu0 %v2531_v56  ;;  %v2750_v29 = vld [vmem:[#allocation14 + $0xf50] sm:$0xff]  ;;  %v2619_v32 = vld [vmem:[#allocation14 + $0xb38] sm:$0xff] }
 0x4a9   : > { %3356 = vmatprep.subr.mxu1 %v2659_v62  ;;  %3286 = vmatpush1.msra.mxu0 %v2530_v36  ;;  %v2747_v25 = vld [vmem:[#allocation14 + $0xf38] sm:$0xff]  ;;  %v2618_v30 = vld [vmem:[#allocation14 + $0xb30] sm:$0xff] }
 0x4aa   : > { %3357 = vmatpush1.msra.mxu1 %v2658_v22  ;;  %3287 = vmatprep.subr.mxu0 %v2527_v23  ;;  %v2746_v31 = vld [vmem:[#allocation14 + $0xf30] sm:$0xff]  ;;  %v2615_v26 = vld [vmem:[#allocation14 + $0xb18] sm:$0xff] }
 0x4ab   : > { %3358 = vmatprep.subr.mxu1 %v2655_v45  ;;  %3288 = vmatpush1.msra.mxu0 %v2526_v46  ;;  %v2743_v38 = vld [vmem:[#allocation14 + $0xf18] sm:$0xff]  ;;  %v2614_v35 = vld [vmem:[#allocation14 + $0xb10] sm:$0xff] }
 0x4ac   : > { %3359 = vmatpush1.msra.mxu1 %v2654_v9  ;;  %3289 = vmatprep.subr.mxu0 %v2523_v60  ;;  %v2742_v27 = vld [vmem:[#allocation14 + $0xf10] sm:$0xff]  ;;  %v2611_v41 = vld [vmem:[#allocation14 + $0xaf8] sm:$0xff] }
 0x4ad   : > { %3360 = vmatprep.subr.mxu1 %v2651_v63  ;;  %3290 = vmatpush1.msra.mxu0 %v2522_v0  ;;  %v2739_v39 = vld [vmem:[#allocation14 + $0xef8] sm:$0xff]  ;;  %v2610_v34 = vld [vmem:[#allocation14 + $0xaf0] sm:$0xff] }
 0x4ae   : > { %3361 = vmatpush1.msra.mxu1 %v2650_v42  ;;  %3291 = vmatprep.subr.mxu0 %v2519_v17  ;;  %v2738_v5 = vld [vmem:[#allocation14 + $0xef0] sm:$0xff]  ;;  %v2607_v47 = vld [vmem:[#allocation14 + $0xad8] sm:$0xff] }
 0x4af   : > { %3362 = vmatprep.subr.mxu1 %v2647_v44  ;;  %3292 = vmatpush1.msra.mxu0 %v2518_v1  ;;  %v2735_v48 = vld [vmem:[#allocation14 + $0xed8] sm:$0xff]  ;;  %v2606_v40 = vld [vmem:[#allocation14 + $0xad0] sm:$0xff] }
 0x4b0   : > { %3363 = vmatpush1.msra.mxu1 %v2646_v2  ;;  %3293 = vmatprep.subr.mxu0 %v2643_v54  ;;  %v2734_v53 = vld [vmem:[#allocation14 + $0xed0] sm:$0xff]  ;;  %v2603_v56 = vld [vmem:[#allocation14 + $0xab8] sm:$0xff] }
 0x4b1   : > { %3364 = vmatprep.subr.mxu1 %v2771_v37  ;;  %3294 = vmatpush2.msra.mxu0 %v2642_v59  ;;  %v2731_v62 = vld [vmem:[#allocation14 + $0xeb8] sm:$0xff]  ;;  %v2602_v36 = vld [vmem:[#allocation14 + $0xab0] sm:$0xff] }
 0x4b2   : > { %3365 = vmatpush2.msra.mxu1 %v2770_v10  ;;  %3295 = vmatprep.subr.mxu0 %v2639_v50  ;;  %v2730_v22 = vld [vmem:[#allocation14 + $0xeb0] sm:$0xff]  ;;  %v2599_v23 = vld [vmem:[#allocation14 + $0xa98] sm:$0xff] }
 0x4b3   : > { %3366 = vmatprep.subr.mxu1 %v2767_v55  ;;  %3296 = vmatpush2.msra.mxu0 %v2638_v51  ;;  %v2727_v45 = vld [vmem:[#allocation14 + $0xe98] sm:$0xff]  ;;  %v2598_v46 = vld [vmem:[#allocation14 + $0xa90] sm:$0xff] }
 0x4b4   : > { %3367 = vmatpush2.msra.mxu1 %v2766_v13  ;;  %3297 = vmatprep.subr.mxu0 %v2635_v61  ;;  %v2726_v9 = vld [vmem:[#allocation14 + $0xe90] sm:$0xff]  ;;  %v2595_v60 = vld [vmem:[#allocation14 + $0xa78] sm:$0xff] }
 0x4b5   : > { %3368 = vmatprep.subr.mxu1 %v2763_v7  ;;  %3298 = vmatpush2.msra.mxu0 %v2634_v58  ;;  %v2723_v63 = vld [vmem:[#allocation14 + $0xe78] sm:$0xff]  ;;  %v2594_v0 = vld [vmem:[#allocation14 + $0xa70] sm:$0xff] }
 0x4b6   : > { %3369 = vmatpush2.msra.mxu1 %v2762_v43  ;;  %3299 = vmatprep.subr.mxu0 %v2631_v6  ;;  %v2722_v42 = vld [vmem:[#allocation14 + $0xe70] sm:$0xff]  ;;  %v2591_v17 = vld [vmem:[#allocation14 + $0xa58] sm:$0xff]  ;;  %v3435_v43 = vld [vmem:[#allocation17 + $0xe0] sm:$0xff] }
 0x4b7   : > { %3370 = vmatprep.subr.mxu1 %v2759_v21  ;;  %3300 = vmatpush2.msra.mxu0 %v2630_v3  ;;  %v2719_v44 = vld [vmem:[#allocation14 + $0xe58] sm:$0xff]  ;;  %v2590_v1 = vld [vmem:[#allocation14 + $0xa50] sm:$0xff] }
 0x4b8   : > { %3371 = vmatpush2.msra.mxu1 %v2758_v14  ;;  %3301 = vmatprep.subr.mxu0 %v2627_v52  ;;  %v2718_v2 = vld [vmem:[#allocation14 + $0xe50] sm:$0xff]  ;;  %v2587_v54 = vld [vmem:[#allocation14 + $0xa38] sm:$0xff] }
 0x4b9   : > { %3372 = vmatprep.subr.mxu1 %v2755_v15  ;;  %3302 = vmatpush2.msra.mxu0 %v2626_v19  ;;  %v2715_v37 = vld [vmem:[#allocation14 + $0xe38] sm:$0xff]  ;;  %v2586_v59 = vld [vmem:[#allocation14 + $0xa30] sm:$0xff] }
 0x4ba   : > { %3373 = vmatpush2.msra.mxu1 %v2754_v16  ;;  %3303 = vmatprep.subr.mxu0 %v2623_v20  ;;  %v2714_v10 = vld [vmem:[#allocation14 + $0xe30] sm:$0xff]  ;;  %v2583_v50 = vld [vmem:[#allocation14 + $0xa18] sm:$0xff] }
 0x4bb   : > { %3374 = vmatprep.subr.mxu1 %v2751_v49  ;;  %3304 = vmatpush2.msra.mxu0 %v2622_v24  ;;  %v2711_v55 = vld [vmem:[#allocation14 + $0xe18] sm:$0xff]  ;;  %v2582_v51 = vld [vmem:[#allocation14 + $0xa10] sm:$0xff]  ;;  %v3495_v49 = vld [vmem:[#allocation17 + $0x2c0] sm:$0xff] }
 0x4bc   : > { %3375 = vmatpush2.msra.mxu1 %v2750_v29  ;;  %3305 = vmatprep.subr.mxu0 %v2619_v32  ;;  %v2710_v13 = vld [vmem:[#allocation14 + $0xe10] sm:$0xff]  ;;  %v3438_v61 = vld [vmem:[#allocation17 + $0xf8] sm:$0xff]  ;;  %v3427_v32 = vld [vmem:[#allocation17 + $0xa0] sm:$0xff] }
 0x4bd   : > { %3376 = vmatprep.subr.mxu1 %v2747_v25  ;;  %3306 = vmatpush2.msra.mxu0 %v2618_v30  ;;  %v3437_v7 = vld [vmem:[#allocation17 + $0xf0] sm:$0xff]  ;;  %v3436_v58 = vld [vmem:[#allocation17 + $0xe8] sm:$0xff]  ;;  %v3434_v6 = vld [vmem:[#allocation17 + $0xd8] sm:$0xff] }
 0x4be   : > { %3377 = vmatpush2.msra.mxu1 %v2746_v31  ;;  %3307 = vmatprep.subr.mxu0 %v2615_v26  ;;  %v3502_v21 = vld [vmem:[#allocation17 + $0x2f8] sm:$0xff]  ;;  %v3501_v3 = vld [vmem:[#allocation17 + $0x2f0] sm:$0xff]  ;;  %v3500_v14 = vld [vmem:[#allocation17 + $0x2e8] sm:$0xff] }
 0x4bf   : > { %3378 = vmatprep.subr.mxu1 %v2743_v38  ;;  %3308 = vmatpush2.msra.mxu0 %v2614_v35  ;;  %v3433_v52 = vld [vmem:[#allocation17 + $0xd0] sm:$0xff]  ;;  %v3432_v15 = vld [vmem:[#allocation17 + $0xc8] sm:$0xff]  ;;  %v3430_v19 = vld [vmem:[#allocation17 + $0xb8] sm:$0xff] }
 0x4c0   : > { %3379 = vmatpush2.msra.mxu1 %v2742_v27  ;;  %3309 = vmatprep.subr.mxu0 %v2611_v41  ;;  %v3496_v16 = vld [vmem:[#allocation17 + $0x2c8] sm:$0xff]  ;;  %v3429_v20 = vld [vmem:[#allocation17 + $0xb0] sm:$0xff]  ;;  %v3494_v29 = vld [vmem:[#allocation17 + $0x2b8] sm:$0xff] }
 0x4c1   : > { %3380 = vmatprep.subr.mxu1 %v2739_v39  ;;  %3310 = vmatpush2.msra.mxu0 %v2610_v34  ;;  %v3428_v24 = vld [vmem:[#allocation17 + $0xa8] sm:$0xff]  ;;  %v3493_v25 = vld [vmem:[#allocation17 + $0x2b0] sm:$0xff]  ;;  %v3426_v30 = vld [vmem:[#allocation17 + $0x98] sm:$0xff] }
 0x4c2   : > { %3381 = vmatpush2.msra.mxu1 %v2738_v5  ;;  %3311 = vmatprep.subr.mxu0 %v2607_v47  ;;  %v3492_v31 = vld [vmem:[#allocation17 + $0x2a8] sm:$0xff]  ;;  %v3425_v26 = vld [vmem:[#allocation17 + $0x90] sm:$0xff]  ;;  %v3491_v38 = vld [vmem:[#allocation17 + $0x2a0] sm:$0xff] }
 0x4c3   : > { %3382 = vmatprep.subr.mxu1 %v2735_v48  ;;  %3312 = vmatpush2.msra.mxu0 %v2606_v40  ;;  %v3424_v35 = vld [vmem:[#allocation17 + $0x88] sm:$0xff]  ;;  %v3490_v27 = vld [vmem:[#allocation17 + $0x298] sm:$0xff]  ;;  %v3423_v41 = vld [vmem:[#allocation17 + $0x80] sm:$0xff] }
 0x4c4   : > { %3383 = vmatpush2.msra.mxu1 %v2734_v53  ;;  %3313 = vmatprep.subr.mxu0 %v2603_v56  ;;  %v3489_v39 = vld [vmem:[#allocation17 + $0x290] sm:$0xff]  ;;  %v3422_v34 = vld [vmem:[#allocation17 + $0x78] sm:$0xff]  ;;  %v3488_v5 = vld [vmem:[#allocation17 + $0x288] sm:$0xff] }
 0x4c5   : > { %3384 = vmatprep.subr.mxu1 %v2731_v62  ;;  %3314 = vmatpush2.msra.mxu0 %v2602_v36  ;;  %v3421_v47 = vld [vmem:[#allocation17 + $0x70] sm:$0xff]  ;;  %v3487_v48 = vld [vmem:[#allocation17 + $0x280] sm:$0xff]  ;;  %v3420_v40 = vld [vmem:[#allocation17 + $0x68] sm:$0xff] }
 0x4c6   : > { %3385 = vmatpush2.msra.mxu1 %v2730_v22  ;;  %3315 = vmatprep.subr.mxu0 %v2599_v23  ;;  %v3486_v53 = vld [vmem:[#allocation17 + $0x278] sm:$0xff]  ;;  %v3419_v56 = vld [vmem:[#allocation17 + $0x60] sm:$0xff]  ;;  %v3485_v62 = vld [vmem:[#allocation17 + $0x270] sm:$0xff] }
 0x4c7   : > { %3386 = vmatprep.subr.mxu1 %v2727_v45  ;;  %3316 = vmatpush2.msra.mxu0 %v2598_v46  ;;  %v3418_v36 = vld [vmem:[#allocation17 + $0x58] sm:$0xff]  ;;  %v3484_v22 = vld [vmem:[#allocation17 + $0x268] sm:$0xff]  ;;  %v3417_v23 = vld [vmem:[#allocation17 + $0x50] sm:$0xff] }
 0x4c8   : > { %3387 = vmatpush2.msra.mxu1 %v2726_v9  ;;  %3317 = vmatprep.subr.mxu0 %v2595_v60  ;;  %v3483_v45 = vld [vmem:[#allocation17 + $0x260] sm:$0xff]  ;;  %v3416_v46 = vld [vmem:[#allocation17 + $0x48] sm:$0xff]  ;;  %v3482_v9 = vld [vmem:[#allocation17 + $0x258] sm:$0xff] }
 0x4c9   : > { %3388 = vmatprep.subr.mxu1 %v2723_v63  ;;  %3318 = vmatpush2.msra.mxu0 %v2594_v0  ;;  %v3415_v60 = vld [vmem:[#allocation17 + $0x40] sm:$0xff]  ;;  %v3481_v63 = vld [vmem:[#allocation17 + $0x250] sm:$0xff]  ;;  %v3414_v0 = vld [vmem:[#allocation17 + $0x38] sm:$0xff] }
 0x4ca   : > { %3389 = vmatpush2.msra.mxu1 %v2722_v42  ;;  %3319 = vmatprep.subr.mxu0 %v2591_v17  ;;  %v3480_v42 = vld [vmem:[#allocation17 + $0x248] sm:$0xff]  ;;  %v3413_v17 = vld [vmem:[#allocation17 + $0x30] sm:$0xff] }
 0x4cb   : > { %3390 = vmatprep.subr.mxu1 %v2719_v44  ;;  %3320 = vmatpush2.msra.mxu0 %v2590_v1  ;;  %v3479_v44 = vld [vmem:[#allocation17 + $0x240] sm:$0xff]  ;;  %v3412_v1 = vld [vmem:[#allocation17 + $0x28] sm:$0xff] }
 0x4cc   : > { %3391 = vmatpush2.msra.mxu1 %v2718_v2  ;;  %3321 = vmatprep.subr.mxu0 %v2587_v54  ;;  %v3478_v2 = vld [vmem:[#allocation17 + $0x238] sm:$0xff]  ;;  %v3411_v54 = vld [vmem:[#allocation17 + $0x20] sm:$0xff] }
 0x4cd   : > { %3392 = vmatprep.subr.mxu1 %v2715_v37  ;;  %3322 = vmatpush2.msra.mxu0 %v2586_v59  ;;  %v3477_v37 = vld [vmem:[#allocation17 + $0x230] sm:$0xff]  ;;  %v3410_v59 = vld [vmem:[#allocation17 + $0x18] sm:$0xff] }
 0x4ce   : > { %3393 = vmatpush2.msra.mxu1 %v2714_v10  ;;  %3323 = vmatprep.subr.mxu0 %v2583_v50  ;;  %v3476_v10 = vld [vmem:[#allocation17 + $0x228] sm:$0xff]  ;;  %v3409_v50 = vld [vmem:[#allocation17 + $0x10] sm:$0xff] }
 0x4cf   : > { %3394 = vmatprep.subr.mxu1 %v2711_v55  ;;  %3324 = vmatpush2.msra.mxu0 %v2582_v51  ;;  %v3475_v55 = vld [vmem:[#allocation17 + $0x220] sm:$0xff]  ;;  %v3408_v51 = vld [vmem:[#allocation17 + $0x8] sm:$0xff] }
 0x4d0   : > { %3325 = vmatprep.mubr.f32.mxu0 %v5466_v18  ;;  %3395 = vmatpush2.msra.mxu1 %v2710_v13  ;;  %v3499_v18 = vld [vmem:[#allocation17 + $0x2e0] sm:$0xff]  ;;  %v3474_v13 = vld [vmem:[#allocation17 + $0x218] sm:$0xff] }
 0x4d1   : > { %3396 = vmatprep.mubr.f32.mxu1 %v5476_v33  ;;  %3326 = vmatmul.mubr.f32.vlgmr.msra.gmra.mxu0 %v5471_v28  ;;  %v3498_v33 = vld [vmem:[#allocation17 + $0x2d8] sm:$0xff]  ;;  %v3431_v28 = vld [vmem:[#allocation17 + $0xc0] sm:$0xff] }
 0x4d2   : > { %3397 = vmatmul.mubr.f32.vlgmr.msra.gmra.mxu1 %v5481_v4  ;;  %3547 = vmatprep.subr.mxu0 %v3438_v61  ;;  %v3497_v4 = vld [vmem:[#allocation17 + $0x2d0] sm:$0xff]  ;;  %v3407_v61 = vld [vmem:[#allocation17] sm:$0xff] }
 0x4d3   : > { %3548 = vmatpush1.msra.mxu0 %v3437_v7  ;;  %3618 = vmatprep.subr.mxu1 %v3502_v21  ;;  %v3473_v7 = vld [vmem:[#allocation17 + $0x210] sm:$0xff]  ;;  %v3471_v21 = vld [vmem:[#allocation17 + $0x200] sm:$0xff] }
 0x4d4   : > { %3549 = vmatprep.subr.mxu0 %v3436_v58  ;;  %3619 = vmatpush1.msra.mxu1 %v3501_v3  ;;  %v3470_v58 = vld [vmem:[#allocation17 + $0x1f8] sm:$0xff]  ;;  %v3468_v3 = vld [vmem:[#allocation17 + $0x1e8] sm:$0xff] }
 0x4d5   : > { %3550 = vmatpush1.msra.mxu0 %v3435_v43  ;;  %3620 = vmatprep.subr.mxu1 %v3500_v14  ;;  %v3472_v43 = vld [vmem:[#allocation17 + $0x208] sm:$0xff]  ;;  %v3534_v14 = vld [vmem:[#allocation17 + $0x3f8] sm:$0xff] }
 0x4d6   : > { %3551 = vmatprep.subr.mxu0 %v3434_v6  ;;  %3621 = vmatpush1.msra.mxu1 %v3499_v18  ;;  %v3469_v6 = vld [vmem:[#allocation17 + $0x1f0] sm:$0xff] }
 0x4d7   : > { %3552 = vmatpush1.msra.mxu0 %v3433_v52  ;;  %3622 = vmatprep.subr.mxu1 %v3498_v33  ;;  %v3467_v52 = vld [vmem:[#allocation17 + $0x1e0] sm:$0xff]  ;;  %v3533_v18 = vld [vmem:[#allocation17 + $0x3f0] sm:$0xff]  ;;  %v3532_v33 = vld [vmem:[#allocation17 + $0x3e8] sm:$0xff] }
 0x4d8   : > { %3553 = vmatprep.subr.mxu0 %v3432_v15  ;;  %3623 = vmatpush1.msra.mxu1 %v3497_v4  ;;  %v3466_v15 = vld [vmem:[#allocation17 + $0x1d8] sm:$0xff]  ;;  %v3531_v4 = vld [vmem:[#allocation17 + $0x3e0] sm:$0xff] }
 0x4d9   : > { %3554 = vmatpush1.msra.mxu0 %v3431_v28  ;;  %3624 = vmatprep.subr.mxu1 %v3496_v16  ;;  %v3465_v28 = vld [vmem:[#allocation17 + $0x1d0] sm:$0xff]  ;;  %v3530_v16 = vld [vmem:[#allocation17 + $0x3d8] sm:$0xff] }
 0x4da   : > { %3555 = vmatprep.subr.mxu0 %v3430_v19  ;;  %3625 = vmatpush1.msra.mxu1 %v3495_v49  ;;  %v3464_v19 = vld [vmem:[#allocation17 + $0x1c8] sm:$0xff]  ;;  %v3529_v49 = vld [vmem:[#allocation17 + $0x3d0] sm:$0xff] }
 0x4db   : > { %3556 = vmatpush1.msra.mxu0 %v3429_v20  ;;  %3626 = vmatprep.subr.mxu1 %v3494_v29  ;;  %v3463_v20 = vld [vmem:[#allocation17 + $0x1c0] sm:$0xff]  ;;  %v3528_v29 = vld [vmem:[#allocation17 + $0x3c8] sm:$0xff] }
 0x4dc   : > { %3557 = vmatprep.subr.mxu0 %v3428_v24  ;;  %3627 = vmatpush1.msra.mxu1 %v3493_v25  ;;  %v3462_v24 = vld [vmem:[#allocation17 + $0x1b8] sm:$0xff]  ;;  %v3527_v25 = vld [vmem:[#allocation17 + $0x3c0] sm:$0xff] }
 0x4dd   : > { %3558 = vmatpush1.msra.mxu0 %v3427_v32  ;;  %3628 = vmatprep.subr.mxu1 %v3492_v31  ;;  %v3461_v32 = vld [vmem:[#allocation17 + $0x1b0] sm:$0xff]  ;;  %v3526_v31 = vld [vmem:[#allocation17 + $0x3b8] sm:$0xff] }
 0x4de   : > { %3559 = vmatprep.subr.mxu0 %v3426_v30  ;;  %3629 = vmatpush1.msra.mxu1 %v3491_v38  ;;  %v3460_v30 = vld [vmem:[#allocation17 + $0x1a8] sm:$0xff]  ;;  %v3525_v38 = vld [vmem:[#allocation17 + $0x3b0] sm:$0xff] }
 0x4df   : > { %3560 = vmatpush1.msra.mxu0 %v3425_v26  ;;  %3630 = vmatprep.subr.mxu1 %v3490_v27  ;;  %v3459_v26 = vld [vmem:[#allocation17 + $0x1a0] sm:$0xff]  ;;  %v3524_v27 = vld [vmem:[#allocation17 + $0x3a8] sm:$0xff] }
 0x4e0   : > { %3561 = vmatprep.subr.mxu0 %v3424_v35  ;;  %3631 = vmatpush1.msra.mxu1 %v3489_v39  ;;  %v3458_v35 = vld [vmem:[#allocation17 + $0x198] sm:$0xff]  ;;  %v3523_v39 = vld [vmem:[#allocation17 + $0x3a0] sm:$0xff] }
 0x4e1   : > { %3562 = vmatpush1.msra.mxu0 %v3423_v41  ;;  %3632 = vmatprep.subr.mxu1 %v3488_v5  ;;  %v3457_v41 = vld [vmem:[#allocation17 + $0x190] sm:$0xff]  ;;  %v3522_v5 = vld [vmem:[#allocation17 + $0x398] sm:$0xff] }
 0x4e2   : > { %3563 = vmatprep.subr.mxu0 %v3422_v34  ;;  %3633 = vmatpush1.msra.mxu1 %v3487_v48  ;;  %v3456_v34 = vld [vmem:[#allocation17 + $0x188] sm:$0xff]  ;;  %v3521_v48 = vld [vmem:[#allocation17 + $0x390] sm:$0xff] }
 0x4e3   : > { %3564 = vmatpush1.msra.mxu0 %v3421_v47  ;;  %3634 = vmatprep.subr.mxu1 %v3486_v53  ;;  %v3455_v47 = vld [vmem:[#allocation17 + $0x180] sm:$0xff]  ;;  %v3520_v53 = vld [vmem:[#allocation17 + $0x388] sm:$0xff] }
 0x4e4   : > { %3565 = vmatprep.subr.mxu0 %v3420_v40  ;;  %3635 = vmatpush1.msra.mxu1 %v3485_v62  ;;  %v3454_v40 = vld [vmem:[#allocation17 + $0x178] sm:$0xff]  ;;  %v3453_v62 = vld [vmem:[#allocation17 + $0x170] sm:$0xff] }
 0x4e5   : > { %3566 = vmatpush1.msra.mxu0 %v3419_v56  ;;  %3636 = vmatprep.subr.mxu1 %v3484_v22  ;;  %v5495_v56 = vld [vmem:[#allocation15] sm:$0xf]  ;;  %v3452_v22 = vld [vmem:[#allocation17 + $0x168] sm:$0xff] }
 0x4e6   : > { %3567 = vmatprep.subr.mxu0 %v3418_v36  ;;  %3637 = vmatpush1.msra.mxu1 %v3483_v45  ;;  %v3519_v36 = vld [vmem:[#allocation17 + $0x380] sm:$0xff]  ;;  %v2901_v45 = vpop.f32.mrf.mxu0 }
 0x4e7   : > { %3568 = vmatpush1.msra.mxu0 %v3417_v23  ;;  %3638 = vmatprep.subr.mxu1 %v3482_v9  ;;  %v3518_v23 = vld [vmem:[#allocation17 + $0x378] sm:$0xff]  ;;  %v3517_v9 = vld [vmem:[#allocation17 + $0x370] sm:$0xff] }
 0x4e8   : > { %3569 = vmatprep.subr.mxu0 %v3416_v46  ;;  %3639 = vmatpush1.msra.mxu1 %v3481_v63  ;;  %v3451_v46 = vld [vmem:[#allocation17 + $0x160] sm:$0xff]  ;;  %v3450_v63 = vld [vmem:[#allocation17 + $0x158] sm:$0xff] }
 0x4e9   : > { %3570 = vmatpush1.msra.mxu0 %v3415_v60  ;;  %3640 = vmatprep.subr.mxu1 %v3480_v42  ;;  %v2818_v60 = vrot.slane %v5495_v56, %v5241_v57  ;;  %v3449_v42 = vld [vmem:[#allocation17 + $0x150] sm:$0xff] }
 0x4ea   : > { %3571 = vmatprep.subr.mxu0 %v3414_v0  ;;  %3641 = vmatpush1.msra.mxu1 %v3479_v44  ;;  %v3516_v0 = vld [vmem:[#allocation17 + $0x368] sm:$0xff]  ;;  %v2822_v44 = vrot.slane %v5495_v56, %v5249_v11 }
 0x4eb   : > { %3572 = vmatpush1.msra.mxu0 %v3413_v17  ;;  %3642 = vmatprep.subr.mxu1 %v3478_v2  ;;  %v3515_v17 = vld [vmem:[#allocation17 + $0x360] sm:$0xff]  ;;  %v3514_v2 = vld [vmem:[#allocation17 + $0x358] sm:$0xff] }
 0x4ec   : > { %3573 = vmatprep.subr.mxu0 %v3412_v1  ;;  %3643 = vmatpush1.msra.mxu1 %v3477_v37  ;;  %v3448_v1 = vld [vmem:[#allocation17 + $0x148] sm:$0xff]  ;;  %v2903_v37 = vpop.f32.mrf.mxu0 }
 0x4ed   : > { %3574 = vmatpush1.msra.mxu0 %v3411_v54  ;;  %3644 = vmatprep.subr.mxu1 %v3476_v10  ;;  %v2972_v54 = vpop.f32.mrf.mxu1  ;;  %v3513_v10 = vld [vmem:[#allocation17 + $0x350] sm:$0xff] }
 0x4ee   : > { %3575 = vmatprep.subr.mxu0 %v3410_v59  ;;  %3645 = vmatpush1.msra.mxu1 %v3475_v55  ;;  %v3447_v59 = vld [vmem:[#allocation17 + $0x140] sm:$0xff]  ;;  %v3446_v55 = vld [vmem:[#allocation17 + $0x138] sm:$0xff] }
 0x4ef   : > { %3576 = vmatpush1.msra.mxu0 %v3409_v50  ;;  %3646 = vmatprep.subr.mxu1 %v3474_v13  ;;  %v2902_v50 = vadd.f32 %v2901_v45, %v2818_v60  ;;  %v2904_v13 = vadd.f32 %v2903_v37, %v2822_v44  ;;  %v3701_v45 = vld [vmem:[%s5662_s11 + $0x50] sm:$0xff]  ;;  %v3715_v60 = vld [vmem:[%s5662_s11 + $0xc0] sm:$0xff] }
 0x4f0   : > { %3577 = vmatprep.subr.mxu0 %v3408_v51  ;;  %3647 = vmatpush1.msra.mxu1 %v3473_v7  ;;  %v3445_v51 = vld [vmem:[#allocation17 + $0x130] sm:$0xff]  ;;  %v2974_v7 = vpop.f32.mrf.mxu1  ;;  %v3695_v37 = vld [vmem:[%s5662_s11 + $0x20] sm:$0xff] }
 0x4f1   : > { %3578 = vmatpush1.msra.mxu0 %v3407_v61  ;;  %3648 = vmatprep.subr.mxu1 %v3472_v43  ;;  %v3444_v61 = vld [vmem:[#allocation17 + $0x128] sm:$0xff]  ;;  %v2973_v43 = vadd.f32 %v2972_v54, %v2902_v50  ;;  %v3697_v44 = vld [vmem:[%s5662_s11 + $0x30] sm:$0xff]  ;;  %v2830_v50 = vrot.slane %v5495_v56, %v5252_v12  ;;  %v3710_v12 = vld [vmem:[%s5662_s11 + $0x98] sm:$0xff] }
 0x4f2   : > { %3579 = vmatprep.subr.mxu0 %v3470_v58  ;;  %3649 = vmatpush1.msra.mxu1 %v3471_v21  ;;  %v3443_v58 = vld [vmem:[#allocation17 + $0x120] sm:$0xff] }
 0x4f3   : > { %3580 = vmatpush2.msra.mxu0 %v3469_v6  ;;  %3650 = vmatprep.subr.mxu1 %v3534_v14  ;;  %v3442_v6 = vld [vmem:[#allocation17 + $0x118] sm:$0xff]  ;;  %v2975_v14 = vadd.f32 %v2974_v7, %v2904_v13  ;;  %v3711_v54 = vld [vmem:[%s5662_s11 + $0xa0] sm:$0xff] }
 0x4f4   : > { %3581 = vmatprep.subr.mxu0 %v3468_v3  ;;  %3651 = vmatpush2.msra.mxu1 %v3533_v18  ;;  %v3441_v3 = vld [vmem:[#allocation17 + $0x110] sm:$0xff]  ;;  %v3440_v18 = vld [vmem:[#allocation17 + $0x108] sm:$0xff] }
 0x4f5   : > { %3582 = vmatpush2.msra.mxu0 %v3467_v52  ;;  %3652 = vmatprep.subr.mxu1 %v3532_v33 }
 0x4f6   : > { %3583 = vmatprep.subr.mxu0 %v3466_v15  ;;  %3653 = vmatpush2.msra.mxu1 %v3531_v4 }
 0x4f7   : > { %3584 = vmatpush2.msra.mxu0 %v3465_v28  ;;  %3654 = vmatprep.subr.mxu1 %v3530_v16  ;;  %v3439_v28 = vld [vmem:[#allocation17 + $0x100] sm:$0xff] }
 0x4f8   : > { %3585 = vmatprep.subr.mxu0 %v3464_v19  ;;  %3655 = vmatpush2.msra.mxu1 %v3529_v49 }
 0x4f9   : > { %3586 = vmatpush2.msra.mxu0 %v3463_v20  ;;  %3656 = vmatprep.subr.mxu1 %v3528_v29  ;;  %v3512_v20 = vld [vmem:[#allocation17 + $0x348] sm:$0xff]  ;;  %v3510_v29 = vld [vmem:[#allocation17 + $0x338] sm:$0xff] }
 0x4fa   : > { %3587 = vmatprep.subr.mxu0 %v3462_v24  ;;  %3657 = vmatpush2.msra.mxu1 %v3527_v25  ;;  %v3511_v24 = vld [vmem:[#allocation17 + $0x340] sm:$0xff]  ;;  %v3509_v25 = vld [vmem:[#allocation17 + $0x330] sm:$0xff] }
 0x4fb   : > { %3588 = vmatpush2.msra.mxu0 %v3461_v32  ;;  %3658 = vmatprep.subr.mxu1 %v3526_v31  ;;  %v3508_v31 = vld [vmem:[#allocation17 + $0x328] sm:$0xff] }
 0x4fc   : > { %3589 = vmatprep.subr.mxu0 %v3460_v30  ;;  %3659 = vmatpush2.msra.mxu1 %v3525_v38  ;;  %v3506_v38 = vld [vmem:[#allocation17 + $0x318] sm:$0xff] }
 0x4fd   : > { %3590 = vmatpush2.msra.mxu0 %v3459_v26  ;;  %3660 = vmatprep.subr.mxu1 %v3524_v27  ;;  %v3507_v26 = vld [vmem:[#allocation17 + $0x320] sm:$0xff]  ;;  %v3504_v27 = vld [vmem:[#allocation17 + $0x308] sm:$0xff] }
 0x4fe   : > { %3591 = vmatprep.subr.mxu0 %v3458_v35  ;;  %3661 = vmatpush2.msra.mxu1 %v3523_v39  ;;  %v3505_v35 = vld [vmem:[#allocation17 + $0x310] sm:$0xff]  ;;  %v3722_v39 = vld [vmem:[%s5662_s11 + $0xf8] sm:$0xff] }
 0x4ff   : > { %3592 = vmatpush2.msra.mxu0 %v3457_v41  ;;  %3662 = vmatprep.subr.mxu1 %v3522_v5  ;;  %v3503_v41 = vld [vmem:[#allocation17 + $0x300] sm:$0xff]  ;;  %v3721_v5 = vld [vmem:[%s5662_s11 + $0xf0] sm:$0xff] }
 0x500   : > { %3593 = vmatprep.subr.mxu0 %v3456_v34  ;;  %3663 = vmatpush2.msra.mxu1 %v3521_v48  ;;  %v3706_v34 = vld [vmem:[%s5662_s11 + $0x78] sm:$0xff]  ;;  %v3720_v48 = vld [vmem:[%s5662_s11 + $0xe8] sm:$0xff] }
 0x501   : > { %3594 = vmatpush2.msra.mxu0 %v3455_v47  ;;  %3664 = vmatprep.subr.mxu1 %v3520_v53  ;;  %v3705_v47 = vld [vmem:[%s5662_s11 + $0x70] sm:$0xff]  ;;  %v3719_v53 = vld [vmem:[%s5662_s11 + $0xe0] sm:$0xff] }
 0x502   : > { %3595 = vmatprep.subr.mxu0 %v3454_v40  ;;  %3665 = vmatpush2.msra.mxu1 %v3519_v36  ;;  %v3704_v40 = vld [vmem:[%s5662_s11 + $0x68] sm:$0xff]  ;;  %v3718_v36 = vld [vmem:[%s5662_s11 + $0xd8] sm:$0xff] }
 0x503   : > { %3596 = vmatpush2.msra.mxu0 %v3453_v62  ;;  %3666 = vmatprep.subr.mxu1 %v3518_v23  ;;  %v3703_v62 = vld [vmem:[%s5662_s11 + $0x60] sm:$0xff]  ;;  %v3717_v23 = vld [vmem:[%s5662_s11 + $0xd0] sm:$0xff] }
 0x504   : > { %3597 = vmatprep.subr.mxu0 %v3452_v22  ;;  %3667 = vmatpush2.msra.mxu1 %v3517_v9  ;;  %v3702_v22 = vld [vmem:[%s5662_s11 + $0x58] sm:$0xff]  ;;  %v3700_v9 = vld [vmem:[%s5662_s11 + $0x48] sm:$0xff] }
 0x505   : > { %3598 = vmatpush2.msra.mxu0 %v3451_v46  ;;  %3668 = vmatprep.subr.mxu1 %v3516_v0  ;;  %v3716_v46 = vld [vmem:[%s5662_s11 + $0xc8] sm:$0xff]  ;;  %v3714_v0 = vld [vmem:[%s5662_s11 + $0xb8] sm:$0xff] }
 0x506   : > { %3599 = vmatprep.subr.mxu0 %v3450_v63  ;;  %3669 = vmatpush2.msra.mxu1 %v3515_v17  ;;  %v3699_v63 = vld [vmem:[%s5662_s11 + $0x40] sm:$0xff]  ;;  %v3713_v17 = vld [vmem:[%s5662_s11 + $0xb0] sm:$0xff] }
 0x507   : > { %3600 = vmatpush2.msra.mxu0 %v3449_v42  ;;  %3670 = vmatprep.subr.mxu1 %v3514_v2  ;;  %v3698_v42 = vld [vmem:[%s5662_s11 + $0x38] sm:$0xff]  ;;  %v3696_v2 = vld [vmem:[%s5662_s11 + $0x28] sm:$0xff] }
 0x508   : > { %3601 = vmatprep.subr.mxu0 %v3448_v1  ;;  %3671 = vmatpush2.msra.mxu1 %v3513_v10  ;;  %v3712_v1 = vld [vmem:[%s5662_s11 + $0xa8] sm:$0xff]  ;;  %v2826_v10 = vrot.slane %v5495_v56, %v5244_v8  ;;  %v3694_v56 = vld [vmem:[%s5662_s11 + $0x18] sm:$0xff] }
 0x509   : > { %3602 = vmatpush2.msra.mxu0 %v3447_v59  ;;  %3672 = vmatprep.subr.mxu1 %v3512_v20  ;;  %v3692_v20 = vld [vmem:[%s5662_s11 + $0x8] sm:$0xff] }
 0x50a   : > { %3603 = vmatprep.subr.mxu0 %v3446_v55  ;;  %3673 = vmatpush2.msra.mxu1 %v3511_v24  ;;  %v3691_v24 = vld [vmem:[%s5662_s11] sm:$0xff] }
 0x50b   : > { %3604 = vmatpush2.msra.mxu0 %v3445_v51  ;;  %3674 = vmatprep.subr.mxu1 %v3510_v29  ;;  %v3535_v29 = vld [vmem:[#allocation18] sm:$0x3] }
 0x50c   : > { %3605 = vmatprep.subr.mxu0 %v3444_v61  ;;  %3675 = vmatpush2.msra.mxu1 %v3509_v25  ;;  %v3540_v25 = vrot.slane %v3535_v29, %v5241_v57 }
 0x50d   : > { %v3043_v21 = vpop.f32.mrf.mxu0  ;;  %3606 = vmatpush2.msra.mxu0 %v3443_v58  ;;  %3676 = vmatprep.subr.mxu1 %v3508_v31 }
 0x50e   : > { %v3044_v52 = vadd.f32 %v3043_v21, %v2973_v43  ;;  %3607 = vmatprep.subr.mxu0 %v3442_v6  ;;  %3677 = vmatpush2.msra.mxu1 %v3507_v26 }
 0x50f   : > { %v3114_v15 = vpop.f32.mrf.mxu1  ;;  %v3045_v33 = vpop.f32.mrf.mxu0  ;;  %3608 = vmatpush2.msra.mxu0 %v3441_v3  ;;  %3678 = vmatprep.subr.mxu1 %v3506_v38 }
 0x510   : > { %v3046_v4 = vadd.f32 %v3045_v33, %v2975_v14  ;;  %v3115_v19 = vadd.f32 %v3114_v15, %v3044_v52  ;;  %3609 = vmatprep.subr.mxu0 %v3440_v18  ;;  %3679 = vmatpush2.msra.mxu1 %v3505_v35 }
 0x511   : > { %v3116_v16 = vpop.f32.mrf.mxu1  ;;  %3610 = vmatpush2.msra.mxu0 %v3439_v28  ;;  %3680 = vmatprep.subr.mxu1 %v3504_v27 }
 0x512   : > { %v3117_v49 = vadd.f32 %v3116_v16, %v3046_v4  ;;  %v3403_v30 = vmax.f32 %v3115_v19, 0.0  ;;  %3681 = vmatpush2.msra.mxu1 %v3503_v41  ;;  %4138 = vmatprep.subr.mxu0 %v3722_v39  ;;  %v3709_v4 = vld [vmem:[%s5662_s11 + $0x90] sm:$0xff]  ;;  %v3708_v16 = vld [vmem:[%s5662_s11 + $0x88] sm:$0xff] }
 0x513   : > { %v3693_v19 = vld [vmem:[%s5662_s11 + $0x10] sm:$0xff] }
 0x514   : > { %v3404_v32 = vmax.f32 %v3117_v49, 0.0  ;;  %v3707_v49 = vld [vmem:[%s5662_s11 + $0x80] sm:$0xff] }
 0x516   : > { %3611 = vmatprep.mubr.f32.mxu0 %v3404_v32 }
 0x517   : > { %3612 = vmatmul.mubr.f32.vlgmr.msra.gmra.mxu0 %v3403_v30  ;;  %v3544_v30 = vrot.slane %v3535_v29, %v5249_v11 }
 0x518   : > { %4139 = vmatpush3.msra.mxu0 %v3706_v34 }
 0x519   : > { %4140 = vmatprep.subr.mxu0 %v3721_v5 }
 0x51a   : > { %4141 = vmatpush3.msra.mxu0 %v3705_v47 }
 0x51b   : > { %4142 = vmatprep.subr.mxu0 %v3720_v48  ;;  %v3723_v48 = vld [vmem:[#allocation20] sm:$0x1] }
 0x51c   : > { %4143 = vmatpush3.msra.mxu0 %v3704_v40 }
 0x51d   : > { %4144 = vmatprep.subr.mxu0 %v3719_v53 }
 0x51e   : > { %4145 = vmatpush3.msra.mxu0 %v3703_v62 }
 0x51f   : > { %4146 = vmatprep.subr.mxu0 %v3718_v36 }
 0x520   : > { %4147 = vmatpush3.msra.mxu0 %v3702_v22 }
 0x521   : > { %4148 = vmatprep.subr.mxu0 %v3717_v23 }
 0x522   : > { %4149 = vmatpush3.msra.mxu0 %v3701_v45 }
 0x523   : > { %4150 = vmatprep.subr.mxu0 %v3716_v46 }
 0x524   : > { %4151 = vmatpush3.msra.mxu0 %v3700_v9 }
 0x525   : > { %4152 = vmatprep.subr.mxu0 %v3715_v60 }
 0x526   : > { %4153 = vmatpush3.msra.mxu0 %v3699_v63 }
 0x527   : > { %4154 = vmatprep.subr.mxu0 %v3714_v0 }
 0x528   : > { %4155 = vmatpush3.msra.mxu0 %v3698_v42 }
 0x529   : > { %4156 = vmatprep.subr.mxu0 %v3713_v17 }
 0x52a   : > { %4157 = vmatpush3.msra.mxu0 %v3697_v44 }
 0x52b   : > { %4158 = vmatprep.subr.mxu0 %v3712_v1 }
 0x52c   : > { %4159 = vmatpush3.msra.mxu0 %v3696_v2 }
 0x52d   : > { %4160 = vmatprep.subr.mxu0 %v3711_v54 }
 0x52e   : > { %4161 = vmatpush3.msra.mxu0 %v3695_v37 }
 0x52f   : > { %4162 = vmatprep.subr.mxu0 %v3710_v12 }
 0x530   : > { %4163 = vmatpush3.msra.mxu0 %v3694_v56 }
 0x531   : > { %4164 = vmatprep.subr.mxu0 %v3709_v4 }
 0x532   : > { %4165 = vmatpush3.msra.mxu0 %v3693_v19 }
 0x533   : > { %4166 = vmatprep.subr.mxu0 %v3708_v16 }
 0x534   : > { %4167 = vmatpush3.msra.mxu0 %v3692_v20 }
 0x535   : > { %4168 = vmatprep.subr.mxu0 %v3707_v49 }
 0x536   : > { %4169 = vmatpush3.msra.mxu0 %v3691_v24 }
 0x54f   : > { %v3185_v59 = vpop.f32.mrf.mxu0 }
 0x550   : > { %v3186_v13 = vadd.f32 %v3185_v59, %v2826_v10 }
 0x551   : > { %v3256_v55 = vpop.f32.mrf.mxu1  ;;  %v3187_v51 = vpop.f32.mrf.mxu0 }
 0x552   : > { %v3188_v61 = vadd.f32 %v3187_v51, %v2830_v50  ;;  %v3257_v58 = vadd.f32 %v3256_v55, %v3186_v13 }
 0x553   : > { %v3258_v7 = vpop.f32.mrf.mxu1 }
 0x554   : > { %v3259_v21 = vadd.f32 %v3258_v7, %v3188_v61 }
 0x591   : > { %v3327_v43 = vpop.f32.mrf.mxu0 }
 0x592   : > { %v3398_v6 = vpop.f32.mrf.mxu1  ;;  %v3328_v3 = vadd.f32 %v3327_v43, %v3257_v58 }
 0x593   : > { %v3329_v14 = vpop.f32.mrf.mxu0 }
 0x594   : > { %v3330_v52 = vadd.f32 %v3329_v14, %v3259_v21  ;;  %v3399_v18 = vadd.f32 %v3398_v6, %v3328_v3  ;;  %v3400_v15 = vpop.f32.mrf.mxu1 }
 0x596   : > { %v3401_v33 = vadd.f32 %v3400_v15, %v3330_v52  ;;  %v3405_v8 = vmax.f32 %v3399_v18, 0.0 }
 0x598   : > { %v3406_v28 = vmax.f32 %v3401_v33, 0.0 }
 0x59a   : > { %3682 = vmatprep.mubr.f32.mxu1 %v3406_v28 }
 0x59b   : > { %3683 = vmatmul.mubr.f32.vlgmr.msra.gmra.mxu1 %v3405_v8 }
 0x5d7   : > { %v3613_v32 = vpop.f32.mrf.mxu0 }
 0x5d8   : > { %v3614_v26 = vadd.f32 %v3613_v32, %v3540_v25 }
 0x5d9   : > { %v3615_v31 = vpop.f32.mrf.mxu0 }
 0x5da   : > { %v3616_v35 = vadd.f32 %v3615_v31, %v3544_v30 }
 0x65b   : > { %v3684_v38 = vpop.f32.mrf.mxu1 }
 0x65c   : > { %v3685_v27 = vadd.f32 %v3684_v38, %v3614_v26 }
 0x65d   : > { %v3686_v41 = vpop.f32.mrf.mxu1 }
 0x65e   : > { %v3687_v39 = vadd.f32 %v3686_v41, %v3616_v35  ;;  %v3689_v5 = vmax.f32 %v3685_v27, 0.0 }
 0x660   : > { %v3690_v34 = vmax.f32 %v3687_v39, 0.0 }
 0x662   : > { %3788 = vmatprep.mubr.f32.mxu0 %v3690_v34 }
 0x663   : > { %3789 = vmatmul.mubr.f32.vlgmr.msra.gmra.mxu0 %v3689_v5 }
 0x723   : > { %v4170_v47 = vpop.f32.mrf.mxu0 }
 0x725   : > { %v4171_v40 = vpop.f32.mrf.mxu0 }
 0x726   : > { %v4172_v53 = vadd.f32 %v4171_v40, %v4170_v47 }
 0x728   : > { %v3791_v57 = vadd.f32 %v4172_v53, %v3723_v48 }
 0x72a   : > { %3795 = vst.msk [vmem:[%s5432_s25] sm:$0x1] %vm3794_vm4, %v3791_v57 }
 0x72b PF: > { %s4114_s18 = sshll.u32 %s4809_s29, 4  ;;  %s3809_s22 = sshll.u32 %s5432_s25, 4  ;;  %s3810_s22 = int_to_ptr.vmem [resolvable:$true] %s3809_s22 }
 0x72c   : > { %s3807_s15 = scalar_lea.hbm %s5664_s13, %s4114_s18  ;;  %s3797_s24 = scalar_lea.sflag [#allocation5], %s600_s30 }
 0x72d   : > { %s4705_s28 = scalar_lea.vmem %s3810_s22, 16  ;;  %p5698_p2 = scmp.ne.s32.totalorder %s5685_s21, 0 }
 0x72e   : > { %p4706_p12 = scmp.ne.s32.totalorder %s3810_s22, %s4705_s28  ;;  %s4844_s19 = smov [#allocation21]  }
 0x72f   : > { %s4709_s27 = sshll.u32 %s4844_s19, 4  ;;  %s4710_s27 = int_to_ptr.vmem [resolvable:$false] %s4709_s27 }
 0x730   : > { %p4707_p10 = pnand %p4706_p12, %p5698_p2  ;;  %s4711_s20 = scalar_lea.vmem %s4710_s27, 32 }
 0x731   : > { %p4712_p6 = scmp.lt.s32.totalorder %s3810_s22, %s4710_s27  ;;  %p4713_p9 = scmp.lt.s32.totalorder %s4711_s20, %s4705_s28 }
 0x732   : > { %p4708_p4 = pneg %p4707_p10 }
 0x733   : > { %p4714_p5 = por %p4713_p9, %p4712_p6 }
 0x735   : > { %p4715_p7 = pnand %p4714_p5, %p4708_p4 }
 0x737   : > { %4718 = shalt.err (!%p4715_p7)
}
 0x738   : > { %s4719_s29 = scalar_lea.hbm %s3807_s15, 16  ;;  %s4723_s2 = scalar_lea.hbm %s5664_s13, 32 }
 0x739   : > { %p4720_p3 = scmp.ne.s32.totalorder %s3807_s15, %s4719_s29  ;;  %p4724_p1 = scmp.lt.s32.totalorder %s3807_s15, %s5664_s13 }
 0x73a   : > { %p4725_p8 = scmp.lt.s32.totalorder %s4723_s2, %s4719_s29 }
 0x73b   : > { %p4721_p13 = pnand %p4720_p3, %p5698_p2 }
 0x73c   : > { %p4726_p11 = por %p4725_p8, %p4724_p1 }
 0x73d   : > { %p4722_p0 = pneg %p4721_p13 }
 0x73f   : > { %p4727_p12 = pnand %p4726_p11, %p4722_p0 }
 0x741   : > { %4730 = shalt.err (!%p4727_p12)
}
 0x742   : > { %4259 = dma.vmem_to_hbm [thread:$0]  (%p5698_p2), %s3810_s22, 16, %s3807_s15, %s3797_s24  }
 0x743 PF: > { %s5699_s16 = sld [smem:[#allocation33_spill]] }
 0x744   : > { %s5700_s18 = sld [smem:[#allocation29_spill]] }
 0x745   : > { %s5701_s17 = sld [smem:[#allocation36_spill]] }
 0x749   : > { %p4321_p10 = scmp.ge.s32.totalorder %s5699_s16, 2 }
 0x74a   : > { %s3821_s1 = sand.u32 1, %s5700_s18  }
 0x74b   : > { %p5702_p4 = scmp.ne.s32.totalorder %s5701_s17, 0  ;;  %s3822_s28 = scalar_lea.sflag [#allocation5], %s3821_s1 }
 0x74d   : > { %p4296_p6 = pnand %p4321_p10, %p5702_p4 }
 0x74f   : > { %p4297_p9 = pneg %p4296_p6 }
 0x751   : > { %4788 = dma.done.wait (%p4297_p9), %s3822_s28, 16  }
 0x752   : > { %4790 = vsyncadd (%p4297_p9), %s3822_s28, 4294967280  ;;  %s32_s15 = sadd.s32 1, %s5699_s16   ;;  %s5703_s19 = sld [smem:[#allocation30_spill]] }
 0x753   : > { %p29_p5 = scmp.ge.s32.totalorder %s32_s15, 6   ;;  %s5704_s27 = sld [smem:[#allocation37_spill]] }
 0x754   : > { %s5705_s28 = sld [smem:[#allocation31_spill]]  ;;  %s5709_s25 = smov %s4797_s26 }
 0x755   : > { %s5706_s29 = sld [smem:[#allocation32_spill]]  ;;  %31 = sbr.rel (!%p29_p5) target bundleno = 14 (0xe), region = 160 }
 0x756   : > { %s5707_s30 = sld [smem:[#allocation34_spill]] }
 0x757   : > { %s5708_s14 = sld [smem:[#allocation35_spill]] }
 0x758   : > { %s5710_s26 = smov %s5703_s19 }
 0x75a   :  { %3826 = vsyncpa [#allocation4], 1 }
 0x75b   :  { %3828 = vsyncpa [#allocation4 + $0x1], 1 }
 0x75c   :  { %3829 = vsyncpa [#allocation7], 1 }
 0x75d   :  { %3830 = vsyncpa [#allocation10], 1 }
 0x75e   :  { %3831 = vsyncpa [#allocation13], 1 }
 0x75f   :  { %3832 = vsyncpa [#allocation16], 1 }
 0x760   :  { %3833 = vsyncpa [#allocation19], 1 }
 0x761   :  { %3834 = vsyncpa [#allocation5], 1 }
 0x762   :  { %3836 = vsyncpa [#allocation5 + $0x1], 1 }

</bundles_post_ra>
